<compile_context>
chip_gen: v7x
topology: tpu7x:2x2x1
jax: 0.10.0
libtpu: 0.0.40
codegen_flags: <defaults>
</compile_context>

<pallas_src>
import jax
import jax.numpy as jnp
from jax import lax
from jax.experimental import pallas as pl
from jax.experimental.pallas import tpu as pltpu

EMB_DIMS = 64          # emb_dims (module default is 512; kept small for the test)
C_PRE = 1024           # prepool conv output channels (fixed by module)
N_GROUPS = 16          # GroupNorm(16, 1024)
GROUP_SIZE = C_PRE // N_GROUPS
EPS = 1e-5


def s_weight_kernel(src_ref, tgt_ref, wc_ref, bcs_ref, bct_ref,
                    gmat_ref, gmatT_ref, gamma_ref, gbeta_ref,
                    w1_ref, b1_ref, w2_ref, b2_ref, w3_ref, b3_ref,
                    out_ref):
    Bt, N, D = src_ref.shape
    bf = jnp.bfloat16

    # --- prepool Conv1d(k=1) as one batched matmul per half (M = Bt*N) -------
    # Constant pad channel is folded into the per-half bias (src:+0, tgt:+wc_pad).
    wc = wc_ref[...]                                                    # (D, 1024) bf16
    xs = src_ref[...].reshape(Bt * N, D).astype(bf)                     # layout-free merge (N % 8 == 0)
    xt = tgt_ref[...].reshape(Bt * N, D).astype(bf)
    hs = jnp.dot(xs, wc, preferred_element_type=jnp.float32) + bcs_ref[...]   # (Bt*N, 1024) f32
    ht = jnp.dot(xt, wc, preferred_element_type=jnp.float32) + bct_ref[...]   # (Bt*N, 1024) f32
    hs3 = hs.reshape(Bt, N, C_PRE)
    ht3 = ht.reshape(Bt, N, C_PRE)

    # --- GroupNorm(16, 1024): per-batch stats over all 2N points -------------
    s1 = jnp.sum(hs3, axis=1) + jnp.sum(ht3, axis=1)                    # (Bt, 1024)
    s2 = jnp.sum(hs3 * hs3, axis=1) + jnp.sum(ht3 * ht3, axis=1)        # (Bt, 1024)
    inv_cnt = 1.0 / (2.0 * N * GROUP_SIZE)
    mean_g = jnp.dot(s1, gmat_ref[...], preferred_element_type=jnp.float32) * inv_cnt   # (Bt, 16)
    ex2_g = jnp.dot(s2, gmat_ref[...], preferred_element_type=jnp.float32) * inv_cnt    # (Bt, 16)
    var_g = jnp.maximum(ex2_g - mean_g * mean_g, 0.0)                   # clamp f32 cancellation
    inv_g = lax.rsqrt(var_g + EPS)
    mean_c = jnp.dot(mean_g, gmatT_ref[...], preferred_element_type=jnp.float32)  # (Bt, 1024)
    inv_c = jnp.dot(inv_g, gmatT_ref[...], preferred_element_type=jnp.float32)    # (Bt, 1024)
    gn_scale = gamma_ref[...] * inv_c                                   # (Bt, 1024)
    gn_shift = gbeta_ref[...] - mean_c * gn_scale                       # (Bt, 1024)

    # --- fused GN-affine + ReLU + AdaptiveMaxPool1d(1) over points -----------
    sc3 = gn_scale[:, None, :]
    sh3 = gn_shift[:, None, :]
    pooled_s = jnp.max(jnp.maximum(hs3 * sc3 + sh3, 0.0), axis=1)       # (Bt, 1024)
    pooled_t = jnp.max(jnp.maximum(ht3 * sc3 + sh3, 0.0), axis=1)       # (Bt, 1024)
    pooled = jnp.maximum(pooled_s, pooled_t)                            # (Bt, 1024)

    # --- postpool MLP, batched over Bt rows (no activations in the module) ---
    h1 = jnp.dot(pooled.astype(bf), w1_ref[...],
                 preferred_element_type=jnp.float32) + b1_ref[...]      # (Bt, 512)
    h2 = jnp.dot(h1.astype(bf), w2_ref[...],
                 preferred_element_type=jnp.float32) + b2_ref[...]      # (Bt, 256)
    raw = jnp.sum(h2 * w3_ref[...], axis=1, keepdims=True) + b3_ref[...]  # (Bt, 1)

    # --- softplus (numerically stable) ----------------------------------------
    out_ref[...] = jnp.maximum(raw, 0.0) + jnp.log1p(jnp.exp(-jnp.abs(raw)))


def _pick_bt(B, N, budget_rows=1024):
    """Batch-tile size: merge Bt batch elements so the prepool matmul has a
    large M dim, while keeping the two (Bt*N, 1024) f32 activation tiles
    within a conservative VMEM budget (fits v7x's smaller VMEM)."""
    if N % 8 != 0:
        # TODO(synk): general N would need masked stats; keep Bt=1 so in-kernel
        # leading-dim reshapes stay layout-free.
        return 1
    if B * N <= budget_rows:
        return B
    divs = [d for d in range(1, B + 1) if B % d == 0 and d * N <= budget_rows]
    mult8 = [d for d in divs if d % 8 == 0]   # keeps the (Bt,1) output block tile-aligned
    return max(mult8) if mult8 else max(divs)


def init_params(emb_dims=EMB_DIMS, seed=42):
    cin = emb_dims + 1
    key = jax.random.PRNGKey(seed)
    ks = jax.random.split(key, 8)

    def uinit(k, shape, fan_in):
        bound = 1.0 / (fan_in ** 0.5)
        return jax.random.uniform(k, shape, jnp.float32, -bound, bound)

    p = {
        # Conv1d(cin, 1024, 1): PyTorch weight (1024, cin, 1) stored transposed (cin, 1024)
        "wc": uinit(ks[0], (cin, C_PRE), cin),
        "bc": uinit(ks[1], (1, C_PRE), cin),
        # GroupNorm affine (PyTorch defaults)
        "gamma": jnp.ones((1, C_PRE), jnp.float32),
        "gbeta": jnp.zeros((1, C_PRE), jnp.float32),
        # Linear layers (stored as (in, out); w3 as a (1, 256) row)
        "w1": uinit(ks[2], (C_PRE, 512), C_PRE),
        "b1": uinit(ks[3], (1, 512), C_PRE),
        "w2": uinit(ks[4], (512, 256), 512),
        "b2": uinit(ks[5], (1, 256), 512),
        "w3": uinit(ks[6], (1, 256), 256),
        "b3": uinit(ks[7], (1, 1), 256),
    }
    ch = jnp.arange(C_PRE) // GROUP_SIZE
    g = jnp.arange(N_GROUPS)
    gmat = (ch[:, None] == g[None, :]).astype(jnp.float32)      # (1024, 16)
    p["gmat"] = gmat
    p["gmatT"] = gmat.T
    return p


def s_weight_forward(src, tgt, p):
    B, N, D = src.shape
    assert tgt.shape == (B, N, D)
    bf = jnp.bfloat16

    # Fold the constant pad channel into a per-half conv bias (kills pad+concat).
    wc_s = p["wc"][:D].astype(bf)                 # (D, 1024) bf16 (shared weight, no pad row)
    bcs = p["bc"]                                 # (1, 1024) f32  — src half (pad value 0)
    bct = p["bc"] + p["wc"][D:D + 1]              # (1, 1024) f32  — tgt half (pad value 1)
    w1 = p["w1"].astype(bf)
    w2 = p["w2"].astype(bf)

    Bt = _pick_bt(B, N)
    grid = (B // Bt,)
    full2 = lambda g: (0, 0)

    out = pl.pallas_call(
        s_weight_kernel,
        out_shape=jax.ShapeDtypeStruct((B, 1), jnp.float32),
        grid=grid,
        in_specs=[
            pl.BlockSpec((Bt, N, D), lambda g: (g, 0, 0)),        # src
            pl.BlockSpec((Bt, N, D), lambda g: (g, 0, 0)),        # tgt
            pl.BlockSpec((D, C_PRE), full2),                      # conv weight (bf16)
            pl.BlockSpec((1, C_PRE), full2),                      # bias, src half
            pl.BlockSpec((1, C_PRE), full2),                      # bias, tgt half
            pl.BlockSpec((C_PRE, N_GROUPS), full2),               # channel->group one-hot
            pl.BlockSpec((N_GROUPS, C_PRE), full2),               # group->channel expand
            pl.BlockSpec((1, C_PRE), full2),                      # gamma
            pl.BlockSpec((1, C_PRE), full2),                      # gbeta
            pl.BlockSpec((C_PRE, 512), full2),                    # w1 (bf16)
            pl.BlockSpec((1, 512), full2),                        # b1
            pl.BlockSpec((512, 256), full2),                      # w2 (bf16)
            pl.BlockSpec((1, 256), full2),                        # b2
            pl.BlockSpec((1, 256), full2),                        # w3
            pl.BlockSpec((1, 1), full2),                          # b3
        ],
        out_specs=pl.BlockSpec((Bt, 1), lambda g: (g, 0)),
        compiler_params=pltpu.CompilerParams(
            dimension_semantics=("parallel",),
            vmem_limit_bytes=48 * 1024 * 1024),
    )(src, tgt, wc_s, bcs, bct, p["gmat"], p["gmatT"], p["gamma"], p["gbeta"],
      w1, p["b1"], w2, p["b2"], p["w3"], p["b3"])
    return out[:, 0]                                              # beta: (B,)


def s_weight_reference_f32(src, tgt, p):
    """Pure-f32 JAX reference mirroring the PyTorch module exactly."""
    src_p = jnp.pad(src, ((0, 0), (0, 0), (0, 1)), constant_values=0.0)
    tgt_p = jnp.pad(tgt, ((0, 0), (0, 0), (0, 1)), constant_values=1.0)
    x = jnp.concatenate([src_p, tgt_p], axis=1)                   # (B, L, cin)
    h = jnp.einsum("blc,co->blo", x, p["wc"]) + p["bc"]           # (B, L, 1024)
    B, L, _ = h.shape
    hg = h.reshape(B, L, N_GROUPS, GROUP_SIZE)
    mean = hg.mean(axis=(1, 3), keepdims=True)
    var = ((hg - mean) ** 2).mean(axis=(1, 3), keepdims=True)
    hn = ((hg - mean) / jnp.sqrt(var + EPS)).reshape(B, L, C_PRE)
    hn = hn * p["gamma"] + p["gbeta"]
    pooled = jnp.max(jnp.maximum(hn, 0.0), axis=1)                # (B, 1024)
    h1 = pooled @ p["w1"] + p["b1"]
    h2 = h1 @ p["w2"] + p["b2"]
    raw = h2 @ p["w3"].T + p["b3"]                                # (B, 1)
    return jax.nn.softplus(raw[:, 0])


def s_weight_reference_mixed(src, tgt, p):
    """Reference with the same bf16-input / f32-accumulate matmuls as the kernel."""
    bf = jnp.bfloat16
    D = src.shape[-1]
    wc = p["wc"][:D].astype(bf)
    bcs = p["bc"]
    bct = p["bc"] + p["wc"][D:D + 1]
    hs = jnp.einsum("bnd,do->bno", src.astype(bf), wc,
                    preferred_element_type=jnp.float32) + bcs
    ht = jnp.einsum("bnd,do->bno", tgt.astype(bf), wc,
                    preferred_element_type=jnp.float32) + bct
    h = jnp.concatenate([hs, ht], axis=1)                         # (B, 2N, 1024)
    B, L, _ = h.shape
    hg = h.reshape(B, L, N_GROUPS, GROUP_SIZE)
    mean = hg.mean(axis=(1, 3), keepdims=True)
    var = jnp.maximum((hg * hg).mean(axis=(1, 3), keepdims=True) - mean * mean, 0.0)
    hn = ((hg - mean) * lax.rsqrt(var + EPS)).reshape(B, L, C_PRE)
    hn = hn * p["gamma"] + p["gbeta"]
    pooled = jnp.max(jnp.maximum(hn, 0.0), axis=1)
    h1 = jnp.dot(pooled.astype(bf), p["w1"].astype(bf),
                 preferred_element_type=jnp.float32) + p["b1"]
    h2 = jnp.dot(h1.astype(bf), p["w2"].astype(bf),
                 preferred_element_type=jnp.float32) + p["b2"]
    raw = jnp.sum(h2 * p["w3"], axis=1, keepdims=True) + p["b3"]
    return jax.nn.softplus(raw[:, 0])


if __name__ == "__main__":
    B, N = 2, 8
    key = jax.random.PRNGKey(0)
    ksrc, ktgt = jax.random.split(key)
    src = jax.random.normal(ksrc, (B, N, EMB_DIMS), jnp.float32)
    tgt = jax.random.normal(ktgt, (B, N, EMB_DIMS), jnp.float32)

    params = init_params(EMB_DIMS)

    beta = s_weight_forward(src, tgt, params)
    jax.block_until_ready(beta)

    beta_mixed = s_weight_reference_mixed(src, tgt, params)
    beta_f32 = s_weight_reference_f32(src, tgt, params)

    assert beta.shape == (B,)
    # tight check vs. a reference with identical mixed precision
    assert jnp.allclose(beta, beta_mixed, rtol=2e-3, atol=2e-3), (beta, beta_mixed)
    # looser check vs. the exact f32 PyTorch-style reference (bf16 MXU rounding)
    assert jnp.allclose(beta, beta_f32, rtol=5e-2, atol=5e-2), (beta, beta_f32)

    print("KERNEL_OK")
</pallas_src>

<mosaic_0001>
module attributes {stable_mosaic.version = 11 : i64} {
  func.func @s_weight_kernel(%arg0: i32, %arg1: memref<2x8x64xf32, #tpu.memory_space<vmem>>, %arg2: memref<2x8x64xf32, #tpu.memory_space<vmem>>, %arg3: memref<64x1024xbf16, #tpu.memory_space<vmem>>, %arg4: memref<1x1024xf32, #tpu.memory_space<vmem>>, %arg5: memref<1x1024xf32, #tpu.memory_space<vmem>>, %arg6: memref<1024x16xf32, #tpu.memory_space<vmem>>, %arg7: memref<16x1024xf32, #tpu.memory_space<vmem>>, %arg8: memref<1x1024xf32, #tpu.memory_space<vmem>>, %arg9: memref<1x1024xf32, #tpu.memory_space<vmem>>, %arg10: memref<1024x512xbf16, #tpu.memory_space<vmem>>, %arg11: memref<1x512xf32, #tpu.memory_space<vmem>>, %arg12: memref<512x256xbf16, #tpu.memory_space<vmem>>, %arg13: memref<1x256xf32, #tpu.memory_space<vmem>>, %arg14: memref<1x256xf32, #tpu.memory_space<vmem>>, %arg15: memref<1x1xf32, #tpu.memory_space<vmem>>, %arg16: memref<2x1xf32, #tpu.memory_space<vmem>>) attributes {dimension_semantics = [#tpu.dimension_semantics<parallel>], iteration_bounds = array<i64: 1>, scalar_prefetch = 0 : i64, scratch_operands = 0 : i64, tpu.core_type = #tpu.core_type<tc>, window_params = [{transform_indices = @transform_0, window_bounds = array<i64: 2, 8, 64>}, {transform_indices = @transform_1, window_bounds = array<i64: 2, 8, 64>}, {pipeline_mode = #tpu.pipeline_mode<synchronous>, transform_indices = @transform_2, window_bounds = array<i64: 64, 1024>}, {pipeline_mode = #tpu.pipeline_mode<synchronous>, transform_indices = @transform_3, window_bounds = array<i64: 1, 1024>}, {pipeline_mode = #tpu.pipeline_mode<synchronous>, transform_indices = @transform_4, window_bounds = array<i64: 1, 1024>}, {pipeline_mode = #tpu.pipeline_mode<synchronous>, transform_indices = @transform_5, window_bounds = array<i64: 1024, 16>}, {pipeline_mode = #tpu.pipeline_mode<synchronous>, transform_indices = @transform_6, window_bounds = array<i64: 16, 1024>}, {pipeline_mode = #tpu.pipeline_mode<synchronous>, transform_indices = @transform_7, window_bounds = array<i64: 1, 1024>}, {pipeline_mode = #tpu.pipeline_mode<synchronous>, transform_indices = @transform_8, window_bounds = array<i64: 1, 1024>}, {pipeline_mode = #tpu.pipeline_mode<synchronous>, transform_indices = @transform_9, window_bounds = array<i64: 1024, 512>}, {pipeline_mode = #tpu.pipeline_mode<synchronous>, transform_indices = @transform_10, window_bounds = array<i64: 1, 512>}, {pipeline_mode = #tpu.pipeline_mode<synchronous>, transform_indices = @transform_11, window_bounds = array<i64: 512, 256>}, {pipeline_mode = #tpu.pipeline_mode<synchronous>, transform_indices = @transform_12, window_bounds = array<i64: 1, 256>}, {pipeline_mode = #tpu.pipeline_mode<synchronous>, transform_indices = @transform_13, window_bounds = array<i64: 1, 256>}, {pipeline_mode = #tpu.pipeline_mode<synchronous>, transform_indices = @transform_14, window_bounds = array<i64: 1, 1>}, {transform_indices = @transform_15, window_bounds = array<i64: 2, 1>}]} {
    %c0 = arith.constant 0 : index
    %c0_0 = arith.constant 0 : index
    %0 = vector.load %arg3[%c0, %c0_0] : memref<64x1024xbf16, #tpu.memory_space<vmem>>, vector<64x1024xbf16>
    %c0_1 = arith.constant 0 : index
    %c0_2 = arith.constant 0 : index
    %c0_3 = arith.constant 0 : index
    %1 = vector.load %arg1[%c0_1, %c0_2, %c0_3] : memref<2x8x64xf32, #tpu.memory_space<vmem>>, vector<2x8x64xf32>
    %2 = vector.shape_cast %1 : vector<2x8x64xf32> to vector<16x64xf32>
    %3 = arith.truncf %2 : vector<16x64xf32> to vector<16x64xbf16>
    %c0_4 = arith.constant 0 : index
    %c0_5 = arith.constant 0 : index
    %c0_6 = arith.constant 0 : index
    %4 = vector.load %arg2[%c0_4, %c0_5, %c0_6] : memref<2x8x64xf32, #tpu.memory_space<vmem>>, vector<2x8x64xf32>
    %5 = vector.shape_cast %4 : vector<2x8x64xf32> to vector<16x64xf32>
    %6 = arith.truncf %5 : vector<16x64xf32> to vector<16x64xbf16>
    %cst = arith.constant dense<0.000000e+00> : vector<16x1024xf32>
    %7 = tpu.matmul %3, %0, %cst {dimension_numbers = #tpu.dot_dimension_numbers<[1], [0], [0], [1], [0, 0, 1, 1], [], []>} : vector<16x64xbf16>, vector<64x1024xbf16>, vector<16x1024xf32> -> vector<16x1024xf32>
    %c0_7 = arith.constant 0 : index
    %c0_8 = arith.constant 0 : index
    %8 = vector.load %arg4[%c0_7, %c0_8] : memref<1x1024xf32, #tpu.memory_space<vmem>>, vector<1x1024xf32>
    %9 = vector.broadcast %8 : vector<1x1024xf32> to vector<16x1024xf32>
    %10 = arith.addf %7, %9 : vector<16x1024xf32>
    %cst_9 = arith.constant dense<0.000000e+00> : vector<16x1024xf32>
    %11 = tpu.matmul %6, %0, %cst_9 {dimension_numbers = #tpu.dot_dimension_numbers<[1], [0], [0], [1], [0, 0, 1, 1], [], []>} : vector<16x64xbf16>, vector<64x1024xbf16>, vector<16x1024xf32> -> vector<16x1024xf32>
    %c0_10 = arith.constant 0 : index
    %c0_11 = arith.constant 0 : index
    %12 = vector.load %arg5[%c0_10, %c0_11] : memref<1x1024xf32, #tpu.memory_space<vmem>>, vector<1x1024xf32>
    %13 = vector.broadcast %12 : vector<1x1024xf32> to vector<16x1024xf32>
    %14 = arith.addf %11, %13 : vector<16x1024xf32>
    %15 = vector.shape_cast %10 : vector<16x1024xf32> to vector<2x8x1024xf32>
    %16 = vector.shape_cast %14 : vector<16x1024xf32> to vector<2x8x1024xf32>
    %cst_12 = arith.constant dense<0.000000e+00> : vector<2x1024xf32>
    %17 = vector.multi_reduction <add>, %15, %cst_12 [1] : vector<2x8x1024xf32> to vector<2x1024xf32>
    %cst_13 = arith.constant dense<0.000000e+00> : vector<2x1024xf32>
    %18 = vector.multi_reduction <add>, %16, %cst_13 [1] : vector<2x8x1024xf32> to vector<2x1024xf32>
    %19 = arith.addf %17, %18 : vector<2x1024xf32>
    %20 = arith.mulf %15, %15 : vector<2x8x1024xf32>
    %cst_14 = arith.constant dense<0.000000e+00> : vector<2x1024xf32>
    %21 = vector.multi_reduction <add>, %20, %cst_14 [1] : vector<2x8x1024xf32> to vector<2x1024xf32>
    %22 = arith.mulf %16, %16 : vector<2x8x1024xf32>
    %cst_15 = arith.constant dense<0.000000e+00> : vector<2x1024xf32>
    %23 = vector.multi_reduction <add>, %22, %cst_15 [1] : vector<2x8x1024xf32> to vector<2x1024xf32>
    %24 = arith.addf %21, %23 : vector<2x1024xf32>
    %c0_16 = arith.constant 0 : index
    %c0_17 = arith.constant 0 : index
    %25 = vector.load %arg6[%c0_16, %c0_17] : memref<1024x16xf32, #tpu.memory_space<vmem>>, vector<1024x16xf32>
    %cst_18 = arith.constant dense<0.000000e+00> : vector<2x16xf32>
    %26 = tpu.matmul %19, %25, %cst_18 {dimension_numbers = #tpu.dot_dimension_numbers<[1], [0], [0], [1], [0, 0, 1, 1], [], []>} : vector<2x1024xf32>, vector<1024x16xf32>, vector<2x16xf32> -> vector<2x16xf32>
    %cst_19 = arith.constant 9.765625E-4 : f32
    %27 = vector.broadcast %cst_19 : f32 to vector<2x16xf32>
    %28 = arith.mulf %26, %27 : vector<2x16xf32>
    %c0_20 = arith.constant 0 : index
    %c0_21 = arith.constant 0 : index
    %29 = vector.load %arg6[%c0_20, %c0_21] : memref<1024x16xf32, #tpu.memory_space<vmem>>, vector<1024x16xf32>
    %cst_22 = arith.constant dense<0.000000e+00> : vector<2x16xf32>
    %30 = tpu.matmul %24, %29, %cst_22 {dimension_numbers = #tpu.dot_dimension_numbers<[1], [0], [0], [1], [0, 0, 1, 1], [], []>} : vector<2x1024xf32>, vector<1024x16xf32>, vector<2x16xf32> -> vector<2x16xf32>
    %cst_23 = arith.constant 9.765625E-4 : f32
    %31 = vector.broadcast %cst_23 : f32 to vector<2x16xf32>
    %32 = arith.mulf %30, %31 : vector<2x16xf32>
    %33 = arith.mulf %28, %28 : vector<2x16xf32>
    %34 = arith.subf %32, %33 : vector<2x16xf32>
    %cst_24 = arith.constant 0.000000e+00 : f32
    %35 = vector.broadcast %cst_24 : f32 to vector<2x16xf32>
    %36 = arith.maximumf %34, %35 : vector<2x16xf32>
    %cst_25 = arith.constant 9.99999974E-6 : f32
    %37 = vector.broadcast %cst_25 : f32 to vector<2x16xf32>
    %38 = arith.addf %36, %37 : vector<2x16xf32>
    %39 = math.rsqrt %38 : vector<2x16xf32>
    %c0_26 = arith.constant 0 : index
    %c0_27 = arith.constant 0 : index
    %40 = vector.load %arg7[%c0_26, %c0_27] : memref<16x1024xf32, #tpu.memory_space<vmem>>, vector<16x1024xf32>
    %cst_28 = arith.constant dense<0.000000e+00> : vector<2x1024xf32>
    %41 = tpu.matmul %28, %40, %cst_28 {dimension_numbers = #tpu.dot_dimension_numbers<[1], [0], [0], [1], [0, 0, 1, 1], [], []>} : vector<2x16xf32>, vector<16x1024xf32>, vector<2x1024xf32> -> vector<2x1024xf32>
    %c0_29 = arith.constant 0 : index
    %c0_30 = arith.constant 0 : index
    %42 = vector.load %arg7[%c0_29, %c0_30] : memref<16x1024xf32, #tpu.memory_space<vmem>>, vector<16x1024xf32>
    %cst_31 = arith.constant dense<0.000000e+00> : vector<2x1024xf32>
    %43 = tpu.matmul %39, %42, %cst_31 {dimension_numbers = #tpu.dot_dimension_numbers<[1], [0], [0], [1], [0, 0, 1, 1], [], []>} : vector<2x16xf32>, vector<16x1024xf32>, vector<2x1024xf32> -> vector<2x1024xf32>
    %c0_32 = arith.constant 0 : index
    %c0_33 = arith.constant 0 : index
    %44 = vector.load %arg8[%c0_32, %c0_33] : memref<1x1024xf32, #tpu.memory_space<vmem>>, vector<1x1024xf32>
    %45 = vector.broadcast %44 : vector<1x1024xf32> to vector<2x1024xf32>
    %46 = arith.mulf %45, %43 : vector<2x1024xf32>
    %c0_34 = arith.constant 0 : index
    %c0_35 = arith.constant 0 : index
    %47 = vector.load %arg9[%c0_34, %c0_35] : memref<1x1024xf32, #tpu.memory_space<vmem>>, vector<1x1024xf32>
    %48 = arith.mulf %41, %46 : vector<2x1024xf32>
    %49 = vector.broadcast %47 : vector<1x1024xf32> to vector<2x1024xf32>
    %50 = arith.subf %49, %48 : vector<2x1024xf32>
    %51 = vector.shape_cast %46 : vector<2x1024xf32> to vector<2x1x1024xf32>
    %52 = vector.shape_cast %50 : vector<2x1024xf32> to vector<2x1x1024xf32>
    %53 = vector.broadcast %51 : vector<2x1x1024xf32> to vector<2x8x1024xf32>
    %54 = arith.mulf %15, %53 : vector<2x8x1024xf32>
    %55 = vector.broadcast %52 : vector<2x1x1024xf32> to vector<2x8x1024xf32>
    %56 = arith.addf %54, %55 : vector<2x8x1024xf32>
    %cst_36 = arith.constant 0.000000e+00 : f32
    %57 = vector.broadcast %cst_36 : f32 to vector<2x8x1024xf32>
    %58 = arith.maximumf %56, %57 : vector<2x8x1024xf32>
    %cst_37 = arith.constant dense<0xFF800000> : vector<2x1024xf32>
    %59 = vector.multi_reduction <maximumf>, %58, %cst_37 [1] : vector<2x8x1024xf32> to vector<2x1024xf32>
    %60 = vector.broadcast %51 : vector<2x1x1024xf32> to vector<2x8x1024xf32>
    %61 = arith.mulf %16, %60 : vector<2x8x1024xf32>
    %62 = vector.broadcast %52 : vector<2x1x1024xf32> to vector<2x8x1024xf32>
    %63 = arith.addf %61, %62 : vector<2x8x1024xf32>
    %cst_38 = arith.constant 0.000000e+00 : f32
    %64 = vector.broadcast %cst_38 : f32 to vector<2x8x1024xf32>
    %65 = arith.maximumf %63, %64 : vector<2x8x1024xf32>
    %cst_39 = arith.constant dense<0xFF800000> : vector<2x1024xf32>
    %66 = vector.multi_reduction <maximumf>, %65, %cst_39 [1] : vector<2x8x1024xf32> to vector<2x1024xf32>
    %67 = arith.maximumf %59, %66 : vector<2x1024xf32>
    %68 = arith.truncf %67 : vector<2x1024xf32> to vector<2x1024xbf16>
    %c0_40 = arith.constant 0 : index
    %c0_41 = arith.constant 0 : index
    %69 = vector.load %arg10[%c0_40, %c0_41] : memref<1024x512xbf16, #tpu.memory_space<vmem>>, vector<1024x512xbf16>
    %cst_42 = arith.constant dense<0.000000e+00> : vector<2x512xf32>
    %70 = tpu.matmul %68, %69, %cst_42 {dimension_numbers = #tpu.dot_dimension_numbers<[1], [0], [0], [1], [0, 0, 1, 1], [], []>} : vector<2x1024xbf16>, vector<1024x512xbf16>, vector<2x512xf32> -> vector<2x512xf32>
    %c0_43 = arith.constant 0 : index
    %c0_44 = arith.constant 0 : index
    %71 = vector.load %arg11[%c0_43, %c0_44] : memref<1x512xf32, #tpu.memory_space<vmem>>, vector<1x512xf32>
    %72 = vector.broadcast %71 : vector<1x512xf32> to vector<2x512xf32>
    %73 = arith.addf %70, %72 : vector<2x512xf32>
    %74 = arith.truncf %73 : vector<2x512xf32> to vector<2x512xbf16>
    %c0_45 = arith.constant 0 : index
    %c0_46 = arith.constant 0 : index
    %75 = vector.load %arg12[%c0_45, %c0_46] : memref<512x256xbf16, #tpu.memory_space<vmem>>, vector<512x256xbf16>
    %cst_47 = arith.constant dense<0.000000e+00> : vector<2x256xf32>
    %76 = tpu.matmul %74, %75, %cst_47 {dimension_numbers = #tpu.dot_dimension_numbers<[1], [0], [0], [1], [0, 0, 1, 1], [], []>} : vector<2x512xbf16>, vector<512x256xbf16>, vector<2x256xf32> -> vector<2x256xf32>
    %c0_48 = arith.constant 0 : index
    %c0_49 = arith.constant 0 : index
    %77 = vector.load %arg13[%c0_48, %c0_49] : memref<1x256xf32, #tpu.memory_space<vmem>>, vector<1x256xf32>
    %78 = vector.broadcast %77 : vector<1x256xf32> to vector<2x256xf32>
    %79 = arith.addf %76, %78 : vector<2x256xf32>
    %c0_50 = arith.constant 0 : index
    %c0_51 = arith.constant 0 : index
    %80 = vector.load %arg14[%c0_50, %c0_51] : memref<1x256xf32, #tpu.memory_space<vmem>>, vector<1x256xf32>
    %81 = vector.broadcast %80 : vector<1x256xf32> to vector<2x256xf32>
    %82 = arith.mulf %79, %81 : vector<2x256xf32>
    %cst_52 = arith.constant dense<0.000000e+00> : vector<2xf32>
    %83 = vector.multi_reduction <add>, %82, %cst_52 [1] : vector<2x256xf32> to vector<2xf32>
    %84 = vector.shape_cast %83 : vector<2xf32> to vector<2x1xf32>
    %c0_53 = arith.constant 0 : index
    %c0_54 = arith.constant 0 : index
    %85 = vector.load %arg15[%c0_53, %c0_54] : memref<1x1xf32, #tpu.memory_space<vmem>>, vector<1x1xf32>
    %86 = vector.broadcast %85 : vector<1x1xf32> to vector<2x1xf32>
    %87 = arith.addf %84, %86 : vector<2x1xf32>
    %cst_55 = arith.constant 0.000000e+00 : f32
    %88 = vector.broadcast %cst_55 : f32 to vector<2x1xf32>
    %89 = arith.maximumf %87, %88 : vector<2x1xf32>
    %90 = math.absf %87 : vector<2x1xf32>
    %cst_56 = arith.constant 0.000000e+00 : f32
    %91 = vector.broadcast %cst_56 : f32 to vector<2x1xf32>
    %92 = arith.subf %91, %90 : vector<2x1xf32>
    %93 = math.exp %92 : vector<2x1xf32>
    %94 = math.log1p %93 : vector<2x1xf32>
    %95 = arith.addf %89, %94 : vector<2x1xf32>
    %c0_57 = arith.constant 0 : index
    %c0_58 = arith.constant 0 : index
    %96 = vector.load %arg16[%c0_57, %c0_58] : memref<2x1xf32, #tpu.memory_space<vmem>>, vector<2x1xf32>
    tpu.vector_store %arg16[%c0_57, %c0_58], %95 {strides = array<i32>} : memref<2x1xf32, #tpu.memory_space<vmem>>, vector<2x1xf32>,
    return
  }
  func.func @transform_0(%arg0: i32) -> (i32, i32, i32) {
    %c0_i32 = arith.constant 0 : i32
    %c0_i32_0 = arith.constant 0 : i32
    %c0_i32_1 = arith.constant 0 : i32
    return %arg0, %c0_i32, %c0_i32_0 : i32, i32, i32
  }
  func.func @transform_1(%arg0: i32) -> (i32, i32, i32) {
    %c0_i32 = arith.constant 0 : i32
    %c0_i32_0 = arith.constant 0 : i32
    %c0_i32_1 = arith.constant 0 : i32
    return %arg0, %c0_i32, %c0_i32_0 : i32, i32, i32
  }
  func.func @transform_2(%arg0: i32) -> (i32, i32) {
    %c0_i32 = arith.constant 0 : i32
    %c0_i32_0 = arith.constant 0 : i32
    %c0_i32_1 = arith.constant 0 : i32
    return %c0_i32, %c0_i32_0 : i32, i32
  }
  func.func @transform_3(%arg0: i32) -> (i32, i32) {
    %c0_i32 = arith.constant 0 : i32
    %c0_i32_0 = arith.constant 0 : i32
    %c0_i32_1 = arith.constant 0 : i32
    return %c0_i32, %c0_i32_0 : i32, i32
  }
  func.func @transform_4(%arg0: i32) -> (i32, i32) {
    %c0_i32 = arith.constant 0 : i32
    %c0_i32_0 = arith.constant 0 : i32
    %c0_i32_1 = arith.constant 0 : i32
    return %c0_i32, %c0_i32_0 : i32, i32
  }
  func.func @transform_5(%arg0: i32) -> (i32, i32) {
    %c0_i32 = arith.constant 0 : i32
    %c0_i32_0 = arith.constant 0 : i32
    %c0_i32_1 = arith.constant 0 : i32
    return %c0_i32, %c0_i32_0 : i32, i32
  }
  func.func @transform_6(%arg0: i32) -> (i32, i32) {
    %c0_i32 = arith.constant 0 : i32
    %c0_i32_0 = arith.constant 0 : i32
    %c0_i32_1 = arith.constant 0 : i32
    return %c0_i32, %c0_i32_0 : i32, i32
  }
  func.func @transform_7(%arg0: i32) -> (i32, i32) {
    %c0_i32 = arith.constant 0 : i32
    %c0_i32_0 = arith.constant 0 : i32
    %c0_i32_1 = arith.constant 0 : i32
    return %c0_i32, %c0_i32_0 : i32, i32
  }
  func.func @transform_8(%arg0: i32) -> (i32, i32) {
    %c0_i32 = arith.constant 0 : i32
    %c0_i32_0 = arith.constant 0 : i32
    %c0_i32_1 = arith.constant 0 : i32
    return %c0_i32, %c0_i32_0 : i32, i32
  }
  func.func @transform_9(%arg0: i32) -> (i32, i32) {
    %c0_i32 = arith.constant 0 : i32
    %c0_i32_0 = arith.constant 0 : i32
    %c0_i32_1 = arith.constant 0 : i32
    return %c0_i32, %c0_i32_0 : i32, i32
  }
  func.func @transform_10(%arg0: i32) -> (i32, i32) {
    %c0_i32 = arith.constant 0 : i32
    %c0_i32_0 = arith.constant 0 : i32
    %c0_i32_1 = arith.constant 0 : i32
    return %c0_i32, %c0_i32_0 : i32, i32
  }
  func.func @transform_11(%arg0: i32) -> (i32, i32) {
    %c0_i32 = arith.constant 0 : i32
    %c0_i32_0 = arith.constant 0 : i32
    %c0_i32_1 = arith.constant 0 : i32
    return %c0_i32, %c0_i32_0 : i32, i32
  }
  func.func @transform_12(%arg0: i32) -> (i32, i32) {
    %c0_i32 = arith.constant 0 : i32
    %c0_i32_0 = arith.constant 0 : i32
    %c0_i32_1 = arith.constant 0 : i32
    return %c0_i32, %c0_i32_0 : i32, i32
  }
  func.func @transform_13(%arg0: i32) -> (i32, i32) {
    %c0_i32 = arith.constant 0 : i32
    %c0_i32_0 = arith.constant 0 : i32
    %c0_i32_1 = arith.constant 0 : i32
    return %c0_i32, %c0_i32_0 : i32, i32
  }
  func.func @transform_14(%arg0: i32) -> (i32, i32) {
    %c0_i32 = arith.constant 0 : i32
    %c0_i32_0 = arith.constant 0 : i32
    %c0_i32_1 = arith.constant 0 : i32
    return %c0_i32, %c0_i32_0 : i32, i32
  }
  func.func @transform_15(%arg0: i32) -> (i32, i32) {
    %c0_i32 = arith.constant 0 : i32
    %c0_i32_0 = arith.constant 0 : i32
    return %arg0, %c0_i32 : i32, i32
  }
}

</mosaic_0001>

<bundles_post_ra>
// kernel: tpu_custom_call.1
= control target key start
LH: loop header
LB: loop body
LE: loop exit
PB: predicated region body
PF: predicated region fallthrough
CT: control target
= control target key end

     0   :  { %s9176_s0 = inlined_call_operand.vmem [shape: f32[2,8,64], index: 0, kind: input, shape index: {}]   ;;  %s9177_s1 = inlined_call_operand.vmem [shape: f32[2,8,64], index: 1, kind: input, shape index: {}]   ;;  %s9178_s2 = inlined_call_operand.vmem [shape: bf16[64,1024], index: 2, kind: input, shape index: {}]   ;;  %s9179_s3 = inlined_call_operand.vmem [shape: f32[1,1024], index: 3, kind: input, shape index: {}]   ;;  %s9180_s4 = inlined_call_operand.vmem [shape: f32[1,1024], index: 4, kind: input, shape index: {}]   ;;  %s9181_s5 = inlined_call_operand.vmem [shape: f32[1024,16], index: 5, kind: input, shape index: {}]   ;;  %s9182_s6 = inlined_call_operand.vmem [shape: f32[16,1024], index: 6, kind: input, shape index: {}]   ;;  %s9183_s7 = inlined_call_operand.vmem [shape: f32[1,1024], index: 7, kind: input, shape index: {}]   ;;  %s9184_s8 = inlined_call_operand.vmem [shape: f32[1,1024], index: 8, kind: input, shape index: {}]   ;;  %s9185_s9 = inlined_call_operand.hbm [shape: bf16[1024,512], index: 9, kind: input, shape index: {}]   ;;  %s9186_s10 = inlined_call_operand.vmem [shape: f32[1,512], index: 10, kind: input, shape index: {}]   ;;  %s9187_s11 = inlined_call_operand.vmem [shape: bf16[512,256], index: 11, kind: input, shape index: {}]   ;;  %s9188_s12 = inlined_call_operand.vmem [shape: f32[1,256], index: 12, kind: input, shape index: {}]   ;;  %s9189_s13 = inlined_call_operand.vmem [shape: f32[1,256], index: 13, kind: input, shape index: {}]   ;;  %s9190_s14 = inlined_call_operand.<no memory space> [shape: f32[1,1], index: 14, kind: input, shape index: {}]   ;;  %s9191_s15 = inlined_call_operand.vmem [shape: f32[2,1], index: 15, kind: output, shape index: {}]  }
   0x1   :  { %v20_v0 = vstv %s9190_s14 }
   0x2   :  { %21 = vst [vmem:[#allocation2] sm:$0x1] %v20_v0 }
   0x3   :  { %22 = vsyncpa [#allocation4], 0  ;;  %s7194_s20 = smov [#allocation3]   ;;  %s7170_s24 = scalar_lea.hbm %s9185_s9, 32768 }
   0x4   :  { %s46_s21 = sshll.u32 %s7194_s20, 4  ;;  %p7171_p0 = scmp.ne.s32.totalorder %s9185_s9, %s7170_s24  ;;  %s47_s21 = int_to_ptr.vmem [resolvable:$true] %s46_s21 }
   0x5   :  { %p7174_p1 = scmp.lt.u32.totalorder %s7170_s24, %s9185_s9 }
   0x7   :  { %p7176_p2 = pnand %p7174_p1, %p7171_p0 }
   0x9   :  { %7179 = shalt.err (!%p7176_p2)
}
   0xa   :  { %s7180_s14 = scalar_lea.vmem %s47_s21, 32768  ;;  %p7185_p4 = scmp.lt.s32.totalorder %s47_s21, %s47_s21 }
   0xb   :  { %p7181_p3 = scmp.ne.s32.totalorder %s47_s21, %s7180_s14  ;;  %p7186_p5 = scmp.lt.s32.totalorder %s7180_s14, %s7180_s14 }
   0xd   :  { %p7187_p6 = por %p7186_p5, %p7185_p4 }
   0xf   :  { %p7188_p7 = pnand %p7187_p6, %p7181_p3 }
  0x11   :  { %7191 = shalt.err (!%p7188_p7)
}
  0x12   :  { %s7195_s29 = smov 256   ;;  %s7196_s30 = smov 16  }
  0x13   :  { %52 = dma.hbm_to_vmem [thread:$0]  %s9185_s9, 32768, %s47_s21, [#allocation4], %s7195_s29, %s7195_s29, %s7196_s30  }
  0x14   :  { %7192 = dma.done.wait [#allocation4], 32768  }
  0x15   :  { %7193 = vsyncadd [#allocation4], 4294934528  ;;  %v7197_v1 = vmov 0   ;;  %v67_v2 = vld [vmem:[%s9178_s2] sm:$0xff]  ;;  %v68_v4 = vld [vmem:[%s9178_s2 + $0x8] sm:$0xff]  ;;  %vm307_vm0 = vcmask 523264  }
  0x16   :  { %343 = vmatprep.mubr.bf16.mxu0 %v7197_v1  ;;  %386 = vmatprep.mubr.bf16.mxu1 %v7197_v1  ;;  %v71_v3 = vld [vmem:[%s9178_s2 + $0x20] sm:$0xff]  ;;  %v72_v6 = vld [vmem:[%s9178_s2 + $0x28] sm:$0xff]  ;;  %v69_v33 = vld [vmem:[%s9178_s2 + $0x10] sm:$0xff]  ;;  %vm1292_vm1 = vcmask 1041409   ;;  %vm1924_vm2 = vcmask 130048   ;;  %vm5673_vm3 = vcmask 1041408  }
  0x17   :  { %v7306_v5 = vcombine.high %v67_v2, %v71_v3  ;;  %v7311_v7 = vcombine.low %v67_v2, %v71_v3  ;;  %v75_v8 = vld [vmem:[%s9178_s2 + $0x40] sm:$0xff]  ;;  %v7319_v10 = vcombine.high %v68_v4, %v72_v6  ;;  %v7321_v11 = vcombine.low %v68_v4, %v72_v6  ;;  %v76_v13 = vld [vmem:[%s9178_s2 + $0x48] sm:$0xff]  ;;  %v73_v34 = vld [vmem:[%s9178_s2 + $0x30] sm:$0xff] }
  0x18   :  { %v79_v9 = vld [vmem:[%s9178_s2 + $0x60] sm:$0xff]  ;;  %v80_v14 = vld [vmem:[%s9178_s2 + $0x68] sm:$0xff]  ;;  %v70_v36 = vld [vmem:[%s9178_s2 + $0x18] sm:$0xff]  ;;  %v7414_v42 = vcombine.high %v69_v33, %v73_v34  ;;  %v7426_v47 = vcombine.low %v69_v33, %v73_v34  ;;  %vm5702_vm5 = vcmask 1024  }
  0x19   :  { %v7323_v12 = vcombine.high %v75_v8, %v79_v9  ;;  %v83_v15 = vld [vmem:[%s9178_s2 + $0x80] sm:$0xff]  ;;  %311 = vmatprep.subr.bf16.mxu0 %v7306_v5  ;;  %v7335_v16 = vcombine.high %v76_v13, %v80_v14  ;;  %v84_v18 = vld [vmem:[%s9178_s2 + $0x88] sm:$0xff]  ;;  %354 = vmatprep.subr.bf16.mxu1 %v7319_v10  ;;  %v7348_v20 = vcombine.low %v75_v8, %v79_v9  ;;  %v74_v37 = vld [vmem:[%s9178_s2 + $0x38] sm:$0xff] }
  0x1a   :  { %v87_v17 = vld [vmem:[%s9178_s2 + $0xa0] sm:$0xff]  ;;  %v88_v19 = vld [vmem:[%s9178_s2 + $0xa8] sm:$0xff]  ;;  %312 = vmatpush1.bf16.msra.mxu0 %v7311_v7  ;;  %355 = vmatpush1.bf16.msra.mxu1 %v7321_v11  ;;  %v7352_v21 = vcombine.low %v76_v13, %v80_v14  ;;  %v77_v39 = vld [vmem:[%s9178_s2 + $0x50] sm:$0xff]  ;;  %v7423_v45 = vcombine.high %v70_v36, %v74_v37  ;;  %v7436_v50 = vcombine.low %v70_v36, %v74_v37 }
  0x1b   :  { %313 = vmatprep.subr.bf16.mxu0 %v7323_v12  ;;  %v7354_v22 = vcombine.high %v83_v15, %v87_v17  ;;  %356 = vmatprep.subr.bf16.mxu1 %v7335_v16  ;;  %v7357_v23 = vcombine.high %v84_v18, %v88_v19  ;;  %v91_v24 = vld [vmem:[%s9178_s2 + $0xc0] sm:$0xff]  ;;  %v92_v26 = vld [vmem:[%s9178_s2 + $0xc8] sm:$0xff]  ;;  %v7372_v28 = vcombine.low %v83_v15, %v87_v17  ;;  %v81_v40 = vld [vmem:[%s9178_s2 + $0x70] sm:$0xff] }
  0x1c   :  { %v95_v25 = vld [vmem:[%s9178_s2 + $0xe0] sm:$0xff]  ;;  %v96_v27 = vld [vmem:[%s9178_s2 + $0xe8] sm:$0xff]  ;;  %v7376_v29 = vcombine.low %v84_v18, %v88_v19  ;;  %v78_v43 = vld [vmem:[%s9178_s2 + $0x58] sm:$0xff]  ;;  %v7438_v51 = vcombine.high %v77_v39, %v81_v40  ;;  %v5721_v55 = vcombine.low %v77_v39, %v81_v40 }
  0x1d   :  { %v7378_v30 = vcombine.high %v91_v24, %v95_v25  ;;  %v7381_v31 = vcombine.high %v92_v26, %v96_v27  ;;  %v99_v32 = vld [vmem:[%s9176_s0] sm:$0xff]  ;;  %v100_v35 = vld [vmem:[%s9176_s0 + $0x8] sm:$0xff]  ;;  %v7402_v38 = vcombine.low %v91_v24, %v95_v25  ;;  %v7412_v41 = vcombine.low %v92_v26, %v96_v27  ;;  %v82_v44 = vld [vmem:[%s9178_s2 + $0x78] sm:$0xff] }
  0x1e   :  { %314 = vmatpush1.bf16.msra.mxu0 %v7348_v20  ;;  %357 = vmatpush1.bf16.msra.mxu1 %v7352_v21  ;;  %v101_v46 = vpack.c.bf16 %v100_v35, %v99_v32  ;;  %v85_v48 = vld [vmem:[%s9178_s2 + $0x90] sm:$0xff]  ;;  %v86_v52 = vld [vmem:[%s9178_s2 + $0x98] sm:$0xff]  ;;  %v5724_v54 = vcombine.high %v78_v43, %v82_v44  ;;  %v5723_v58 = vcombine.low %v78_v43, %v82_v44  ;;  %v1164_v9 = vld [vmem:[%s9181_s5 + $0x80] sm:$0xff] }
  0x1f   :  { %315 = vmatprep.subr.bf16.mxu0 %v7354_v22  ;;  %358 = vmatprep.subr.bf16.mxu1 %v7357_v23  ;;  %v89_v49 = vld [vmem:[%s9178_s2 + $0xb0] sm:$0xff]  ;;  %v90_v53 = vld [vmem:[%s9178_s2 + $0xb8] sm:$0xff]  ;;  %v1148_v13 = vld [vmem:[%s9181_s5] sm:$0xff] }
  0x20   :  { %v93_v56 = vld [vmem:[%s9178_s2 + $0xd0] sm:$0xff]  ;;  %v5730_v59 = vcombine.high %v85_v48, %v89_v49  ;;  %v94_v60 = vld [vmem:[%s9178_s2 + $0xd8] sm:$0xff]  ;;  %v5732_v62 = vcombine.high %v86_v52, %v90_v53  ;;  %v5729_v63 = vcombine.low %v85_v48, %v89_v49  ;;  %v5731_v0 = vcombine.low %v86_v52, %v90_v53  ;;  %v1149_v14 = vld [vmem:[%s9181_s5 + $0x8] sm:$0xff] }
  0x21   :  { %v97_v57 = vld [vmem:[%s9178_s2 + $0xf0] sm:$0xff]  ;;  %v98_v61 = vld [vmem:[%s9178_s2 + $0xf8] sm:$0xff]  ;;  %v1180_v17 = vld [vmem:[%s9181_s5 + $0x100] sm:$0xff] }
  0x22   :  { %316 = vmatpush1.bf16.msra.mxu0 %v7372_v28  ;;  %359 = vmatpush1.bf16.msra.mxu1 %v7376_v29  ;;  %v5738_v2 = vcombine.high %v93_v56, %v97_v57  ;;  %v5740_v3 = vcombine.high %v94_v60, %v98_v61  ;;  %v5737_v4 = vcombine.low %v93_v56, %v97_v57  ;;  %v1181_v18 = vld [vmem:[%s9181_s5 + $0x108] sm:$0xff]  ;;  %v1199_v24 = vld [vmem:[%s9181_s5 + $0x198] sm:$0xff]  ;;  %v1150_v25 = vld [vmem:[%s9181_s5 + $0x10] sm:$0xff] }
  0x23   :  { %317 = vmatprep.subr.bf16.mxu0 %v7378_v30  ;;  %360 = vmatprep.subr.bf16.mxu1 %v7381_v31  ;;  %v5739_v6 = vcombine.low %v94_v60, %v98_v61  ;;  %v7534_v19 = vpack.c.bf16 %v1181_v18, %v1180_v17  ;;  %v1151_v26 = vld [vmem:[%s9181_s5 + $0x18] sm:$0xff]  ;;  %v1168_v32 = vld [vmem:[%s9181_s5 + $0xa0] sm:$0xff]  ;;  %v1169_v33 = vld [vmem:[%s9181_s5 + $0xa8] sm:$0xff] }
  0x24   :  { %v1200_v34 = vld [vmem:[%s9181_s5 + $0x1a0] sm:$0xff]  ;;  %v7584_v35 = vpack.c.bf16 %v1169_v33, %v1168_v32  ;;  %v1201_v36 = vld [vmem:[%s9181_s5 + $0x1a8] sm:$0xff]  ;;  %v1170_v44 = vld [vmem:[%s9181_s5 + $0xb0] sm:$0xff] }
  0x25   :  { %9321 = vst [vmem:[#allocation9_spill] sm:$0xff] %v7534_v19  ;;  %v1152_v37 = vld [vmem:[%s9181_s5 + $0x20] sm:$0xff]  ;;  %v7595_v39 = vpack.c.bf16 %v1201_v36, %v1200_v34  ;;  %v1203_v48 = vld [vmem:[%s9181_s5 + $0x1b8] sm:$0xff]  ;;  %v1154_v49 = vld [vmem:[%s9181_s5 + $0x30] sm:$0xff] }
  0x26   :  { %318 = vmatpush1.bf16.msra.mxu0 %v7402_v38  ;;  %361 = vmatpush1.bf16.msra.mxu1 %v7412_v41  ;;  %9326 = vst [vmem:[#allocation14_spill] sm:$0xff] %v7584_v35  ;;  %v1186_v53 = vld [vmem:[%s9181_s5 + $0x130] sm:$0xff]  ;;  %v1172_v56 = vld [vmem:[%s9181_s5 + $0xc0] sm:$0xff]  ;;  %v1173_v57 = vld [vmem:[%s9181_s5 + $0xc8] sm:$0xff] }
  0x27   :  { %397 = vmatprep.subr.bf16.mxu0 %v7414_v42  ;;  %440 = vmatprep.subr.bf16.mxu1 %v7423_v45  ;;  %9327 = vst [vmem:[#allocation15_spill] sm:$0xff] %v7595_v39  ;;  %v1205_v60 = vld [vmem:[%s9181_s5 + $0x1c8] sm:$0xff]  ;;  %v1156_v61 = vld [vmem:[%s9181_s5 + $0x40] sm:$0xff]  ;;  %v1191_v17 = vld [vmem:[%s9181_s5 + $0x158] sm:$0xff] }
  0x28   :  { %v1192_v33 = vld [vmem:[%s9181_s5 + $0x160] sm:$0xff]  ;;  %v1193_v34 = vld [vmem:[%s9181_s5 + $0x168] sm:$0xff] }
  0x29   :  { %5741 = vmatmul.mubr.msk.bf16.vlgmr.msra.gmra.mrb[0].mxu0 %vm307_vm0, %v101_v46  ;;  %5742 = vmatmul.mubr.msk.bf16.vlgmr.msra.gmra.mrb[0].mxu1 %vm307_vm0, %v101_v46  ;;  %v7750_v36 = vpack.c.bf16 %v1193_v34, %v1192_v33  ;;  %v105_v33 = vld [vmem:[%s9179_s3] sm:$0xff] }
  0x2a   :  { %398 = vmatpush1.bf16.msra.mxu0 %v7426_v47  ;;  %441 = vmatpush1.bf16.msra.mxu1 %v7436_v50 }
  0x2b   :  { %399 = vmatprep.subr.bf16.mxu0 %v7438_v51  ;;  %442 = vmatprep.subr.bf16.mxu1 %v5724_v54  ;;  %9345 = vst [vmem:[#allocation33_spill] sm:$0xff] %v7750_v36 }
  0x2c   :  { %429 = vmatprep.mubr.bf16.mxu0 %v7197_v1  ;;  %472 = vmatprep.mubr.bf16.mxu1 %v7197_v1 }
  0x2e   :  { %400 = vmatpush1.bf16.msra.mxu0 %v5721_v55  ;;  %443 = vmatpush1.bf16.msra.mxu1 %v5723_v58 }
  0x2f   :  { %401 = vmatprep.subr.bf16.mxu0 %v5730_v59  ;;  %444 = vmatprep.subr.bf16.mxu1 %v5732_v62 }
  0x32   :  { %402 = vmatpush1.bf16.msra.mxu0 %v5729_v63  ;;  %445 = vmatpush1.bf16.msra.mxu1 %v5731_v0 }
  0x33   :  { %403 = vmatprep.subr.bf16.mxu0 %v5738_v2  ;;  %446 = vmatprep.subr.bf16.mxu1 %v5740_v3 }
  0x36   :  { %404 = vmatpush1.bf16.msra.mxu0 %v5737_v4  ;;  %447 = vmatpush1.bf16.msra.mxu1 %v5739_v6 }
  0x37   :  { %528 = vmatprep.subr.bf16.mxu0 %v7306_v5  ;;  %571 = vmatprep.subr.bf16.mxu1 %v7319_v10  ;;  %v102_v5 = vld [vmem:[%s9177_s1] sm:$0xff] }
  0x38   :  { %v1196_v10 = vld [vmem:[%s9181_s5 + $0x180] sm:$0xff] }
  0x39   :  { %5743 = vmatmul.mubr.msk.bf16.vlgmr.msra.gmra.mrb[4].mxu0 %vm307_vm0, %v101_v46  ;;  %5744 = vmatmul.mubr.msk.bf16.vlgmr.msra.gmra.mrb[4].mxu1 %vm307_vm0, %v101_v46  ;;  %v1202_v46 = vld [vmem:[%s9181_s5 + $0x1b0] sm:$0xff] }
  0x3a   :  { %529 = vmatpush1.bf16.msra.mxu0 %v7311_v7  ;;  %572 = vmatpush1.bf16.msra.mxu1 %v7321_v11  ;;  %v103_v7 = vld [vmem:[%s9177_s1 + $0x8] sm:$0xff] }
  0x3b   :  { %530 = vmatprep.subr.bf16.mxu0 %v7323_v12  ;;  %573 = vmatprep.subr.bf16.mxu1 %v7335_v16  ;;  %v104_v8 = vpack.c.bf16 %v103_v7, %v102_v5  ;;  %v1197_v12 = vld [vmem:[%s9181_s5 + $0x188] sm:$0xff]  ;;  %v7525_v16 = vpack.c.bf16 %v1149_v14, %v1148_v13  ;;  %v1175_v5 = vld [vmem:[%s9181_s5 + $0xd8] sm:$0xff]  ;;  %v1206_v7 = vld [vmem:[%s9181_s5 + $0x1d0] sm:$0xff] }
  0x3c   :  { %560 = vmatprep.mubr.bf16.mxu0 %v7197_v1  ;;  %603 = vmatprep.mubr.bf16.mxu1 %v7197_v1  ;;  %v7523_v15 = vpack.c.bf16 %v1197_v12, %v1196_v10  ;;  %v1159_v10 = vld [vmem:[%s9181_s5 + $0x58] sm:$0xff]  ;;  %v1190_v14 = vld [vmem:[%s9181_s5 + $0x150] sm:$0xff] }
  0x3d   :  { %9320 = vst [vmem:[#allocation8_spill] sm:$0xff] %v7525_v16  ;;  %v7714_v18 = vpack.c.bf16 %v1191_v17, %v1190_v14  ;;  %v107_v14 = vlaneseq }
  0x3e   :  { %531 = vmatpush1.bf16.msra.mxu0 %v7348_v20  ;;  %574 = vmatpush1.bf16.msra.mxu1 %v7352_v21  ;;  %9319 = vst [vmem:[#allocation7_spill] sm:$0xff] %v7523_v15  ;;  %v1166_v20 = vld [vmem:[%s9181_s5 + $0x90] sm:$0xff]  ;;  %v1167_v21 = vld [vmem:[%s9181_s5 + $0x98] sm:$0xff] }
  0x3f   :  { %532 = vmatprep.subr.bf16.mxu0 %v7354_v22  ;;  %575 = vmatprep.subr.bf16.mxu1 %v7357_v23  ;;  %v1198_v22 = vld [vmem:[%s9181_s5 + $0x190] sm:$0xff]  ;;  %v7548_v23 = vpack.c.bf16 %v1167_v21, %v1166_v20  ;;  %9341 = vst [vmem:[#allocation29_spill] sm:$0xff] %v7714_v18  ;;  %v1176_v20 = vld [vmem:[%s9181_s5 + $0xe0] sm:$0xff]  ;;  %v1177_v21 = vld [vmem:[%s9181_s5 + $0xe8] sm:$0xff]  ;;  %v7823_v17 = vshrl.u32 %v107_v14, 7 }
  0x40   :  { %v7559_v27 = vpack.c.bf16 %v1199_v24, %v1198_v22  ;;  %v1208_v22 = vld [vmem:[%s9181_s5 + $0x1e0] sm:$0xff]  ;;  %v7728_v24 = vpack.c.bf16 %v1177_v21, %v1176_v20  ;;  %v1213_v14 = vld [vmem:[%s9181_s5 + $0x208] sm:$0xff] }
  0x41   :  { %9322 = vst [vmem:[#allocation10_spill] sm:$0xff] %v7548_v23  ;;  %9352 = vst [vmem:[#allocation40_spill] sm:$0xff] %v7823_v17  ;;  %v7842_v34 = vsub.s32 2, %v7823_v17 }
  0x42   :  { %533 = vmatpush1.bf16.msra.mxu0 %v7372_v28  ;;  %576 = vmatpush1.bf16.msra.mxu1 %v7376_v29  ;;  %9323 = vst [vmem:[#allocation11_spill] sm:$0xff] %v7559_v27  ;;  %v7561_v28 = vpack.c.bf16 %v1151_v26, %v1150_v25  ;;  %v1182_v29 = vld [vmem:[%s9181_s5 + $0x110] sm:$0xff]  ;;  %9342 = vst [vmem:[#allocation30_spill] sm:$0xff] %v7728_v24  ;;  %v1209_v25 = vld [vmem:[%s9181_s5 + $0x1e8] sm:$0xff] }
  0x43   :  { %534 = vmatprep.subr.bf16.mxu0 %v7378_v30  ;;  %577 = vmatprep.subr.bf16.mxu1 %v7381_v31  ;;  %v1183_v30 = vld [vmem:[%s9181_s5 + $0x118] sm:$0xff]  ;;  %v1160_v26 = vld [vmem:[%s9181_s5 + $0x60] sm:$0xff]  ;;  %9354 = vst [vmem:[#allocation42_spill] sm:$0xff] %v7842_v34 }
  0x44   :  { %9324 = vst [vmem:[#allocation12_spill] sm:$0xff] %v7561_v28  ;;  %v7570_v31 = vpack.c.bf16 %v1183_v30, %v1182_v29  ;;  %v1161_v29 = vld [vmem:[%s9181_s5 + $0x68] sm:$0xff]  ;;  %v7739_v30 = vpack.c.bf16 %v1209_v25, %v1208_v22  ;;  %v7832_v25 = vsub.s32 0, %v7823_v17 }
  0x45   :  { %v7741_v32 = vpack.c.bf16 %v1161_v29, %v1160_v26 }
  0x46   :  { %535 = vmatpush1.bf16.msra.mxu0 %v7402_v38  ;;  %578 = vmatpush1.bf16.msra.mxu1 %v7412_v41  ;;  %9325 = vst [vmem:[#allocation13_spill] sm:$0xff] %v7570_v31  ;;  %v1153_v38 = vld [vmem:[%s9181_s5 + $0x28] sm:$0xff]  ;;  %v1184_v41 = vld [vmem:[%s9181_s5 + $0x120] sm:$0xff]  ;;  %9343 = vst [vmem:[#allocation31_spill] sm:$0xff] %v7739_v30 }
  0x47   :  { %614 = vmatprep.subr.bf16.mxu0 %v7414_v42  ;;  %657 = vmatprep.subr.bf16.mxu1 %v7423_v45  ;;  %v7597_v40 = vpack.c.bf16 %v1153_v38, %v1152_v37  ;;  %v1185_v42 = vld [vmem:[%s9181_s5 + $0x128] sm:$0xff]  ;;  %v1171_v45 = vld [vmem:[%s9181_s5 + $0xb8] sm:$0xff]  ;;  %9344 = vst [vmem:[#allocation32_spill] sm:$0xff] %v7741_v32  ;;  %v1178_v37 = vld [vmem:[%s9181_s5 + $0xf0] sm:$0xff] }
  0x48   :  { %v7606_v43 = vpack.c.bf16 %v1185_v42, %v1184_v41  ;;  %v1179_v38 = vld [vmem:[%s9181_s5 + $0xf8] sm:$0xff]  ;;  %v1210_v41 = vld [vmem:[%s9181_s5 + $0x1f0] sm:$0xff]  ;;  %9353 = vst [vmem:[#allocation41_spill] sm:$0xff] %v7832_v25 }
  0x49   :  { %5745 = vmatmul.mubr.msk.bf16.vlgmr.msra.gmra.mrb[8].mxu0 %vm307_vm0, %v104_v8  ;;  %5746 = vmatmul.mubr.msk.bf16.vlgmr.msra.gmra.mrb[8].mxu1 %vm307_vm0, %v104_v8  ;;  %9328 = vst [vmem:[#allocation16_spill] sm:$0xff] %v7597_v40  ;;  %v7764_v42 = vpack.c.bf16 %v1179_v38, %v1178_v37 }
  0x4a   :  { %615 = vmatpush1.bf16.msra.mxu0 %v7426_v47  ;;  %658 = vmatpush1.bf16.msra.mxu1 %v7436_v50  ;;  %9329 = vst [vmem:[#allocation17_spill] sm:$0xff] %v7606_v43  ;;  %v7620_v47 = vpack.c.bf16 %v1171_v45, %v1170_v44  ;;  %v1155_v50 = vld [vmem:[%s9181_s5 + $0x38] sm:$0xff]  ;;  %v1162_v45 = vld [vmem:[%s9181_s5 + $0x70] sm:$0xff] }
  0x4b   :  { %616 = vmatprep.subr.bf16.mxu0 %v7438_v51  ;;  %659 = vmatprep.subr.bf16.mxu1 %v5724_v54  ;;  %v7631_v51 = vpack.c.bf16 %v1203_v48, %v1202_v46  ;;  %v7633_v52 = vpack.c.bf16 %v1155_v50, %v1154_v49  ;;  %v1187_v54 = vld [vmem:[%s9181_s5 + $0x138] sm:$0xff]  ;;  %9346 = vst [vmem:[#allocation34_spill] sm:$0xff] %v7764_v42  ;;  %v1194_v50 = vld [vmem:[%s9181_s5 + $0x170] sm:$0xff] }
  0x4c   :  { %646 = vmatprep.mubr.bf16.mxu0 %v7197_v1  ;;  %689 = vmatprep.mubr.bf16.mxu1 %v7197_v1  ;;  %v1165_v1 = vld [vmem:[%s9181_s5 + $0x88] sm:$0xff]  ;;  %9330 = vst [vmem:[#allocation18_spill] sm:$0xff] %v7620_v47  ;;  %v1211_v44 = vld [vmem:[%s9181_s5 + $0x1f8] sm:$0xff] }
  0x4d   :  { %v7512_v11 = vpack.c.bf16 %v1165_v1, %v1164_v9  ;;  %9331 = vst [vmem:[#allocation19_spill] sm:$0xff] %v7631_v51  ;;  %9332 = vst [vmem:[#allocation20_spill] sm:$0xff] %v7633_v52  ;;  %v1207_v9 = vld [vmem:[%s9181_s5 + $0x1d8] sm:$0xff]  ;;  %v1158_v1 = vld [vmem:[%s9181_s5 + $0x50] sm:$0xff]  ;;  %v7775_v48 = vpack.c.bf16 %v1211_v44, %v1210_v41  ;;  %v7849_v41 = vsub.s32 1, %v7823_v17  ;;  %v7852_v44 = vsub.s32 3, %v7823_v17 }
  0x4e   :  { %617 = vmatpush1.bf16.msra.mxu0 %v5721_v55  ;;  %660 = vmatpush1.bf16.msra.mxu1 %v5723_v58  ;;  %v7642_v55 = vpack.c.bf16 %v1187_v54, %v1186_v53  ;;  %v1204_v58 = vld [vmem:[%s9181_s5 + $0x1c0] sm:$0xff]  ;;  %v7703_v12 = vpack.c.bf16 %v1207_v9, %v1206_v7  ;;  %v7705_v13 = vpack.c.bf16 %v1159_v10, %v1158_v1  ;;  %v1163_v46 = vld [vmem:[%s9181_s5 + $0x78] sm:$0xff] }
  0x4f   :  { %618 = vmatprep.subr.bf16.mxu0 %v5730_v59  ;;  %661 = vmatprep.subr.bf16.mxu1 %v5732_v62  ;;  %9318 = vst [vmem:[#allocation6_spill] sm:$0xff] %v7512_v11  ;;  %v7656_v59 = vpack.c.bf16 %v1173_v57, %v1172_v56  ;;  %v1157_v62 = vld [vmem:[%s9181_s5 + $0x48] sm:$0xff]  ;;  %9347 = vst [vmem:[#allocation35_spill] sm:$0xff] %v7775_v48  ;;  %v7777_v49 = vpack.c.bf16 %v1163_v46, %v1162_v45  ;;  %v1195_v53 = vld [vmem:[%s9181_s5 + $0x178] sm:$0xff]  ;;  %v7855_v45 = vsub.s32 4, %v7823_v17 }
  0x50   :  { %9333 = vst [vmem:[#allocation21_spill] sm:$0xff] %v7642_v55  ;;  %9339 = vst [vmem:[#allocation27_spill] sm:$0xff] %v7703_v12  ;;  %v7786_v54 = vpack.c.bf16 %v1195_v53, %v1194_v50  ;;  %v1228_v56 = vld [vmem:[%s9181_s5 + $0x280] sm:$0xff]  ;;  %v1229_v57 = vld [vmem:[%s9181_s5 + $0x288] sm:$0xff]  ;;  %v7858_v46 = vsub.s32 6, %v7823_v17  ;;  %v7863_v53 = vsub.s32 5, %v7823_v17 }
  0x51   :  { %9334 = vst [vmem:[#allocation22_spill] sm:$0xff] %v7656_v59  ;;  %9340 = vst [vmem:[#allocation28_spill] sm:$0xff] %v7705_v13 }
  0x52   :  { %619 = vmatpush1.bf16.msra.mxu0 %v5729_v63  ;;  %662 = vmatpush1.bf16.msra.mxu1 %v5731_v0  ;;  %v7667_v63 = vpack.c.bf16 %v1205_v60, %v1204_v58  ;;  %v7669_v0 = vpack.c.bf16 %v1157_v62, %v1156_v61  ;;  %9348 = vst [vmem:[#allocation36_spill] sm:$0xff] %v7777_v49  ;;  %9349 = vst [vmem:[#allocation37_spill] sm:$0xff] %v7786_v54  ;;  %v1260_v58 = vld [vmem:[%s9181_s5 + $0x380] sm:$0xff]  ;;  %v1261_v61 = vld [vmem:[%s9181_s5 + $0x388] sm:$0xff] }
  0x53   :  { %620 = vmatprep.subr.bf16.mxu0 %v5738_v2  ;;  %663 = vmatprep.subr.bf16.mxu1 %v5740_v3  ;;  %v1188_v2 = vld [vmem:[%s9181_s5 + $0x140] sm:$0xff]  ;;  %v1189_v3 = vld [vmem:[%s9181_s5 + $0x148] sm:$0xff]  ;;  %v7800_v60 = vpack.c.bf16 %v1229_v57, %v1228_v56  ;;  %v7805_v62 = vpack.c.bf16 %v1261_v61, %v1260_v58  ;;  %9355 = vst [vmem:[#allocation43_spill] sm:$0xff] %v7849_v41  ;;  %9356 = vst [vmem:[#allocation44_spill] sm:$0xff] %v7852_v44  ;;  %v7866_v56 = vsub.s32 7, %v7823_v17 }
  0x54   :  { %9335 = vst [vmem:[#allocation23_spill] sm:$0xff] %v7667_v63  ;;  %9336 = vst [vmem:[#allocation24_spill] sm:$0xff] %v7669_v0  ;;  %v7869_v57 = vrot.slane %v105_v33, %v7832_v25  ;;  %v483_v58 = vld [vmem:[%s9180_s4] sm:$0xff] }
  0x55   :  { %9350 = vst [vmem:[#allocation38_spill] sm:$0xff] %v7800_v60  ;;  %9351 = vst [vmem:[#allocation39_spill] sm:$0xff] %v7805_v62  ;;  %v1212_v61 = vld [vmem:[%s9181_s5 + $0x200] sm:$0xff] }
  0x56   :  { %621 = vmatpush1.bf16.msra.mxu0 %v5737_v4  ;;  %664 = vmatpush1.bf16.msra.mxu1 %v5739_v6  ;;  %v7678_v4 = vpack.c.bf16 %v1189_v3, %v1188_v2  ;;  %v1174_v6 = vld [vmem:[%s9181_s5 + $0xd0] sm:$0xff]  ;;  %9357 = vst [vmem:[#allocation45_spill] sm:$0xff] %v7855_v45  ;;  %9358 = vst [vmem:[#allocation46_spill] sm:$0xff] %v7858_v46  ;;  %v1244_v17 = vld [vmem:[%s9181_s5 + $0x300] sm:$0xff] }
  0x57   :  { %6359 = vmatprep.subr.bf16.mxu0 %v7512_v11  ;;  %6391 = vmatprep.subr.bf16.mxu1 %v7523_v15  ;;  %9359 = vst [vmem:[#allocation47_spill] sm:$0xff] %v7863_v53  ;;  %9360 = vst [vmem:[#allocation48_spill] sm:$0xff] %v7866_v56  ;;  %v7994_v15 = vpack.c.bf16 %v1213_v14, %v1212_v61 }
  0x58   :  { %9337 = vst [vmem:[#allocation25_spill] sm:$0xff] %v7678_v4 }
  0x59   :  { %5747 = vmatmul.mubr.msk.bf16.vlgmr.msra.gmra.mrb[12].mxu0 %vm307_vm0, %v104_v8  ;;  %5748 = vmatmul.mubr.msk.bf16.vlgmr.msra.gmra.mrb[12].mxu1 %vm307_vm0, %v104_v8  ;;  %v7692_v8 = vpack.c.bf16 %v1175_v5, %v1174_v6  ;;  %9364 = vst [vmem:[#allocation52_spill] sm:$0xff] %v7994_v15  ;;  %v1237_v15 = vld [vmem:[%s9181_s5 + $0x2c8] sm:$0xff] }
  0x5a   :  { %6361 = vmatpush3.bf16.msra.mxu0 %v7525_v16  ;;  %6393 = vmatpush3.bf16.msra.mxu1 %v7534_v19  ;;  %v7989_v19 = vrot.slane %v483_v58, %v7863_v53  ;;  %v1219_v16 = vld [vmem:[%s9181_s5 + $0x238] sm:$0xff] }
  0x5b   :  { %6363 = vmatprep.subr.bf16.mxu0 %v7548_v23  ;;  %6395 = vmatprep.subr.bf16.mxu1 %v7559_v27  ;;  %9338 = vst [vmem:[#allocation26_spill] sm:$0xff] %v7692_v8  ;;  %v7986_v27 = vrot.slane %v483_v58, %v7858_v46  ;;  %v1218_v23 = vld [vmem:[%s9181_s5 + $0x230] sm:$0xff] }
  0x5d   :  { %9363 = vst [vmem:[#allocation51_spill] sm:$0xff] %v7986_v27  ;;  %v1268_v27 = vld [vmem:[%s9181_s5 + $0x3c0] sm:$0xff] }
  0x5e   :  { %6365 = vmatpush3.bf16.msra.mxu0 %v7561_v28  ;;  %6397 = vmatpush3.bf16.msra.mxu1 %v7570_v31  ;;  %v7965_v31 = vrot.slane %v483_v58, %v7855_v45  ;;  %v7992_v28 = vrot.slane %v483_v58, %v7866_v56 }
  0x5f   :  { %6367 = vmatprep.subr.bf16.mxu0 %v7584_v35  ;;  %6399 = vmatprep.subr.bf16.mxu1 %v7595_v39  ;;  %v7959_v39 = vrot.slane %v483_v58, %v7849_v41  ;;  %v1249_v35 = vld [vmem:[%s9181_s5 + $0x328] sm:$0xff] }
  0x60   :  { %9362 = vst [vmem:[#allocation50_spill] sm:$0xff] %v7965_v31  ;;  %v1269_v31 = vld [vmem:[%s9181_s5 + $0x3c8] sm:$0xff] }
  0x62   :  { %6369 = vmatpush3.bf16.msra.mxu0 %v7597_v40  ;;  %6401 = vmatpush3.bf16.msra.mxu1 %v7606_v43  ;;  %v1264_v43 = vld [vmem:[%s9181_s5 + $0x3a0] sm:$0xff] }
  0x63   :  { %6371 = vmatprep.subr.bf16.mxu0 %v7620_v47  ;;  %6403 = vmatprep.subr.bf16.mxu1 %v7631_v51  ;;  %v1232_v51 = vld [vmem:[%s9181_s5 + $0x2a0] sm:$0xff]  ;;  %v7962_v47 = vrot.slane %v483_v58, %v7852_v44 }
  0x64   :  { %v1248_v40 = vld [vmem:[%s9181_s5 + $0x320] sm:$0xff] }
  0x66   :  { %6373 = vmatpush3.bf16.msra.mxu0 %v7633_v52  ;;  %6405 = vmatpush3.bf16.msra.mxu1 %v7642_v55  ;;  %v7932_v55 = vrot.slane %v483_v58, %v7832_v25  ;;  %v1217_v25 = vld [vmem:[%s9181_s5 + $0x228] sm:$0xff] }
  0x67   :  { %6375 = vmatprep.subr.bf16.mxu0 %v7656_v59  ;;  %6407 = vmatprep.subr.bf16.mxu1 %v7667_v63  ;;  %v7926_v63 = vrot.slane %v105_v33, %v7863_v53  ;;  %v1233_v59 = vld [vmem:[%s9181_s5 + $0x2a8] sm:$0xff]  ;;  %v1251_v53 = vld [vmem:[%s9181_s5 + $0x338] sm:$0xff] }
  0x6a   :  { %6377 = vmatpush3.bf16.msra.mxu0 %v7669_v0  ;;  %6409 = vmatpush3.bf16.msra.mxu1 %v7678_v4  ;;  %v1246_v4 = vld [vmem:[%s9181_s5 + $0x310] sm:$0xff]  ;;  %v7935_v0 = vrot.slane %v483_v58, %v7842_v34  ;;  %v1236_v58 = vld [vmem:[%s9181_s5 + $0x2c0] sm:$0xff] }
  0x6b   :  { %6379 = vmatprep.subr.bf16.mxu0 %v7692_v8  ;;  %6411 = vmatprep.subr.bf16.mxu1 %v7703_v12  ;;  %v7914_v12 = vrot.slane %v105_v33, %v7858_v46  ;;  %v7929_v8 = vrot.slane %v105_v33, %v7866_v56  ;;  %v1250_v46 = vld [vmem:[%s9181_s5 + $0x330] sm:$0xff] }
  0x6e   :  { %6381 = vmatpush3.bf16.msra.mxu0 %v7705_v13  ;;  %6413 = vmatpush3.bf16.msra.mxu1 %v7714_v18  ;;  %v7908_v18 = vrot.slane %v105_v33, %v7852_v44  ;;  %v1247_v13 = vld [vmem:[%s9181_s5 + $0x318] sm:$0xff] }
  0x6f   :  { %6383 = vmatprep.subr.bf16.mxu0 %v7728_v24  ;;  %6415 = vmatprep.subr.bf16.mxu1 %v7739_v30  ;;  %v1214_v30 = vld [vmem:[%s9181_s5 + $0x210] sm:$0xff]  ;;  %v1215_v24 = vld [vmem:[%s9181_s5 + $0x218] sm:$0xff] }
  0x70   :  { %v1235_v44 = vld [vmem:[%s9181_s5 + $0x2b8] sm:$0xff]  ;;  %v8017_v11 = vpack.c.bf16 %v1215_v24, %v1214_v30 }
  0x72   :  { %6385 = vmatpush3.bf16.msra.mxu0 %v7741_v32  ;;  %6417 = vmatpush3.bf16.msra.mxu1 %v7750_v36  ;;  %v1262_v36 = vld [vmem:[%s9181_s5 + $0x390] sm:$0xff]  ;;  %v7911_v32 = vrot.slane %v105_v33, %v7855_v45  ;;  %9367 = vst [vmem:[#allocation55_spill] sm:$0xff] %v8017_v11 }
  0x73   :  { %6387 = vmatprep.subr.bf16.mxu0 %v7764_v42  ;;  %6419 = vmatprep.subr.bf16.mxu1 %v7775_v48  ;;  %v1230_v48 = vld [vmem:[%s9181_s5 + $0x290] sm:$0xff]  ;;  %v7905_v42 = vrot.slane %v105_v33, %v7849_v41  ;;  %v1267_v41 = vld [vmem:[%s9181_s5 + $0x3b8] sm:$0xff] }
  0x74   :  { %v1266_v45 = vld [vmem:[%s9181_s5 + $0x3b0] sm:$0xff] }
  0x75   :  { %v1222_v11 = vld [vmem:[%s9181_s5 + $0x250] sm:$0xff] }
  0x76   :  { %6389 = vmatpush3.bf16.msra.mxu0 %v7777_v49  ;;  %6421 = vmatpush3.bf16.msra.mxu1 %v7786_v54  ;;  %v1245_v54 = vld [vmem:[%s9181_s5 + $0x308] sm:$0xff]  ;;  %v1263_v49 = vld [vmem:[%s9181_s5 + $0x398] sm:$0xff] }
  0x77   :  { %6423 = vmatprep.subr.bf16.mxu0 %v7800_v60  ;;  %6455 = vmatprep.subr.bf16.mxu1 %v7805_v62  ;;  %v7881_v62 = vrot.slane %v105_v33, %v7842_v34  ;;  %v1231_v60 = vld [vmem:[%s9181_s5 + $0x298] sm:$0xff]  ;;  %v1265_v33 = vld [vmem:[%s9181_s5 + $0x3a8] sm:$0xff]  ;;  %v1216_v34 = vld [vmem:[%s9181_s5 + $0x220] sm:$0xff]  ;;  %v8011_v61 = vpack.c.bf16 %v1245_v54, %v1244_v17  ;;  %v8015_v56 = vpack.c.bf16 %v1263_v49, %v1262_v36 }
  0x78   :  { %v8013_v14 = vpack.c.bf16 %v1231_v60, %v1230_v48  ;;  %v8040_v36 = vpack.c.bf16 %v1247_v13, %v1246_v4  ;;  %v1220_v49 = vld [vmem:[%s9181_s5 + $0x240] sm:$0xff]  ;;  %v1221_v54 = vld [vmem:[%s9181_s5 + $0x248] sm:$0xff]  ;;  %v1238_v4 = vld [vmem:[%s9181_s5 + $0x2d0] sm:$0xff]  ;;  %v8063_v17 = vpack.c.bf16 %v1265_v33, %v1264_v43  ;;  %v8080_v43 = vpack.c.bf16 %v1249_v35, %v1248_v40 }
  0x79   :  { %9365 = vst [vmem:[#allocation53_spill] sm:$0xff] %v8011_v61  ;;  %9366 = vst [vmem:[#allocation54_spill] sm:$0xff] %v8015_v56  ;;  %v1252_v60 = vld [vmem:[%s9181_s5 + $0x340] sm:$0xff]  ;;  %v1239_v13 = vld [vmem:[%s9181_s5 + $0x2d8] sm:$0xff]  ;;  %v8097_v35 = vpack.c.bf16 %v1219_v16, %v1218_v23  ;;  %v8099_v40 = vpack.c.bf16 %v1251_v53, %v1250_v46 }
  0x7a   :  { %9371 = vst [vmem:[#allocation59_spill] sm:$0xff] %v8040_v36  ;;  %9372 = vst [vmem:[#allocation60_spill] sm:$0xff] %v8063_v17  ;;  %v8065_v36 = vpack.c.bf16 %v1217_v25, %v1216_v34  ;;  %v1270_v56 = vld [vmem:[%s9181_s5 + $0x3d0] sm:$0xff]  ;;  %v1271_v61 = vld [vmem:[%s9181_s5 + $0x3d8] sm:$0xff]  ;;  %v8084_v25 = vpack.c.bf16 %v1267_v41, %v1266_v45  ;;  %v8101_v41 = vpack.c.bf16 %v1237_v15, %v1236_v58 }
  0x7b   :  { %9375 = vst [vmem:[#allocation63_spill] sm:$0xff] %v8080_v43  ;;  %v1223_v34 = vld [vmem:[%s9181_s5 + $0x258] sm:$0xff]  ;;  %v1254_v33 = vld [vmem:[%s9181_s5 + $0x350] sm:$0xff]  ;;  %9378 = vst [vmem:[#allocation66_spill] sm:$0xff] %v8097_v35 }
  0x7c   :  { %9373 = vst [vmem:[#allocation61_spill] sm:$0xff] %v8065_v36  ;;  %9377 = vst [vmem:[#allocation65_spill] sm:$0xff] %v8084_v25  ;;  %v1255_v17 = vld [vmem:[%s9181_s5 + $0x358] sm:$0xff]  ;;  %v1240_v45 = vld [vmem:[%s9181_s5 + $0x2e0] sm:$0xff]  ;;  %v8133_v25 = vpack.c.bf16 %v1221_v54, %v1220_v49 }
  0x7d   :  { %9379 = vst [vmem:[#allocation67_spill] sm:$0xff] %v8099_v40  ;;  %9380 = vst [vmem:[#allocation68_spill] sm:$0xff] %v8101_v41  ;;  %v1273_v53 = vld [vmem:[%s9181_s5 + $0x3e8] sm:$0xff]  ;;  %v1224_v49 = vld [vmem:[%s9181_s5 + $0x260] sm:$0xff] }
  0x7e   :  { %9383 = vst [vmem:[#allocation71_spill] sm:$0xff] %v8133_v25  ;;  %v1225_v54 = vld [vmem:[%s9181_s5 + $0x268] sm:$0xff] }
  0xfc   :  { %v345_v2 = vpop.f32.mrb[0].mxu0  ;;  %v7809_v3 = vpop.f32.mrb[0].mxu1 }
  0xfd   :  { %v7811_v6 = vpop.f32.mrb[1].mxu0  ;;  %v7813_v5 = vpop.f32.mrb[1].mxu1  ;;  %v7956_v52 = vadd.f32 %v345_v2, %v7869_v57  ;;  %v1234_v2 = vld [vmem:[%s9181_s5 + $0x2b0] sm:$0xff]  ;;  %v8030_v48 = vadd.f32 %v7809_v3, %v7881_v62  ;;  %v1253_v3 = vld [vmem:[%s9181_s5 + $0x348] sm:$0xff] }
  0xfe   :  { %v7815_v7 = vpop.f32.mrb[2].mxu0  ;;  %v7817_v9 = vpop.f32.mrb[2].mxu1  ;;  %v8034_v24 = vadd.f32 %v7811_v6, %v7905_v42  ;;  %v8038_v30 = vadd.f32 %v7813_v5, %v7908_v18  ;;  %v8061_v5 = vpack.c.bf16 %v1233_v59, %v1232_v51  ;;  %v8082_v59 = vpack.c.bf16 %v1235_v44, %v1234_v2  ;;  %v1272_v2 = vld [vmem:[%s9181_s5 + $0x3e0] sm:$0xff] }
  0xff   :  { %v7819_v1 = vpop.f32.mrb[3].mxu0  ;;  %v7821_v10 = vpop.f32.mrb[3].mxu1  ;;  %9361 = vst [vmem:[#allocation49_spill] sm:$0xff] %v7956_v52  ;;  %9368 = vst [vmem:[#allocation56_spill] sm:$0xff] %v8030_v48  ;;  %v700_v6 = vrot.slane %v7956_v52, 4  ;;  %v8078_v51 = vadd.f32 %v7815_v7, %v7869_v57  ;;  %v8103_v44 = vpack.c.bf16 %v1269_v31, %v1268_v27  ;;  %v1241_v57 = vld [vmem:[%s9181_s5 + $0x2e8] sm:$0xff]  ;;  %v8119_v27 = vadd.f32 %v7817_v9, %v7881_v62 }
 0x100   :  { %9369 = vst [vmem:[#allocation57_spill] sm:$0xff] %v8034_v24  ;;  %9370 = vst [vmem:[#allocation58_spill] sm:$0xff] %v8038_v30  ;;  %v712_v16 = vrot.slane %v8030_v48, 4  ;;  %v706_v23 = vrot.slane %v8034_v24, 4  ;;  %v718_v15 = vrot.slane %v8038_v30, 4  ;;  %v8135_v41 = vpack.c.bf16 %v1253_v3, %v1252_v60  ;;  %v1257_v3 = vld [vmem:[%s9181_s5 + $0x368] sm:$0xff] }
 0x101   :  { %9374 = vst [vmem:[#allocation62_spill] sm:$0xff] %v8078_v51  ;;  %9376 = vst [vmem:[#allocation64_spill] sm:$0xff] %v8082_v59  ;;  %v701_v58 = vadd.f32 %v700_v6, %v7956_v52  ;;  %v8137_v62 = vpack.c.bf16 %v1239_v13, %v1238_v4  ;;  %v748_v9 = vrot.slane %v8078_v51, 4  ;;  %v8142_v43 = vadd.f32 %v7819_v1, %v7905_v42 }
 0x102   :  { %9381 = vst [vmem:[#allocation69_spill] sm:$0xff] %v8103_v44  ;;  %9382 = vst [vmem:[#allocation70_spill] sm:$0xff] %v8119_v27  ;;  %v8148_v6 = vpack.c.bf16 %v1271_v61, %v1270_v56  ;;  %v8150_v52 = vpack.c.bf16 %v1223_v34, %v1222_v11  ;;  %v8160_v42 = vadd.f32 %v7821_v10, %v7908_v18  ;;  %v1256_v61 = vld [vmem:[%s9181_s5 + $0x360] sm:$0xff]  ;;  %v760_v13 = vrot.slane %v8119_v27, 4  ;;  %v1243_v34 = vld [vmem:[%s9181_s5 + $0x2f8] sm:$0xff] }
 0x103   :  { %9384 = vst [vmem:[#allocation72_spill] sm:$0xff] %v8135_v41  ;;  %9385 = vst [vmem:[#allocation73_spill] sm:$0xff] %v8137_v62  ;;  %v8164_v60 = vpack.c.bf16 %v1255_v17, %v1254_v33  ;;  %v8166_v56 = vpack.c.bf16 %v1241_v57, %v1240_v45  ;;  %v8168_v11 = vpack.c.bf16 %v1273_v53, %v1272_v2  ;;  %v1242_v17 = vld [vmem:[%s9181_s5 + $0x2f0] sm:$0xff]  ;;  %v702_v33 = vrot.slane %v701_v58, 2 }
 0x104   :  { %9386 = vst [vmem:[#allocation74_spill] sm:$0xff] %v8142_v43  ;;  %9387 = vst [vmem:[#allocation75_spill] sm:$0xff] %v8148_v6  ;;  %v713_v4 = vadd.f32 %v712_v16, %v8030_v48  ;;  %v707_v18 = vadd.f32 %v706_v23, %v8034_v24  ;;  %v719_v10 = vadd.f32 %v718_v15, %v8038_v30  ;;  %v754_v23 = vrot.slane %v8142_v43, 4  ;;  %v1227_v48 = vld [vmem:[%s9181_s5 + $0x278] sm:$0xff] }
 0x105   :  { %9388 = vst [vmem:[#allocation76_spill] sm:$0xff] %v8150_v52  ;;  %9389 = vst [vmem:[#allocation77_spill] sm:$0xff] %v8160_v42  ;;  %v8194_v2 = vpack.c.bf16 %v1225_v54, %v1224_v49  ;;  %v749_v16 = vadd.f32 %v748_v9, %v8078_v51  ;;  %v917_v15 = vmul.f32 %v8142_v43, %v8142_v43  ;;  %v766_v54 = vrot.slane %v8160_v42, 4 }
 0x106   :  { %9390 = vst [vmem:[#allocation78_spill] sm:$0xff] %v8164_v60  ;;  %9391 = vst [vmem:[#allocation79_spill] sm:$0xff] %v8166_v56  ;;  %v8200_v53 = vpack.c.bf16 %v1257_v3, %v1256_v61  ;;  %v8210_v49 = vmul.f32 %v8034_v24, %v8034_v24  ;;  %v8214_v9 = vmul.f32 %v8038_v30, %v8038_v30  ;;  %v1226_v3 = vld [vmem:[%s9181_s5 + $0x270] sm:$0xff]  ;;  %v708_v51 = vrot.slane %v707_v18, 2 }
 0x107   :  { %9392 = vst [vmem:[#allocation80_spill] sm:$0xff] %v8168_v11  ;;  %9395 = vst [vmem:[#allocation83_spill] sm:$0xff] %v8194_v2  ;;  %v8217_v61 = vpack.c.bf16 %v1243_v34, %v1242_v17  ;;  %v720_v24 = vrot.slane %v719_v10, 2  ;;  %v761_v11 = vadd.f32 %v760_v13, %v8119_v27  ;;  %v1258_v30 = vld [vmem:[%s9181_s5 + $0x370] sm:$0xff]  ;;  %v1259_v17 = vld [vmem:[%s9181_s5 + $0x378] sm:$0xff]  ;;  %v8232_v34 = vadd.f32 %v702_v33, %v701_v58 }
 0x108   :  { %9396 = vst [vmem:[#allocation84_spill] sm:$0xff] %v8200_v53  ;;  %9397 = vst [vmem:[#allocation85_spill] sm:$0xff] %v8214_v9  ;;  %v714_v53 = vrot.slane %v713_v4, 2  ;;  %v750_v6 = vrot.slane %v749_v16, 2  ;;  %v755_v56 = vadd.f32 %v754_v23, %v8142_v43  ;;  %v978_v13 = vrot.slane %v917_v15, 4 }
 0x109   :  { %9398 = vst [vmem:[#allocation86_spill] sm:$0xff] %v8217_v61  ;;  %v8239_v27 = vpack.c.bf16 %v1227_v48, %v1226_v3  ;;  %v767_v62 = vadd.f32 %v766_v54, %v8160_v42  ;;  %v8244_v58 = vpack.c.bf16 %v1259_v17, %v1258_v30  ;;  %v762_v25 = vrot.slane %v761_v11, 2 }
 0x10a   :  { %v8246_v33 = vadd.f32 %v714_v53, %v713_v4  ;;  %v8248_v36 = vadd.f32 %v708_v51, %v707_v18  ;;  %v8263_v54 = vadd.f32 %v750_v6, %v749_v16  ;;  %v756_v4 = vrot.slane %v755_v56, 2 }
 0x10b   :  { %9400 = vst [vmem:[#allocation88_spill] sm:$0xff] %v8239_v27  ;;  %9401 = vst [vmem:[#allocation89_spill] sm:$0xff] %v8244_v58  ;;  %v8265_v53 = vadd.f32 %v978_v13, %v917_v15  ;;  %v768_v51 = vrot.slane %v767_v62, 2 }
 0x10c   :  { %v7825_v20 = vpop.f32.mrb[4].mxu0  ;;  %v7827_v21 = vpop.f32.mrb[4].mxu1  ;;  %v8343_v15 = vadd.f32 %v756_v4, %v755_v56 }
 0x10d   :  { %v7829_v22 = vpop.f32.mrb[5].mxu0  ;;  %v7834_v26 = vpop.f32.mrb[5].mxu1  ;;  %v8254_v23 = vadd.f32 %v7825_v20, %v7911_v32  ;;  %9402 = vst [vmem:[#allocation90_spill] sm:$0xff] %v8265_v53  ;;  %v8273_v20 = vadd.f32 %v7827_v21, %v7914_v12 }
 0x10e   :  { %v7836_v29 = vpop.f32.mrb[6].mxu0  ;;  %v7844_v37 = vpop.f32.mrb[6].mxu1  ;;  %v8188_v45 = vadd.f32 %v7829_v22, %v7926_v63  ;;  %v8192_v57 = vadd.f32 %v7834_v26, %v7929_v8  ;;  %v1274_v22 = vld [vmem:[%s9181_s5 + $0x3f0] sm:$0xff]  ;;  %v1275_v26 = vld [vmem:[%s9181_s5 + $0x3f8] sm:$0xff] }
 0x10f   :  { %v7846_v38 = vpop.f32.mrb[7].mxu0  ;;  %v7860_v50 = vpop.f32.mrb[7].mxu1  ;;  %v8236_v2 = vpack.c.bf16 %v1275_v26, %v1274_v22  ;;  %v8250_v22 = vadd.f32 %v720_v24, %v719_v10  ;;  %v8269_v24 = vmul.f32 %v8160_v42, %v8160_v42  ;;  %v8285_v10 = vadd.f32 %v762_v25, %v761_v11 }
 0x110   :  { %9393 = vst [vmem:[#allocation81_spill] sm:$0xff] %v8188_v45  ;;  %9394 = vst [vmem:[#allocation82_spill] sm:$0xff] %v8192_v57  ;;  %v730_v61 = vrot.slane %v8188_v45, 4  ;;  %v742_v60 = vrot.slane %v8192_v57, 4  ;;  %v8289_v16 = vadd.f32 %v7860_v50, %v7929_v8 }
 0x111   :  { %9399 = vst [vmem:[#allocation87_spill] sm:$0xff] %v8236_v2  ;;  %v764_v53 = vrot.slane %v8285_v10, 1 }
 0x112   :  { %v8257_v48 = vadd.f32 %v730_v61, %v8188_v45  ;;  %v8260_v26 = vadd.f32 %v742_v60, %v8192_v57  ;;  %v8277_v60 = vadd.f32 %v7846_v38, %v7926_v63  ;;  %9405 = vst [vmem:[#allocation93_spill] sm:$0xff] %v8289_v16 }
 0x114   :  { %9403 = vst [vmem:[#allocation91_spill] sm:$0xff] %v8277_v60  ;;  %v778_v17 = vrot.slane %v8277_v60, 4 }
 0x11c   :  { %v8095_v7 = vpop.f32.mrb[8].mxu0  ;;  %v8121_v31 = vpop.f32.mrb[8].mxu1 }
 0x11d   :  { %v8123_v46 = vpop.f32.mrb[9].mxu0  ;;  %v8129_v44 = vpop.f32.mrb[9].mxu1  ;;  %v8281_v6 = vadd.f32 %v8095_v7, %v7932_v55  ;;  %v8293_v21 = vadd.f32 %v8121_v31, %v7935_v0 }
 0x11e   :  { %v8131_v40 = vpop.f32.mrb[10].mxu0  ;;  %v8144_v35 = vpop.f32.mrb[10].mxu1  ;;  %v8320_v61 = vadd.f32 %v8123_v46, %v7959_v39  ;;  %v8324_v3 = vadd.f32 %v8129_v44, %v7962_v47  ;;  %v790_v46 = vrot.slane %v8289_v16, 4 }
 0x11f   :  { %v8146_v59 = vpop.f32.mrb[11].mxu0  ;;  %v8162_v1 = vpop.f32.mrb[11].mxu1  ;;  %9404 = vst [vmem:[#allocation92_spill] sm:$0xff] %v8281_v6  ;;  %9406 = vst [vmem:[#allocation94_spill] sm:$0xff] %v8293_v21  ;;  %v8297_v63 = vadd.f32 %v8131_v40, %v7932_v55  ;;  %v8306_v8 = vadd.f32 %v8144_v35, %v7935_v0  ;;  %v8312_v55 = vadd.f32 %v7836_v29, %v7911_v32  ;;  %v796_v32 = vrot.slane %v8281_v6, 4 }
 0x120   :  { %v8316_v40 = vadd.f32 %v7844_v37, %v7914_v12  ;;  %9410 = vst [vmem:[#allocation98_spill] sm:$0xff] %v8320_v61  ;;  %9411 = vst [vmem:[#allocation99_spill] sm:$0xff] %v8324_v3  ;;  %v8332_v29 = vadd.f32 %v8146_v59, %v7959_v39  ;;  %v710_v37 = vrot.slane %v8248_v36, 1  ;;  %v808_v13 = vrot.slane %v8293_v21, 4 }
 0x121   :  { %9407 = vst [vmem:[#allocation95_spill] sm:$0xff] %v8297_v63  ;;  %9408 = vst [vmem:[#allocation96_spill] sm:$0xff] %v8306_v8  ;;  %v844_v44 = vrot.slane %v8297_v63, 4  ;;  %v8340_v52 = vadd.f32 %v8162_v1, %v7962_v47  ;;  %v856_v41 = vrot.slane %v8306_v8, 4  ;;  %v722_v39 = vrot.slane %v8250_v22, 1 }
 0x122   :  { %9409 = vst [vmem:[#allocation97_spill] sm:$0xff] %v8312_v55  ;;  %9412 = vst [vmem:[#allocation100_spill] sm:$0xff] %v8332_v29  ;;  %v8346_v59 = vadd.f32 %v768_v51, %v767_v62  ;;  %v802_v11 = vrot.slane %v8320_v61, 4  ;;  %v814_v25 = vrot.slane %v8324_v3, 4  ;;  %v772_v47 = vrot.slane %v8312_v55, 4 }
 0x123   :  { %9413 = vst [vmem:[#allocation101_spill] sm:$0xff] %v8340_v52  ;;  %v8358_v1 = vadd.f32 %v778_v17, %v8277_v60  ;;  %v797_v56 = vadd.f32 %v796_v32, %v8281_v6  ;;  %v850_v62 = vrot.slane %v8332_v29, 4  ;;  %v8363_v4 = vadd.f32 %v790_v46, %v8289_v16 }
 0x124   :  { %v809_v51 = vadd.f32 %v808_v13, %v8293_v21  ;;  %v862_v43 = vrot.slane %v8340_v52, 4  ;;  %v857_v17 = vadd.f32 %v856_v41, %v8306_v8  ;;  %v803_v46 = vadd.f32 %v802_v11, %v8320_v61 }
 0x125   :  { %v815_v13 = vadd.f32 %v814_v25, %v8324_v3  ;;  %v8384_v21 = vadd.f32 %v772_v47, %v8312_v55  ;;  %v798_v41 = vrot.slane %v797_v56, 2 }
 0x126   :  { %v863_v11 = vadd.f32 %v862_v43, %v8340_v52  ;;  %v804_v47 = vrot.slane %v803_v46, 2 }
 0x127   :  { %v816_v55 = vrot.slane %v815_v13, 2 }
 0x128   :  { %v864_v27 = vrot.slane %v863_v11, 2 }
 0x12c   :  { %v8283_v18 = vpop.f32.mrb[12].mxu0  ;;  %v8299_v38 = vpop.f32.mrb[12].mxu1 }
 0x12d   :  { %v650_v7 = vpop.f32.mrb[13].mxu0  ;;  %v693_v50 = vpop.f32.mrb[13].mxu1 }
 0x12e   :  { %v8308_v31 = vpop.f32.mrb[14].mxu0  ;;  %v8326_v0 = vpop.f32.mrb[14].mxu1  ;;  %v8351_v30 = vadd.f32 %v650_v7, %v7989_v19  ;;  %v8354_v42 = vadd.f32 %v693_v50, %v7992_v28  ;;  %v845_v7 = vadd.f32 %v844_v44, %v8297_v63  ;;  %v8370_v50 = vmul.f32 %v8320_v61, %v8320_v61 }
 0x12f   :  { %v654_v35 = vpop.f32.mrb[15].mxu0  ;;  %v697_v12 = vpop.f32.mrb[15].mxu1  ;;  %v858_v61 = vrot.slane %v857_v17, 2  ;;  %v8407_v63 = vmul.f32 %v8332_v29, %v8332_v29 }
 0x130   :  { %9414 = vst [vmem:[#allocation102_spill] sm:$0xff] %v8351_v30  ;;  %9415 = vst [vmem:[#allocation103_spill] sm:$0xff] %v8354_v42  ;;  %v8374_v57 = vadd.f32 %v654_v35, %v7989_v19  ;;  %v8377_v32 = vadd.f32 %v697_v12, %v7992_v28  ;;  %v826_v44 = vrot.slane %v8351_v30, 4  ;;  %v838_v16 = vrot.slane %v8354_v42, 4 }
 0x131   :  { %v851_v19 = vadd.f32 %v850_v62, %v8332_v29  ;;  %v810_v28 = vrot.slane %v809_v51, 2  ;;  %v846_v12 = vrot.slane %v845_v7, 2  ;;  %v799_v35 = vadd.f32 %v798_v41, %v797_v56  ;;  %v9419_v56 = vld [vmem:[#allocation51_spill] sm:$0xff] }
 0x132   :  { %9416 = vst [vmem:[#allocation104_spill] sm:$0xff] %v8374_v57  ;;  %9417 = vst [vmem:[#allocation105_spill] sm:$0xff] %v8377_v32  ;;  %v874_v8 = vrot.slane %v8374_v57, 4  ;;  %v886_v58 = vrot.slane %v8377_v32, 4  ;;  %v8394_v45 = vadd.f32 %v826_v44, %v8351_v30  ;;  %v8397_v62 = vadd.f32 %v838_v16, %v8354_v42  ;;  %v9418_v30 = vld [vmem:[#allocation50_spill] sm:$0xff] }
 0x133   :  { %v852_v60 = vrot.slane %v851_v19, 2  ;;  %v811_v25 = vadd.f32 %v810_v28, %v809_v51  ;;  %v847_v2 = vadd.f32 %v846_v12, %v845_v7  ;;  %v859_v44 = vadd.f32 %v858_v61, %v857_v17 }
 0x134   :  { %v8400_v6 = vadd.f32 %v874_v8, %v8374_v57  ;;  %v8403_v43 = vadd.f32 %v886_v58, %v8377_v32  ;;  %v8411_v16 = vadd.f32 %v8283_v18, %v9418_v30  ;;  %v8415_v8 = vadd.f32 %v8308_v31, %v9418_v30 }
 0x135   :  { %v8419_v58 = vadd.f32 %v8326_v0, %v9419_v56  ;;  %v828_v51 = vrot.slane %v8394_v45, 2  ;;  %v711_v17 = vadd.f32 %v710_v37, %v8248_v36  ;;  %v758_v18 = vrot.slane %v8343_v15, 1 }
 0x136   :  { %v876_v41 = vrot.slane %v8400_v6, 2  ;;  %v805_v28 = vadd.f32 %v804_v47, %v803_v46  ;;  %v853_v12 = vadd.f32 %v852_v60, %v851_v19  ;;  %v723_v30 = vadd.f32 %v722_v39, %v8250_v22 }
 0x137   :  { %v770_v31 = vrot.slane %v8346_v59, 1  ;;  %v817_v0 = vadd.f32 %v816_v55, %v815_v13  ;;  %v865_v29 = vadd.f32 %v864_v27, %v863_v11  ;;  %v759_v42 = vadd.f32 %v758_v18, %v8343_v15 }
 0x138   :  { %v806_v32 = vrot.slane %v805_v28, 1  ;;  %v854_v7 = vrot.slane %v853_v12, 1  ;;  %v9420_v57 = vrot.slane %v8232_v34, 1  ;;  %v752_v60 = vrot.slane %v8263_v54, 1 }
 0x139   :  { %v771_v36 = vadd.f32 %v770_v31, %v8346_v59  ;;  %v818_v37 = vrot.slane %v817_v0, 1  ;;  %v866_v9 = vrot.slane %v865_v29, 1  ;;  %v800_v39 = vrot.slane %v799_v35, 1 }
 0x13a   :  { %v705_v61 = vadd.f32 %v9420_v57, %v8232_v34  ;;  %v807_v46 = vadd.f32 %v806_v32, %v805_v28  ;;  %v855_v22 = vadd.f32 %v854_v7, %v853_v12  ;;  %v848_v19 = vrot.slane %v847_v2, 1 }
 0x13b   :  { %v819_v55 = vadd.f32 %v818_v37, %v817_v0  ;;  %v867_v27 = vadd.f32 %v866_v9, %v865_v29  ;;  %v753_v15 = vadd.f32 %v752_v60, %v8263_v54  ;;  %v716_v13 = vrot.slane %v8246_v33, 1  ;;  %v9424_v60 = vld [vmem:[#allocation52_spill] sm:$0xff] }
 0x13c   :  { %v893_v11 = vadd.f32 %v807_v46, %v711_v17  ;;  %v901_v47 = vadd.f32 %v855_v22, %v759_v42  ;;  %v801_v18 = vadd.f32 %v800_v39, %v799_v35  ;;  %v849_v57 = vadd.f32 %v848_v19, %v847_v2 }
 0x13d   :  { %v895_v34 = vadd.f32 %v819_v55, %v723_v30  ;;  %v903_v59 = vadd.f32 %v867_v27, %v771_v36  ;;  %v717_v31 = vadd.f32 %v716_v13, %v8246_v33  ;;  %v812_v12 = vrot.slane %v811_v25, 1 }
 0x13e   :  { %v1294_v32 = vsel %vm1292_vm1, %v901_v47, %v893_v11  ;;  %v892_v7 = vadd.f32 %v801_v18, %v705_v61  ;;  %v900_v28 = vadd.f32 %v849_v57, %v753_v15  ;;  %v765_v54 = vadd.f32 %v764_v53, %v8285_v10 }
 0x13f   :  { %1373 = vmatprep.mubr.f32.mxu0 %v1294_v32  ;;  %v1296_v9 = vsel %vm1292_vm1, %v903_v59, %v895_v34  ;;  %v860_v29 = vrot.slane %v859_v44, 1  ;;  %v9421_v42 = vrot.slane %v8257_v48, 2  ;;  %v813_v35 = vadd.f32 %v812_v12, %v811_v25  ;;  %v9428_v34 = vld [vmem:[#allocation55_spill] sm:$0xff] }
 0x140   :  { %1443 = vmatprep.mubr.f32.mxu1 %v1296_v9  ;;  %v1293_v33 = vsel %vm1292_vm1, %v900_v28, %v892_v7  ;;  %v9422_v17 = vrot.slane %v8358_v1, 2  ;;  %v829_v30 = vadd.f32 %v828_v51, %v8394_v45  ;;  %v877_v53 = vadd.f32 %v876_v41, %v8400_v6 }
 0x141   :  { %v733_v2 = vadd.f32 %v9421_v42, %v8257_v48  ;;  %1374 = vmatmul.mubr.f32.vlgmr.msra.gmra.mrb[16].mxu0 %v1293_v33  ;;  %v861_v0 = vadd.f32 %v860_v29, %v859_v44  ;;  %v9423_v10 = vrot.slane %v8260_v26, 2  ;;  %v868_v48 = vrot.slane %v8415_v8, 4 }
 0x142   :  { %v781_v61 = vadd.f32 %v9422_v17, %v8358_v1  ;;  %6425 = vmatpush3.bf16.msra.mxu0 %v9424_v60  ;;  %v830_v46 = vrot.slane %v829_v30, 1  ;;  %v9425_v1 = vrot.slane %v8363_v4, 2  ;;  %v894_v45 = vadd.f32 %v813_v35, %v717_v31  ;;  %v9429_v31 = vld [vmem:[#allocation53_spill] sm:$0xff] }
 0x143   :  { %v734_v36 = vrot.slane %v733_v2, 1  ;;  %v745_v37 = vadd.f32 %v9423_v10, %v8260_v26  ;;  %v902_v51 = vadd.f32 %v861_v0, %v765_v54  ;;  %6427 = vmatprep.subr.bf16.mxu0 %v8013_v14  ;;  %v878_v6 = vrot.slane %v877_v53, 1  ;;  %v9430_v54 = vld [vmem:[#allocation54_spill] sm:$0xff]  ;;  %v9432_v0 = vld [vmem:[#allocation61_spill] sm:$0xff]  ;;  %v9433_v10 = vld [vmem:[#allocation59_spill] sm:$0xff] }
 0x144   :  { %v782_v25 = vrot.slane %v781_v61, 1  ;;  %v793_v22 = vadd.f32 %v9425_v1, %v8363_v4  ;;  %v831_v39 = vadd.f32 %v830_v46, %v829_v30  ;;  %v9426_v26 = vrot.slane %v8397_v62, 2 }
 0x145   :  { %v735_v44 = vadd.f32 %v734_v36, %v733_v2  ;;  %v746_v19 = vrot.slane %v745_v37, 1  ;;  %v1295_v27 = vsel %vm1292_vm1, %v902_v51, %v894_v45  ;;  %v879_v15 = vadd.f32 %v878_v6, %v877_v53  ;;  %v9436_v45 = vld [vmem:[#allocation60_spill] sm:$0xff] }
 0x146   :  { %v783_v41 = vadd.f32 %v782_v25, %v781_v61  ;;  %v841_v55 = vadd.f32 %v9426_v26, %v8397_v62  ;;  %v794_v13 = vrot.slane %v793_v22, 1  ;;  %v9427_v4 = vrot.slane %v8403_v43, 2  ;;  %1444 = vmatmul.mubr.f32.vlgmr.msra.gmra.mrb[16].mxu1 %v1295_v27  ;;  %6429 = vmatpush3.bf16.msra.mxu0 %v9428_v34  ;;  %v9438_v27 = vld [vmem:[#allocation66_spill] sm:$0xff] }
 0x147   :  { %v1090_v47 = vrot.slane %v8407_v63, 4  ;;  %v1031_v18 = vmul.f32 %v8340_v52, %v8340_v52  ;;  %v820_v57 = vrot.slane %v8411_v16, 4  ;;  %v8474_v62 = vadd.f32 %v8299_v38, %v9419_v56  ;;  %6457 = vmatpush3.bf16.msra.mxu1 %v9429_v31  ;;  %6431 = vmatprep.subr.bf16.mxu0 %v8061_v5 }
 0x148   :  { %v889_v11 = vadd.f32 %v9427_v4, %v8403_v43  ;;  %v842_v59 = vrot.slane %v841_v55, 1  ;;  %v897_v43 = vadd.f32 %v831_v39, %v735_v44  ;;  %v905_v32 = vadd.f32 %v879_v15, %v783_v41  ;;  %6459 = vmatprep.subr.bf16.mxu1 %v9430_v54 }
 0x149   :  { %v1023_v28 = vmul.f32 %v8324_v3, %v8324_v3  ;;  %v869_v12 = vadd.f32 %v868_v48, %v8415_v8  ;;  %v880_v9 = vrot.slane %v8419_v58, 4  ;;  %v747_v56 = vadd.f32 %v746_v19, %v745_v37  ;;  %v9434_v37 = vld [vmem:[#allocation64_spill] sm:$0xff] }
 0x14a   :  { %v890_v7 = vrot.slane %v889_v11, 1  ;;  %v843_v29 = vadd.f32 %v842_v59, %v841_v55  ;;  %v1298_v38 = vsel %vm1292_vm1, %v905_v32, %v897_v43  ;;  %v795_v42 = vadd.f32 %v794_v13, %v793_v22  ;;  %6433 = vmatpush3.bf16.msra.mxu0 %v9432_v0 }
 0x14b   :  { %v784_v33 = vrot.slane %v8316_v40, 4  ;;  %v9431_v35 = vrot.slane %v8370_v50, 4  ;;  %v1091_v61 = vadd.f32 %v1090_v47, %v8407_v63  ;;  %v821_v30 = vadd.f32 %v820_v57, %v8411_v16  ;;  %1513 = vmatprep.mubr.f32.mxu0 %v1298_v38  ;;  %6461 = vmatpush3.bf16.msra.mxu1 %v9433_v10  ;;  %v9441_v47 = vld [vmem:[#allocation90_spill] sm:$0xff] }
 0x14c   :  { %v891_v2 = vadd.f32 %v890_v7, %v889_v11  ;;  %v1102_v36 = vrot.slane %v1031_v18, 4  ;;  %v832_v53 = vrot.slane %v8474_v62, 4  ;;  %6435 = vmatprep.subr.bf16.mxu0 %v9434_v37  ;;  %v899_v48 = vadd.f32 %v843_v29, %v747_v56  ;;  %6463 = vmatprep.subr.bf16.mxu1 %v9436_v45  ;;  %v9439_v11 = vld [vmem:[#allocation63_spill] sm:$0xff]  ;;  %v9442_v29 = vld [vmem:[#allocation65_spill] sm:$0xff] }
 0x14d   :  { %v1043_v17 = vadd.f32 %v9431_v35, %v8370_v50  ;;  %v990_v46 = vrot.slane %v8269_v24, 4  ;;  %v9435_v50 = vrot.slane %v8254_v23, 4  ;;  %v1054_v1 = vrot.slane %v1023_v28, 4 }
 0x14e   :  { %v907_v25 = vadd.f32 %v891_v2, %v795_v42  ;;  %v870_v22 = vrot.slane %v869_v12, 2  ;;  %v9437_v51 = vrot.slane %v8210_v49, 4  ;;  %v736_v6 = vrot.slane %v8273_v20, 4  ;;  %6437 = vmatpush3.bf16.msra.mxu0 %v9438_v27  ;;  %v9443_v2 = vld [vmem:[#allocation85_spill] sm:$0xff] }
 0x14f   :  { %v725_v63 = vadd.f32 %v9435_v50, %v8254_v23  ;;  %v881_v41 = vadd.f32 %v880_v9, %v8419_v58  ;;  %v774_v19 = vrot.slane %v8384_v21, 2  ;;  %v785_v26 = vadd.f32 %v784_v33, %v8316_v40  ;;  %6465 = vmatpush3.bf16.msra.mxu1 %v9439_v11 }
 0x150   :  { %v931_v44 = vadd.f32 %v9437_v51, %v8210_v49  ;;  %v1300_v39 = vsel %vm1292_vm1, %v907_v25, %v899_v48  ;;  %v822_v55 = vrot.slane %v821_v30, 2  ;;  %v1092_v15 = vrot.slane %v1091_v61, 2  ;;  %v9440_v49 = vld [vmem:[#allocation68_spill] sm:$0xff]  ;;  %6467 = vmatprep.subr.bf16.mxu1 %v9442_v29  ;;  %v9445_v25 = vld [vmem:[#allocation71_spill] sm:$0xff] }
 0x151   :  { %1583 = vmatprep.mubr.f32.mxu1 %v1300_v39  ;;  %v1103_v13 = vadd.f32 %v1102_v36, %v1031_v18  ;;  %v833_v4 = vadd.f32 %v832_v53, %v8474_v62  ;;  %6439 = vmatprep.subr.bf16.mxu0 %v9440_v49  ;;  %v980_v57 = vrot.slane %v9441_v47, 2  ;;  %v1044_v59 = vrot.slane %v1043_v17, 2  ;;  %v9453_v29 = vld [vmem:[#allocation83_spill] sm:$0xff] }
 0x152   :  { %v991_v43 = vadd.f32 %v990_v46, %v8269_v24  ;;  %v726_v32 = vrot.slane %v725_v63, 2  ;;  %v1055_v7 = vadd.f32 %v1054_v1, %v1023_v28  ;;  %v871_v9 = vadd.f32 %v870_v22, %v869_v12  ;;  %6441 = vmatpush3.bf16.msra.mxu0 %v9445_v25  ;;  %v9446_v28 = vld [vmem:[#allocation67_spill] sm:$0xff]  ;;  %v9447_v12 = vld [vmem:[#allocation73_spill] sm:$0xff] }
 0x153   :  { %v737_v38 = vadd.f32 %v736_v6, %v8273_v20  ;;  %v882_v56 = vrot.slane %v881_v41, 2  ;;  %v932_v18 = vrot.slane %v931_v44, 2  ;;  %v1093_v42 = vadd.f32 %v1092_v15, %v1091_v61  ;;  %6469 = vmatpush3.bf16.msra.mxu1 %v9446_v28  ;;  %6443 = vmatprep.subr.bf16.mxu0 %v9447_v12  ;;  %v9448_v22 = vld [vmem:[#allocation69_spill] sm:$0xff]  ;;  %v9449_v15 = vld [vmem:[#allocation76_spill] sm:$0xff] }
 0x154   :  { %v9444_v33 = vrot.slane %v9443_v2, 4  ;;  %v775_v36 = vadd.f32 %v774_v19, %v8384_v21  ;;  %v786_v53 = vrot.slane %v785_v26, 2  ;;  %v823_v48 = vadd.f32 %v822_v55, %v821_v30  ;;  %6471 = vmatprep.subr.bf16.mxu1 %v9448_v22 }
 0x155   :  { %v834_v24 = vrot.slane %v833_v4, 2  ;;  %v981_v46 = vadd.f32 %v980_v57, %v9441_v47  ;;  %v1045_v50 = vadd.f32 %v1044_v59, %v1043_v17  ;;  %v1104_v1 = vrot.slane %v1103_v13, 2  ;;  %v9450_v17 = vld [vmem:[#allocation72_spill] sm:$0xff] }
 0x156   :  { %v943_v35 = vadd.f32 %v9444_v33, %v9443_v2  ;;  %v727_v61 = vadd.f32 %v726_v32, %v725_v63  ;;  %v872_v51 = vrot.slane %v871_v9, 1  ;;  %v992_v6 = vrot.slane %v991_v43, 2  ;;  %6445 = vmatpush3.bf16.msra.mxu0 %v9449_v15  ;;  %v9451_v63 = vld [vmem:[#allocation79_spill] sm:$0xff] }
 0x157   :  { %v1056_v39 = vrot.slane %v1055_v7, 2  ;;  %v738_v21 = vrot.slane %v737_v38, 2  ;;  %v883_v19 = vadd.f32 %v882_v56, %v881_v41  ;;  %v933_v30 = vadd.f32 %v932_v18, %v931_v44  ;;  %6473 = vmatpush3.bf16.msra.mxu1 %v9450_v17  ;;  %6447 = vmatprep.subr.bf16.mxu0 %v9451_v63  ;;  %v9452_v32 = vld [vmem:[#allocation75_spill] sm:$0xff] }
 0x158   :  { %v1094_v55 = vrot.slane %v1093_v42, 1  ;;  %v776_v2 = vrot.slane %v775_v36, 1  ;;  %v824_v33 = vrot.slane %v823_v48, 1  ;;  %v944_v52 = vrot.slane %v943_v35, 2  ;;  %6475 = vmatprep.subr.bf16.mxu1 %v9452_v32 }
 0x159   :  { %v1105_v3 = vadd.f32 %v1104_v1, %v1103_v13  ;;  %v787_v12 = vadd.f32 %v786_v53, %v785_v26  ;;  %v835_v47 = vadd.f32 %v834_v24, %v833_v4  ;;  %v982_v57 = vrot.slane %v981_v46, 1  ;;  %v9454_v24 = vld [vmem:[#allocation78_spill] sm:$0xff] }
 0x15a   :  { %v1046_v59 = vrot.slane %v1045_v50, 1  ;;  %v728_v22 = vrot.slane %v727_v61, 1  ;;  %v873_v41 = vadd.f32 %v872_v51, %v871_v9  ;;  %v993_v44 = vadd.f32 %v992_v6, %v991_v43  ;;  %6449 = vmatpush3.bf16.msra.mxu0 %v9453_v29  ;;  %v9455_v1 = vld [vmem:[#allocation86_spill] sm:$0xff]  ;;  %v9456_v43 = vld [vmem:[#allocation80_spill] sm:$0xff] }
 0x15b   :  { %v1057_v56 = vadd.f32 %v1056_v39, %v1055_v7  ;;  %v739_v18 = vadd.f32 %v738_v21, %v737_v38  ;;  %v884_v15 = vrot.slane %v883_v19, 1  ;;  %v934_v28 = vrot.slane %v933_v30, 1  ;;  %6477 = vmatpush3.bf16.msra.mxu1 %v9454_v24  ;;  %6451 = vmatprep.subr.bf16.mxu0 %v9455_v1  ;;  %v9458_v21 = vld [vmem:[#allocation88_spill] sm:$0xff]  ;;  %v9495_v29 = vld [vmem:[#allocation26_spill] sm:$0xff] }
 0x15c   :  { %v1095_v25 = vadd.f32 %v1094_v55, %v1093_v42  ;;  %v777_v26 = vadd.f32 %v776_v2, %v775_v36  ;;  %v825_v13 = vadd.f32 %v824_v33, %v823_v48  ;;  %v945_v4 = vadd.f32 %v944_v52, %v943_v35  ;;  %6479 = vmatprep.subr.bf16.mxu1 %v9456_v43  ;;  %v9457_v52 = vld [vmem:[#allocation62_spill] sm:$0xff] }
 0x15d   :  { %v1106_v53 = vrot.slane %v1105_v3, 1  ;;  %v788_v63 = vrot.slane %v787_v12, 1  ;;  %v836_v32 = vrot.slane %v835_v47, 1  ;;  %v983_v17 = vadd.f32 %v982_v57, %v981_v46  ;;  %v9459_v46 = vld [vmem:[#allocation84_spill] sm:$0xff] }
 0x15e   :  { %v1047_v9 = vadd.f32 %v1046_v59, %v1045_v50  ;;  %v729_v7 = vadd.f32 %v728_v22, %v727_v61  ;;  %v904_v38 = vadd.f32 %v873_v41, %v777_v26  ;;  %v994_v51 = vrot.slane %v993_v44, 1  ;;  %6453 = vmatpush3.bf16.msra.mxu0 %v9458_v21  ;;  %v9460_v61 = vld [vmem:[#allocation6_spill] sm:$0xff]  ;;  %v9461_v59 = vld [vmem:[#allocation95_spill] sm:$0xff] }
 0x15f   :  { %v1058_v42 = vrot.slane %v1057_v56, 1  ;;  %v740_v6 = vrot.slane %v739_v18, 1  ;;  %v885_v39 = vadd.f32 %v884_v15, %v883_v19  ;;  %v935_v36 = vadd.f32 %v934_v28, %v933_v30  ;;  %6481 = vmatpush3.bf16.msra.mxu1 %v9459_v46  ;;  %6487 = vmatprep.subr.bf16.mxu0 %v9460_v61  ;;  %v9462_v28 = vld [vmem:[#allocation87_spill] sm:$0xff] }
 0x160   :  { %v1141_v48 = vadd.f32 %v1095_v25, %v983_v17  ;;  %v916_v35 = vmul.f32 %v9457_v52, %v9457_v52  ;;  %v896_v55 = vadd.f32 %v825_v13, %v729_v7  ;;  %v946_v2 = vrot.slane %v945_v4, 1  ;;  %6483 = vmatprep.subr.bf16.mxu1 %v9462_v28  ;;  %v9463_v17 = vld [vmem:[#allocation104_spill] sm:$0xff] }
 0x161   :  { %v1107_v33 = vadd.f32 %v1106_v53, %v1105_v3  ;;  %v789_v50 = vadd.f32 %v788_v63, %v787_v12  ;;  %v837_v57 = vadd.f32 %v836_v32, %v835_v47  ;;  %v1133_v22 = vadd.f32 %v1047_v9, %v935_v36  ;;  %v9464_v47 = vld [vmem:[#allocation92_spill] sm:$0xff]  ;;  %v9466_v9 = vld [vmem:[#allocation91_spill] sm:$0xff] }
 0x162   :  { %v1028_v19 = vmul.f32 %v9461_v59, %v9461_v59  ;;  %v1297_v25 = vsel %vm1292_vm1, %v904_v38, %v896_v55  ;;  %v995_v30 = vadd.f32 %v994_v51, %v993_v44  ;;  %v1059_v15 = vadd.f32 %v1058_v42, %v1057_v56  ;;  %v9465_v32 = vld [vmem:[#allocation8_spill] sm:$0xff]  ;;  %v9467_v56 = vld [vmem:[#allocation102_spill] sm:$0xff]  ;;  %v9468_v38 = vld [vmem:[#allocation89_spill] sm:$0xff] }
 0x163   :  { %v1033_v41 = vmul.f32 %v9463_v17, %v9463_v17  ;;  %1514 = vmatmul.mubr.f32.vlgmr.msra.gmra.mrb[18].mxu0 %v1297_v25  ;;  %v741_v3 = vadd.f32 %v740_v6, %v739_v18  ;;  %v906_v26 = vadd.f32 %v885_v39, %v789_v50  ;;  %v1607_v12 = vsel %vm1292_vm1, %v1141_v48, %v1133_v22  ;;  %v9469_v51 = vld [vmem:[#allocation10_spill] sm:$0xff]  ;;  %v9470_v42 = vld [vmem:[#allocation49_spill] sm:$0xff]  ;;  %v9471_v36 = vld [vmem:[#allocation7_spill] sm:$0xff] }
 0x164   :  { %v1020_v63 = vmul.f32 %v9464_v47, %v9464_v47  ;;  %6489 = vmatpush3.bf16.msra.mxu0 %v9465_v32  ;;  %1686 = vmatprep.mubr.f32.mxu0 %v1607_v12  ;;  %v947_v13 = vadd.f32 %v946_v2, %v945_v4  ;;  %v1143_v53 = vadd.f32 %v1107_v33, %v995_v30  ;;  %v1084_v39 = vrot.slane %v1028_v19, 4  ;;  %v9472_v4 = vld [vmem:[#allocation81_spill] sm:$0xff]  ;;  %v9473_v2 = vld [vmem:[#allocation96_spill] sm:$0xff] }
 0x165   :  { %v921_v44 = vmul.f32 %v9466_v9, %v9466_v9  ;;  %v1025_v7 = vmul.f32 %v9467_v56, %v9467_v56  ;;  %6485 = vmatpush3.bf16.msra.mxu1 %v9468_v38  ;;  %v898_v18 = vadd.f32 %v837_v57, %v741_v3  ;;  %6491 = vmatprep.subr.bf16.mxu0 %v9469_v51  ;;  %v1114_v50 = vrot.slane %v1033_v41, 4  ;;  %v9474_v25 = vld [vmem:[#allocation105_spill] sm:$0xff]  ;;  %v9475_v12 = vld [vmem:[#allocation12_spill] sm:$0xff]  ;;  %v9477_v51 = vld [vmem:[#allocation94_spill] sm:$0xff] }
 0x166   :  { %v908_v6 = vmul.f32 %v9470_v42, %v9470_v42  ;;  %6519 = vmatprep.subr.bf16.mxu1 %v9471_v36  ;;  %v1135_v48 = vadd.f32 %v1059_v15, %v947_v13  ;;  %v913_v55 = vmul.f32 %v9472_v4, %v9472_v4  ;;  %v1030_v33 = vmul.f32 %v9473_v2, %v9473_v2  ;;  %v9476_v15 = vld [vmem:[#allocation70_spill] sm:$0xff]  ;;  %v9478_v56 = vld [vmem:[#allocation9_spill] sm:$0xff]  ;;  %v9480_v9 = vld [vmem:[#allocation103_spill] sm:$0xff] }
 0x167   :  { %v1299_v61 = vsel %vm1292_vm1, %v906_v26, %v898_v18  ;;  %v972_v22 = vrot.slane %v916_v35, 4  ;;  %v1036_v57 = vrot.slane %v1020_v63, 4  ;;  %v1035_v30 = vmul.f32 %v9474_v25, %v9474_v25  ;;  %v9479_v18 = vld [vmem:[#allocation93_spill] sm:$0xff]  ;;  %v9483_v4 = vld [vmem:[#allocation56_spill] sm:$0xff] }
 0x168   :  { %1584 = vmatmul.mubr.f32.vlgmr.msra.gmra.mrb[18].mxu1 %v1299_v61  ;;  %v1609_v3 = vsel %vm1292_vm1, %v1143_v53, %v1135_v48  ;;  %6493 = vmatpush3.bf16.msra.mxu0 %v9475_v12  ;;  %v918_v32 = vmul.f32 %v9476_v15, %v9476_v15  ;;  %v1002_v13 = vrot.slane %v921_v44, 4  ;;  %v1022_v36 = vmul.f32 %v9477_v51, %v9477_v51  ;;  %v9481_v48 = vld [vmem:[#allocation11_spill] sm:$0xff]  ;;  %v9482_v12 = vld [vmem:[#allocation14_spill] sm:$0xff]  ;;  %v9486_v38 = vld [vmem:[#allocation13_spill] sm:$0xff] }
 0x169   :  { %v1066_v17 = vrot.slane %v1025_v7, 4  ;;  %6521 = vmatpush3.bf16.msra.mxu1 %v9478_v56  ;;  %1756 = vmatprep.mubr.f32.mxu1 %v1609_v3  ;;  %v924_v26 = vrot.slane %v908_v6, 4  ;;  %v923_v25 = vmul.f32 %v9479_v18, %v9479_v18  ;;  %v1085_v61 = vadd.f32 %v1084_v39, %v1028_v19  ;;  %v9484_v3 = vld [vmem:[#allocation82_spill] sm:$0xff]  ;;  %v9485_v19 = vld [vmem:[#allocation16_spill] sm:$0xff] }
 0x16a   :  { %v1027_v53 = vmul.f32 %v9480_v9, %v9480_v9  ;;  %6523 = vmatprep.subr.bf16.mxu1 %v9481_v48  ;;  %6495 = vmatprep.subr.bf16.mxu0 %v9482_v12  ;;  %v910_v2 = vmul.f32 %v9483_v4, %v9483_v4  ;;  %v954_v51 = vrot.slane %v913_v55, 4  ;;  %v1096_v15 = vrot.slane %v1030_v33, 4  ;;  %v9487_v12 = vld [vmem:[#allocation18_spill] sm:$0xff] }
 0x16b   :  { %v1115_v59 = vadd.f32 %v1114_v50, %v1033_v41  ;;  %v973_v56 = vadd.f32 %v972_v22, %v916_v35  ;;  %v915_v47 = vmul.f32 %v9484_v3, %v9484_v3  ;;  %v1037_v52 = vadd.f32 %v1036_v57, %v1020_v63  ;;  %v9488_v35 = vld [vmem:[#allocation15_spill] sm:$0xff] }
 0x16c   :  { %v1126_v18 = vrot.slane %v1035_v30, 4  ;;  %6497 = vmatpush3.bf16.msra.mxu0 %v9485_v19  ;;  %v984_v39 = vrot.slane %v918_v32, 4  ;;  %v1003_v9 = vadd.f32 %v1002_v13, %v921_v44  ;;  %v1048_v42 = vrot.slane %v1022_v36, 4  ;;  %v9489_v13 = vld [vmem:[#allocation20_spill] sm:$0xff] }
 0x16d   :  { %v1067_v48 = vadd.f32 %v1066_v17, %v1025_v7  ;;  %6525 = vmatpush3.bf16.msra.mxu1 %v9486_v38  ;;  %6499 = vmatprep.subr.bf16.mxu0 %v9487_v12  ;;  %v925_v4 = vadd.f32 %v924_v26, %v908_v6  ;;  %v1014_v28 = vrot.slane %v923_v25, 4  ;;  %v1086_v46 = vrot.slane %v1085_v61, 2  ;;  %v9490_v38 = vld [vmem:[#allocation17_spill] sm:$0xff]  ;;  %v9491_v6 = vld [vmem:[#allocation22_spill] sm:$0xff] }
 0x16e   :  { %v1078_v41 = vrot.slane %v1027_v53, 4  ;;  %6527 = vmatprep.subr.bf16.mxu1 %v9488_v35  ;;  %v936_v50 = vrot.slane %v910_v2, 4  ;;  %v955_v22 = vadd.f32 %v954_v51, %v913_v55  ;;  %v1097_v63 = vadd.f32 %v1096_v15, %v1030_v33  ;;  %v9492_v55 = vld [vmem:[#allocation19_spill] sm:$0xff] }
 0x16f   :  { %v1116_v57 = vrot.slane %v1115_v59, 2  ;;  %v974_v3 = vrot.slane %v973_v56, 2  ;;  %v966_v19 = vrot.slane %v915_v47, 4  ;;  %v1038_v21 = vrot.slane %v1037_v52, 2 }
 0x170   :  { %v1127_v44 = vadd.f32 %v1126_v18, %v1035_v30  ;;  %6501 = vmatpush3.bf16.msra.mxu0 %v9489_v13  ;;  %v985_v17 = vadd.f32 %v984_v39, %v918_v32  ;;  %v1049_v7 = vadd.f32 %v1048_v42, %v1022_v36  ;;  %v1004_v26 = vrot.slane %v1003_v9, 2  ;;  %v9493_v13 = vld [vmem:[#allocation24_spill] sm:$0xff] }
 0x171   :  { %6529 = vmatpush3.bf16.msra.mxu1 %v9490_v38  ;;  %6503 = vmatprep.subr.bf16.mxu0 %v9491_v6  ;;  %v1068_v12 = vrot.slane %v1067_v48, 2  ;;  %v926_v43 = vrot.slane %v925_v4, 2  ;;  %v1015_v35 = vadd.f32 %v1014_v28, %v923_v25  ;;  %v1079_v1 = vadd.f32 %v1078_v41, %v1027_v53  ;;  %v9494_v6 = vld [vmem:[#allocation21_spill] sm:$0xff]  ;;  %v9496_v53 = vld [vmem:[#allocation23_spill] sm:$0xff] }
 0x172   :  { %6531 = vmatprep.subr.bf16.mxu1 %v9492_v55  ;;  %v1087_v33 = vadd.f32 %v1086_v46, %v1085_v61  ;;  %v937_v15 = vadd.f32 %v936_v50, %v910_v2  ;;  %v1098_v51 = vrot.slane %v1097_v63, 2  ;;  %v956_v24 = vrot.slane %v955_v22, 2  ;;  %v9498_v55 = vld [vmem:[#allocation25_spill] sm:$0xff] }
 0x173   :  { %v1117_v30 = vadd.f32 %v1116_v57, %v1115_v59  ;;  %v967_v18 = vadd.f32 %v966_v19, %v915_v47  ;;  %v975_v42 = vadd.f32 %v974_v3, %v973_v56  ;;  %v1039_v32 = vadd.f32 %v1038_v21, %v1037_v52  ;;  %v9497_v52 = vld [vmem:[#allocation28_spill] sm:$0xff] }
 0x174   :  { %6505 = vmatpush3.bf16.msra.mxu0 %v9493_v13  ;;  %v1128_v36 = vrot.slane %v1127_v44, 2  ;;  %v986_v39 = vrot.slane %v985_v17, 2  ;;  %v1050_v38 = vrot.slane %v1049_v7, 2  ;;  %v1005_v28 = vadd.f32 %v1004_v26, %v1003_v9  ;;  %v9500_v26 = vld [vmem:[#allocation27_spill] sm:$0xff] }
 0x175   :  { %6533 = vmatpush3.bf16.msra.mxu1 %v9494_v6  ;;  %6507 = vmatprep.subr.bf16.mxu0 %v9495_v29  ;;  %v1069_v25 = vadd.f32 %v1068_v12, %v1067_v48  ;;  %v927_v46 = vadd.f32 %v926_v43, %v925_v4  ;;  %v1088_v2 = vrot.slane %v1087_v33, 1  ;;  %v1016_v61 = vrot.slane %v1015_v35, 2  ;;  %v9499_v29 = vld [vmem:[#allocation30_spill] sm:$0xff] }
 0x176   :  { %6535 = vmatprep.subr.bf16.mxu1 %v9496_v53  ;;  %v1080_v59 = vrot.slane %v1079_v1, 2  ;;  %v938_v47 = vrot.slane %v937_v15, 2  ;;  %v1099_v41 = vadd.f32 %v1098_v51, %v1097_v63  ;;  %v957_v50 = vadd.f32 %v956_v24, %v955_v22 }
 0x177   :  { %v1118_v56 = vrot.slane %v1117_v30, 1  ;;  %v976_v21 = vrot.slane %v975_v42, 1  ;;  %v1040_v3 = vrot.slane %v1039_v32, 1  ;;  %v968_v57 = vrot.slane %v967_v18, 2 }
 0x178   :  { %6509 = vmatpush3.bf16.msra.mxu0 %v9497_v52  ;;  %v1129_v19 = vadd.f32 %v1128_v36, %v1127_v44  ;;  %v987_v9 = vadd.f32 %v986_v39, %v985_v17  ;;  %v1051_v48 = vadd.f32 %v1050_v38, %v1049_v7  ;;  %v1006_v43 = vrot.slane %v1005_v28, 1  ;;  %v9501_v52 = vld [vmem:[#allocation32_spill] sm:$0xff]  ;;  %v9502_v17 = vld [vmem:[#allocation29_spill] sm:$0xff]  ;;  %v9503_v7 = vld [vmem:[#allocation34_spill] sm:$0xff] }
 0x179   :  { %6537 = vmatpush3.bf16.msra.mxu1 %v9498_v55  ;;  %6511 = vmatprep.subr.bf16.mxu0 %v9499_v29  ;;  %v1070_v4 = vrot.slane %v1069_v25, 1  ;;  %v928_v12 = vrot.slane %v927_v46, 1  ;;  %v1089_v63 = vadd.f32 %v1088_v2, %v1087_v33  ;;  %v1017_v24 = vadd.f32 %v1016_v61, %v1015_v35  ;;  %v9504_v35 = vld [vmem:[#allocation31_spill] sm:$0xff] }
 0x17a   :  { %6539 = vmatprep.subr.bf16.mxu1 %v9500_v26  ;;  %v1081_v22 = vadd.f32 %v1080_v59, %v1079_v1  ;;  %v939_v51 = vadd.f32 %v938_v47, %v937_v15  ;;  %v1100_v13 = vrot.slane %v1099_v41, 1  ;;  %v958_v6 = vrot.slane %v957_v50, 1 }
 0x17b   :  { %v1119_v53 = vadd.f32 %v1118_v56, %v1117_v30  ;;  %v977_v44 = vadd.f32 %v976_v21, %v975_v42  ;;  %v1041_v36 = vadd.f32 %v1040_v3, %v1039_v32  ;;  %v969_v55 = vadd.f32 %v968_v57, %v967_v18  ;;  %v9505_v18 = vld [vmem:[#allocation36_spill] sm:$0xff]  ;;  %v9506_v3 = vld [vmem:[#allocation33_spill] sm:$0xff] }
 0x17c   :  { %6513 = vmatpush3.bf16.msra.mxu0 %v9501_v52  ;;  %v1130_v29 = vrot.slane %v1129_v19, 1  ;;  %v988_v39 = vrot.slane %v987_v9, 1  ;;  %v1052_v38 = vrot.slane %v1051_v48, 1  ;;  %v1007_v26 = vadd.f32 %v1006_v43, %v1005_v28 }
 0x17d   :  { %6541 = vmatpush3.bf16.msra.mxu1 %v9502_v17  ;;  %6515 = vmatprep.subr.bf16.mxu0 %v9503_v7  ;;  %v1071_v33 = vadd.f32 %v1070_v4, %v1069_v25  ;;  %v929_v1 = vadd.f32 %v928_v12, %v927_v46  ;;  %v1140_v15 = vadd.f32 %v1089_v63, %v977_v44  ;;  %v1018_v2 = vrot.slane %v1017_v24, 1  ;;  %v9507_v25 = vld [vmem:[#allocation38_spill] sm:$0xff]  ;;  %v9508_v4 = vld [vmem:[#allocation35_spill] sm:$0xff]  ;;  %v9509_v63 = vld [vmem:[#allocation97_spill] sm:$0xff] }
 0x17e   :  { %6543 = vmatprep.subr.bf16.mxu1 %v9504_v35  ;;  %v1082_v30 = vrot.slane %v1081_v22, 1  ;;  %v940_v61 = vrot.slane %v939_v51, 1  ;;  %v1101_v59 = vadd.f32 %v1100_v13, %v1099_v41  ;;  %v959_v42 = vadd.f32 %v958_v6, %v957_v50  ;;  %v9510_v44 = vld [vmem:[#allocation37_spill] sm:$0xff] }
 0x17f   :  { %v1145_v32 = vadd.f32 %v1119_v53, %v1007_v26  ;;  %v1132_v47 = vadd.f32 %v1041_v36, %v929_v1  ;;  %v970_v56 = vrot.slane %v969_v55, 1  ;;  %v1131_v21 = vadd.f32 %v1130_v29, %v1129_v19  ;;  %v9511_v36 = vld [vmem:[#allocation39_spill] sm:$0xff] }
 0x180   :  { %6517 = vmatpush3.bf16.msra.mxu0 %v9505_v18  ;;  %v989_v57 = vadd.f32 %v988_v39, %v987_v9  ;;  %v1053_v28 = vadd.f32 %v1052_v38, %v1051_v48  ;;  %v1137_v43 = vadd.f32 %v1071_v33, %v959_v42  ;;  %v1032_v46 = vmul.f32 %v8415_v8, %v8415_v8 }
 0x181   :  { %6545 = vmatpush3.bf16.msra.mxu1 %v9506_v3  ;;  %6551 = vmatprep.subr.bf16.mxu0 %v9507_v25  ;;  %v1606_v41 = vsel %vm1292_vm1, %v1140_v15, %v1132_v47  ;;  %v1019_v50 = vadd.f32 %v1018_v2, %v1017_v24  ;;  %v1083_v12 = vadd.f32 %v1082_v30, %v1081_v22  ;;  %v9514_v25 = vld [vmem:[#allocation67_spill] sm:$0xff] }
 0x182   :  { %6547 = vmatprep.subr.bf16.mxu1 %v9508_v4  ;;  %v920_v13 = vmul.f32 %v9509_v63, %v9509_v63  ;;  %v941_v19 = vadd.f32 %v940_v61, %v939_v51  ;;  %v1142_v6 = vadd.f32 %v1101_v59, %v989_v57  ;;  %v1611_v9 = vsel %vm1292_vm1, %v1145_v32, %v1137_v43  ;;  %v9516_v43 = vld [vmem:[#allocation69_spill] sm:$0xff] }
 0x183   :  { %1687 = vmatmul.mubr.f32.vlgmr.msra.gmra.mrb[20].mxu0 %v1606_v41  ;;  %v1024_v48 = vmul.f32 %v8411_v16, %v8411_v16  ;;  %v971_v53 = vadd.f32 %v970_v56, %v969_v55  ;;  %v1147_v52 = vadd.f32 %v1131_v21, %v1019_v50  ;;  %v912_v22 = vmul.f32 %v8254_v23, %v8254_v23  ;;  %v9513_v21 = vld [vmem:[#allocation71_spill] sm:$0xff]  ;;  %v9517_v41 = vld [vmem:[#allocation76_spill] sm:$0xff] }
 0x184   :  { %6553 = vmatpush3.bf16.msra.mxu0 %v9424_v60  ;;  %1826 = vmatprep.mubr.f32.mxu0 %v1611_v9  ;;  %v1134_v24 = vadd.f32 %v1053_v28, %v941_v19  ;;  %v1108_v51 = vrot.slane %v1032_v46, 4  ;;  %v1034_v17 = vmul.f32 %v8419_v58, %v8419_v58  ;;  %v996_v7 = vrot.slane %v920_v13, 4  ;;  %v9519_v19 = vld [vmem:[#allocation79_spill] sm:$0xff] }
 0x185   :  { %6549 = vmatpush3.bf16.msra.mxu1 %v9510_v44  ;;  %6555 = vmatprep.subr.bf16.mxu0 %v8013_v14  ;;  %v1139_v29 = vadd.f32 %v1083_v12, %v971_v53  ;;  %v1060_v55 = vrot.slane %v1024_v48, 4  ;;  %v922_v14 = vmul.f32 %v8316_v40, %v8316_v40  ;;  %v1026_v38 = vmul.f32 %v8474_v62, %v8474_v62 }
 0x186   :  { %6583 = vmatprep.subr.bf16.mxu1 %v9511_v36  ;;  %v1608_v60 = vsel %vm1292_vm1, %v1142_v6, %v1134_v24  ;;  %v948_v26 = vrot.slane %v912_v22, 4  ;;  %v1109_v33 = vadd.f32 %v1108_v51, %v1032_v46  ;;  %v914_v35 = vmul.f32 %v8273_v20, %v8273_v20 }
 0x187   :  { %v1613_v39 = vsel %vm1292_vm1, %v1147_v52, %v1139_v29  ;;  %v1120_v1 = vrot.slane %v1034_v17, 4  ;;  %v1061_v15 = vadd.f32 %v1060_v55, %v1024_v48  ;;  %v1008_v2 = vrot.slane %v922_v14, 4  ;;  %v9520_v48 = vld [vmem:[#allocation75_spill] sm:$0xff]  ;;  %v9522_v29 = vld [vmem:[#allocation78_spill] sm:$0xff]  ;;  %v9524_v55 = vld [vmem:[#allocation80_spill] sm:$0xff] }
 0x188   :  { %1757 = vmatmul.mubr.f32.vlgmr.msra.gmra.mrb[20].mxu1 %v1608_v60  ;;  %6557 = vmatpush3.bf16.msra.mxu0 %v9428_v34  ;;  %v997_v34 = vadd.f32 %v996_v7, %v920_v13  ;;  %v1072_v30 = vrot.slane %v1026_v38, 4  ;;  %v1110_v61 = vrot.slane %v1109_v33, 2  ;;  %v9518_v13 = vld [vmem:[#allocation72_spill] sm:$0xff] }
 0x189   :  { %6585 = vmatpush3.bf16.msra.mxu1 %v9429_v31  ;;  %1896 = vmatprep.mubr.f32.mxu1 %v1613_v39  ;;  %v949_v31 = vadd.f32 %v948_v26, %v912_v22  ;;  %v1062_v42 = vrot.slane %v1061_v15, 2  ;;  %v1009_v32 = vadd.f32 %v1008_v2, %v922_v14  ;;  %v9521_v22 = vld [vmem:[#allocation83_spill] sm:$0xff] }
 0x18a   :  { %6587 = vmatprep.subr.bf16.mxu1 %v9430_v54  ;;  %6559 = vmatprep.subr.bf16.mxu0 %v8061_v5  ;;  %v960_v54 = vrot.slane %v914_v35, 4  ;;  %v1121_v5 = vadd.f32 %v1120_v1, %v1034_v17  ;;  %v998_v59 = vrot.slane %v997_v34, 2  ;;  %v1073_v18 = vadd.f32 %v1072_v30, %v1026_v38  ;;  %v9523_v17 = vld [vmem:[#allocation86_spill] sm:$0xff]  ;;  %v9526_v1 = vld [vmem:[#allocation84_spill] sm:$0xff]  ;;  %v9527_v2 = vld [vmem:[#allocation87_spill] sm:$0xff] }
 0x18b   :  { %v1063_v3 = vadd.f32 %v1062_v42, %v1061_v15  ;;  %v1010_v57 = vrot.slane %v1009_v32, 2  ;;  %v1909_v42 = vld [vmem:[%s9182_s6 + $0x8] sm:$0xff] }
 0x18c   :  { %6561 = vmatpush3.bf16.msra.mxu0 %v9432_v0  ;;  %v950_v0 = vrot.slane %v949_v31, 2  ;;  %v961_v47 = vadd.f32 %v960_v54, %v914_v35  ;;  %v1122_v56 = vrot.slane %v1121_v5, 2  ;;  %v1074_v28 = vrot.slane %v1073_v18, 2  ;;  %v9528_v54 = vld [vmem:[#allocation89_spill] sm:$0xff] }
 0x18d   :  { %6589 = vmatpush3.bf16.msra.mxu1 %v9433_v10  ;;  %6563 = vmatprep.subr.bf16.mxu0 %v9434_v37  ;;  %v9512_v10 = vld [vmem:[#allocation65_spill] sm:$0xff]  ;;  %v1111_v37 = vadd.f32 %v1110_v61, %v1109_v33  ;;  %v1064_v12 = vrot.slane %v1063_v3, 1  ;;  %v1011_v6 = vadd.f32 %v1010_v57, %v1009_v32  ;;  %v9525_v33 = vld [vmem:[#allocation88_spill] sm:$0xff]  ;;  %v1917_v32 = vld [vmem:[%s9182_s6 + $0x48] sm:$0xff] }
 0x18e   :  { %6591 = vmatprep.subr.bf16.mxu1 %v9436_v45  ;;  %v999_v45 = vadd.f32 %v998_v59, %v997_v34  ;;  %v962_v46 = vrot.slane %v961_v47, 2  ;;  %v1123_v4 = vadd.f32 %v1122_v56, %v1121_v5  ;;  %v1075_v9 = vadd.f32 %v1074_v28, %v1073_v18  ;;  %v1911_v18 = vld [vmem:[%s9182_s6 + $0x18] sm:$0xff]  ;;  %v1918_v57 = vld [vmem:[%s9182_s6 + $0x50] sm:$0xff]  ;;  %v1913_v28 = vld [vmem:[%s9182_s6 + $0x28] sm:$0xff] }
 0x18f   :  { %v1065_v36 = vadd.f32 %v1064_v12, %v1063_v3  ;;  %v1012_v60 = vrot.slane %v1011_v6, 1  ;;  %v7198_v56 = vmov 0.0   ;;  %v1910_v3 = vld [vmem:[%s9182_s6 + $0x10] sm:$0xff] }
 0x190   :  { %6565 = vmatpush3.bf16.msra.mxu0 %v9438_v27  ;;  %v9515_v27 = vld [vmem:[#allocation73_spill] sm:$0xff]  ;;  %v1000_v50 = vrot.slane %v999_v45, 1  ;;  %v963_v44 = vadd.f32 %v962_v46, %v961_v47  ;;  %v1124_v24 = vrot.slane %v1123_v4, 1  ;;  %v1076_v7 = vrot.slane %v1075_v9, 1 }
 0x191   :  { %6593 = vmatpush3.bf16.msra.mxu1 %v9439_v11  ;;  %6567 = vmatprep.subr.bf16.mxu0 %v9440_v49  ;;  %v951_v11 = vadd.f32 %v950_v0, %v949_v31  ;;  %v1112_v49 = vrot.slane %v1111_v37, 1  ;;  %v1013_v34 = vadd.f32 %v1012_v60, %v1011_v6  ;;  %v6614_v0 = vpack.c.bf16 %v1917_v32, %v1909_v42  ;;  %v1916_v47 = vld [vmem:[%s9182_s6 + $0x40] sm:$0xff] }
 0x192   :  { %6595 = vmatprep.subr.bf16.mxu1 %v9512_v10  ;;  %v1001_v51 = vadd.f32 %v1000_v50, %v999_v45  ;;  %v964_v38 = vrot.slane %v963_v44, 1  ;;  %v1125_v26 = vadd.f32 %v1124_v24, %v1123_v4  ;;  %v1077_v15 = vadd.f32 %v1076_v7, %v1075_v9  ;;  %v1919_v10 = vld [vmem:[%s9182_s6 + $0x58] sm:$0xff] }
 0x193   :  { %v952_v53 = vrot.slane %v951_v11, 1  ;;  %v1113_v52 = vadd.f32 %v1112_v49, %v1111_v37  ;;  %v1908_v37 = vld [vmem:[%s9182_s6] sm:$0xff] }
 0x194   :  { %6569 = vmatpush3.bf16.msra.mxu0 %v9513_v21  ;;  %v965_v31 = vadd.f32 %v964_v38, %v963_v44  ;;  %v1146_v61 = vadd.f32 %v1125_v26, %v1013_v34  ;;  %v6618_v21 = vpack.c.bf16 %v1919_v10, %v1911_v18  ;;  %v6616_v45 = vpack.c.bf16 %v1916_v47, %v1908_v37  ;;  %v6684_v47 = vld [vmem:[#allocation3] ss:$16 sps:$4 sm:$0xff]  }
 0x195   :  { %6597 = vmatpush3.bf16.msra.mxu1 %v9514_v25  ;;  %6571 = vmatprep.subr.bf16.mxu0 %v9515_v27  ;;  %v953_v39 = vadd.f32 %v952_v53, %v951_v11  ;;  %v1144_v14 = vadd.f32 %v1113_v52, %v1001_v51  ;;  %v6620_v25 = vpack.c.bf16 %v1918_v57, %v1910_v3  ;;  %v1921_v27 = vld [vmem:[%s9182_s6 + $0x68] sm:$0xff]  ;;  %v1923_v11 = vld [vmem:[%s9182_s6 + $0x78] sm:$0xff] }
 0x196   :  { %6599 = vmatprep.subr.bf16.mxu1 %v9516_v43  ;;  %v1138_v5 = vadd.f32 %v1077_v15, %v965_v31  ;;  %v1915_v43 = vld [vmem:[%s9182_s6 + $0x38] sm:$0xff]  ;;  %v6622_v49 = vpack.c.bf16 %v1921_v27, %v1913_v28  ;;  %v6693_v27 = vld [vmem:[#allocation3 + $0x220] ss:$16 sps:$4 sm:$0xff]  }
 0x197   :  { %v1136_v35 = vadd.f32 %v1065_v36, %v953_v39  ;;  %v6626_v46 = vpack.c.bf16 %v1923_v11, %v1915_v43  ;;  %v1920_v36 = vld [vmem:[%s9182_s6 + $0x60] sm:$0xff] }
 0x198   :  { %6573 = vmatpush3.bf16.msra.mxu0 %v9517_v41  ;;  %v1612_v59 = vsel %vm1292_vm1, %v1146_v61, %v1138_v5  ;;  %v6689_v3 = vld [vmem:[#allocation3 + $0x204] ss:$16 sps:$4 sm:$0xff]   ;;  %v6696_v11 = vld [vmem:[#allocation3 + $0x40] ss:$16 sps:$4 sm:$0xff]  }
 0x199   :  { %6601 = vmatpush3.bf16.msra.mxu1 %v9518_v13  ;;  %6575 = vmatprep.subr.bf16.mxu0 %v9519_v19  ;;  %v1610_v30 = vsel %vm1292_vm1, %v1144_v14, %v1136_v35  ;;  %v6692_v57 = vld [vmem:[#allocation3 + $0x24] ss:$16 sps:$4 sm:$0xff]  }
 0x19a   :  { %6603 = vmatprep.subr.bf16.mxu1 %v9520_v48  ;;  %v6695_v28 = vld [vmem:[#allocation3 + $0x224] ss:$16 sps:$4 sm:$0xff]  }
 0x19b   :  { %v6698_v43 = vld [vmem:[#allocation3 + $0x44] ss:$16 sps:$4 sm:$0xff]  }
 0x19c   :  { %6577 = vmatpush3.bf16.msra.mxu0 %v9521_v22  ;;  %v1912_v22 = vld [vmem:[%s9182_s6 + $0x20] sm:$0xff] }
 0x19d   :  { %6605 = vmatpush3.bf16.msra.mxu1 %v9522_v29  ;;  %6579 = vmatprep.subr.bf16.mxu0 %v9523_v17  ;;  %v1914_v29 = vld [vmem:[%s9182_s6 + $0x30] sm:$0xff]  ;;  %v6624_v7 = vpack.c.bf16 %v1920_v36, %v1912_v22 }
 0x19e   :  { %6607 = vmatprep.subr.bf16.mxu1 %v9524_v55  ;;  %v1922_v17 = vld [vmem:[%s9182_s6 + $0x70] sm:$0xff] }
 0x19f   :  { %v6628_v55 = vpack.c.bf16 %v1922_v17, %v1914_v29  ;;  %v6720_v22 = vld [vmem:[#allocation3 + $0xc0] ss:$16 sps:$4 sm:$0xff]   ;;  %v6728_v36 = vld [vmem:[#allocation3 + $0xe4] ss:$16 sps:$4 sm:$0xff]  }
 0x1a0   :  { %6581 = vmatpush3.bf16.msra.mxu0 %v9525_v33  ;;  %v6731_v29 = vld [vmem:[#allocation3 + $0x2e4] ss:$16 sps:$4 sm:$0xff]   ;;  %v6726_v17 = vld [vmem:[#allocation3 + $0xe0] ss:$16 sps:$4 sm:$0xff]  }
 0x1a1   :  { %6609 = vmatpush3.bf16.msra.mxu1 %v9526_v1  ;;  %6615 = vmatprep.subr.bf16.mxu0 %v6614_v0 }
 0x1a2   :  { %6611 = vmatprep.subr.bf16.mxu1 %v9527_v2 }
 0x1a3   :  { %1827 = vmatmul.mubr.f32.vlgmr.msra.gmra.mrb[22].mxu0 %v1610_v30 }
 0x1a4   :  { %1992 = vmatprep.mubr.f32.mxu0 %v7198_v56  ;;  %6617 = vmatpush1.bf16.msra.mxu0 %v6616_v45 }
 0x1a5   :  { %6613 = vmatpush3.bf16.msra.mxu1 %v9528_v54  ;;  %6623 = vmatprep.subr.bf16.mxu0 %v6622_v49 }
 0x1a6   :  { %6619 = vmatprep.subr.bf16.mxu1 %v6618_v21 }
 0x1a8   :  { %1897 = vmatmul.mubr.f32.vlgmr.msra.gmra.mrb[22].mxu1 %v1612_v59 }
 0x1a9   :  { %2063 = vmatprep.mubr.f32.mxu1 %v7198_v56  ;;  %6621 = vmatpush1.bf16.msra.mxu1 %v6620_v25 }
 0x1aa   :  { %6627 = vmatprep.subr.bf16.mxu1 %v6626_v46 }
 0x214   :  { %v6110_v4 = vpop.f32.mrb[16].mxu0 }
 0x215   :  { %v6111_v41 = vpop.f32.mrb[17].mxu0 }
 0x216   :  { %v6112_v50 = vadd.f32 %v6111_v41, %v6110_v4  ;;  %v6707_v4 = vld [vmem:[#allocation3 + $0x264] ss:$16 sps:$4 sm:$0xff]   ;;  %v6702_v41 = vld [vmem:[#allocation3 + $0x60] ss:$16 sps:$4 sm:$0xff]  }
 0x219   :  { %v6145_v12 = vpop.f32.mrb[16].mxu1 }
 0x21a   :  { %v6146_v13 = vpop.f32.mrb[17].mxu1 }
 0x21b   :  { %v6147_v19 = vadd.f32 %v6146_v13, %v6145_v12  ;;  %v6708_v12 = vld [vmem:[#allocation3 + $0x80] ss:$16 sps:$4 sm:$0xff]   ;;  %v6710_v13 = vld [vmem:[#allocation3 + $0x84] ss:$16 sps:$4 sm:$0xff]  }
 0x21d   :  { %v1446_v6 = vadd.f32 %v6147_v19, %v6112_v50  ;;  %v6705_v50 = vld [vmem:[#allocation3 + $0x260] ss:$16 sps:$4 sm:$0xff]  }
 0x21e   :  { %v6711_v19 = vld [vmem:[#allocation3 + $0x280] ss:$16 sps:$4 sm:$0xff]  }
 0x236   :  { %v6180_v9 = vpop.f32.mrb[18].mxu0 }
 0x237   :  { %v6181_v48 = vpop.f32.mrb[19].mxu0 }
 0x238   :  { %v6182_v53 = vadd.f32 %v6181_v48, %v6180_v9  ;;  %v6714_v9 = vld [vmem:[#allocation3 + $0xa0] ss:$16 sps:$4 sm:$0xff]   ;;  %v6716_v48 = vld [vmem:[#allocation3 + $0xa4] ss:$16 sps:$4 sm:$0xff]  }
 0x23a   :  { %v1516_v52 = vadd.f32 %v6182_v53, %v1446_v6  ;;  %v6713_v6 = vld [vmem:[#allocation3 + $0x284] ss:$16 sps:$4 sm:$0xff]   ;;  %v6717_v53 = vld [vmem:[#allocation3 + $0x2a0] ss:$16 sps:$4 sm:$0xff]  }
 0x23b   :  { %v6215_v44 = vpop.f32.mrb[18].mxu1 }
 0x23c   :  { %v6216_v24 = vpop.f32.mrb[19].mxu1 }
 0x23d   :  { %v6217_v51 = vadd.f32 %v6216_v24, %v6215_v44  ;;  %v6722_v44 = vld [vmem:[#allocation3 + $0xc4] ss:$16 sps:$4 sm:$0xff]  }
 0x23e   :  { %v6725_v24 = vld [vmem:[#allocation3 + $0x2c4] ss:$16 sps:$4 sm:$0xff]  }
 0x23f   :  { %v1586_v60 = vadd.f32 %v6217_v51, %v1516_v52  ;;  %v6719_v52 = vld [vmem:[#allocation3 + $0x2a4] ss:$16 sps:$4 sm:$0xff]   ;;  %v6723_v51 = vld [vmem:[#allocation3 + $0x2c0] ss:$16 sps:$4 sm:$0xff]  }
 0x241   :  { %v1589_v39 = vmul.f32 0.0009765625, %v1586_v60  ;;  %v6729_v60 = vld [vmem:[#allocation3 + $0x2e0] ss:$16 sps:$4 sm:$0xff]  }
 0x243   :  { %5749 = vmatmul.mubr.msk.f32.vlgmr.msra.gmra.mrb[24].mxu0 %vm1924_vm2, %v1589_v39  ;;  %5750 = vmatmul.mubr.msk.f32.vlgmr.msra.gmra.mrb[24].mxu1 %vm1924_vm2, %v1589_v39  ;;  %v1903_v32 = vmul.f32 %v1589_v39, %v1589_v39 }
 0x244   :  { %6625 = vmatpush1.bf16.msra.mxu0 %v6624_v7  ;;  %6629 = vmatpush1.bf16.msra.mxu1 %v6628_v55 }
 0x245   :  { %2134 = vmatprep.mubr.f32.mxu0 %v7198_v56  ;;  %2205 = vmatprep.mubr.f32.mxu1 %v7198_v56 }
 0x246   :  { %6631 = vmatprep.subr.bf16.mxu0 %v6614_v0  ;;  %6635 = vmatprep.subr.bf16.mxu1 %v6618_v21  ;;  %v6686_v21 = vld [vmem:[#allocation3 + $0x4] ss:$16 sps:$4 sm:$0xff]  }
 0x247   :  { %5751 = vmatmul.mubr.msk.f32.vlgmr.msra.gmra.mrb[26].mxu0 %vm1924_vm2, %v1589_v39  ;;  %5752 = vmatmul.mubr.msk.f32.vlgmr.msra.gmra.mrb[26].mxu1 %vm1924_vm2, %v1589_v39  ;;  %v6732_v39 = vld [vmem:[#allocation3 + $0x100] ss:$16 sps:$4 sm:$0xff]  }
 0x248   :  { %6633 = vmatpush1.bf16.msra.mxu0 %v6616_v45  ;;  %6637 = vmatpush1.bf16.msra.mxu1 %v6620_v25  ;;  %v6687_v45 = vld [vmem:[#allocation3 + $0x200] ss:$16 sps:$4 sm:$0xff]  }
 0x249   :  { %2279 = vmatprep.mubr.f32.mxu0 %v7198_v56  ;;  %2350 = vmatprep.mubr.f32.mxu1 %v7198_v56  ;;  %v6690_v25 = vld [vmem:[#allocation3 + $0x20] ss:$16 sps:$4 sm:$0xff]  }
 0x24a   :  { %6639 = vmatprep.subr.bf16.mxu0 %v6622_v49  ;;  %6643 = vmatprep.subr.bf16.mxu1 %v6626_v46  ;;  %v6699_v49 = vld [vmem:[#allocation3 + $0x240] ss:$16 sps:$4 sm:$0xff]   ;;  %v6704_v46 = vld [vmem:[#allocation3 + $0x64] ss:$16 sps:$4 sm:$0xff]  }
 0x256   :  { %v6250_v14 = vpop.f32.mrb[20].mxu0 }
 0x257   :  { %v6251_v38 = vpop.f32.mrb[21].mxu0 }
 0x258   :  { %v6252_v26 = vadd.f32 %v6251_v38, %v6250_v14  ;;  %v6735_v14 = vld [vmem:[#allocation3 + $0x300] ss:$16 sps:$4 sm:$0xff]   ;;  %v6740_v38 = vld [vmem:[#allocation3 + $0x124] ss:$16 sps:$4 sm:$0xff]  }
 0x25b   :  { %v6285_v33 = vpop.f32.mrb[20].mxu1 }
 0x25c   :  { %v6286_v35 = vpop.f32.mrb[21].mxu1 }
 0x25d   :  { %v6287_v1 = vadd.f32 %v6286_v35, %v6285_v33  ;;  %v6738_v33 = vld [vmem:[#allocation3 + $0x120] ss:$16 sps:$4 sm:$0xff]  }
 0x25e   :  { %v6741_v35 = vld [vmem:[#allocation3 + $0x320] ss:$16 sps:$4 sm:$0xff]  }
 0x25f   :  { %v1759_v34 = vadd.f32 %v6287_v1, %v6252_v26  ;;  %v6743_v26 = vld [vmem:[#allocation3 + $0x324] ss:$16 sps:$4 sm:$0xff]  }
 0x260   :  { %v6746_v1 = vld [vmem:[#allocation3 + $0x144] ss:$16 sps:$4 sm:$0xff]  }
 0x276   :  { %v6320_v15 = vpop.f32.mrb[22].mxu0 }
 0x277   :  { %v6321_v2 = vpop.f32.mrb[23].mxu0 }
 0x278   :  { %v6322_v30 = vadd.f32 %v6321_v2, %v6320_v15  ;;  %v6744_v15 = vld [vmem:[#allocation3 + $0x140] ss:$16 sps:$4 sm:$0xff]  }
 0x279   :  { %v6747_v2 = vld [vmem:[#allocation3 + $0x340] ss:$16 sps:$4 sm:$0xff]  }
 0x27a   :  { %v1829_v31 = vadd.f32 %v6322_v30, %v1759_v34  ;;  %v6749_v34 = vld [vmem:[#allocation3 + $0x344] ss:$16 sps:$4 sm:$0xff]  }
 0x27b   :  { %v6355_v61 = vpop.f32.mrb[22].mxu1  ;;  %v6752_v30 = vld [vmem:[#allocation3 + $0x164] ss:$16 sps:$4 sm:$0xff]  }
 0x27c   :  { %v6356_v54 = vpop.f32.mrb[23].mxu1 }
 0x27d   :  { %v6357_v5 = vadd.f32 %v6356_v54, %v6355_v61  ;;  %v6750_v61 = vld [vmem:[#allocation3 + $0x160] ss:$16 sps:$4 sm:$0xff]  }
 0x27f   :  { %v1899_v59 = vadd.f32 %v6357_v5, %v1829_v31  ;;  %v6755_v31 = vld [vmem:[#allocation3 + $0x364] ss:$16 sps:$4 sm:$0xff]  }
 0x281   :  { %v1902_v42 = vmul.f32 0.0009765625, %v1899_v59  ;;  %v6753_v59 = vld [vmem:[#allocation3 + $0x360] ss:$16 sps:$4 sm:$0xff]  }
 0x283   :  { %v1904_v18 = vsub.f32 %v1902_v42, %v1903_v32  ;;  %v6758_v42 = vld [vmem:[#allocation3 + $0x184] ss:$16 sps:$4 sm:$0xff]  }
 0x285   :  { %v1905_v0 = vmax.f32 %v1904_v18, 0.0 }
 0x287   :  { %v1906_v10 = vadd.f32 1e-05, %v1905_v0  ;;  %v6761_v0 = vld [vmem:[#allocation3 + $0x384] ss:$16 sps:$4 sm:$0xff]  }
 0x289   :  { %7164 = vrsqrt.f32 %v1906_v10  ;;  %v6756_v10 = vld [vmem:[#allocation3 + $0x180] ss:$16 sps:$4 sm:$0xff]  }
 0x293   :  { %v7165_v37 = vpop.eup %7164 }
 0x294   :  { %5753 = vmatmul.mubr.msk.f32.vlgmr.msra.gmra.mrb[28].mxu0 %vm1924_vm2, %v7165_v37  ;;  %5754 = vmatmul.mubr.msk.f32.vlgmr.msra.gmra.mrb[28].mxu1 %vm1924_vm2, %v7165_v37 }
 0x295   :  { %6641 = vmatpush1.bf16.msra.mxu0 %v6624_v7  ;;  %6645 = vmatpush1.bf16.msra.mxu1 %v6628_v55  ;;  %v6734_v7 = vld [vmem:[#allocation3 + $0x104] ss:$16 sps:$4 sm:$0xff]  }
 0x296   :  { %2421 = vmatprep.mubr.f32.mxu0 %v7198_v56  ;;  %2492 = vmatprep.mubr.f32.mxu1 %v7198_v56  ;;  %v6701_v56 = vld [vmem:[#allocation3 + $0x244] ss:$16 sps:$4 sm:$0xff]  }
 0x297   :  { %4849 = vmatprep.subr.bf16.mxu1 %v6686_v21  ;;  %4890 = vmatprep.subr.bf16.mxu0 %v6689_v3  ;;  %v6737_v55 = vld [vmem:[#allocation3 + $0x304] ss:$16 sps:$4 sm:$0xff]   ;;  %v6759_v21 = vld [vmem:[#allocation3 + $0x380] ss:$16 sps:$4 sm:$0xff]  }
 0x298   :  { %5755 = vmatmul.mubr.msk.f32.vlgmr.msra.gmra.mrb[30].mxu0 %vm1924_vm2, %v7165_v37  ;;  %5756 = vmatmul.mubr.msk.f32.vlgmr.msra.gmra.mrb[30].mxu1 %vm1924_vm2, %v7165_v37 }
 0x299   :  { %4850 = vmatpush1.bf16.msra.mxu1 %v6684_v47  ;;  %4891 = vmatpush1.bf16.msra.mxu0 %v6687_v45  ;;  %v6764_v45 = vld [vmem:[#allocation3 + $0x1a4] ss:$16 sps:$4 sm:$0xff]  }
 0x29a   :  { %4851 = vmatprep.subr.bf16.mxu1 %v6692_v57  ;;  %4892 = vmatprep.subr.bf16.mxu0 %v6695_v28  ;;  %v6767_v28 = vld [vmem:[#allocation3 + $0x3a4] ss:$16 sps:$4 sm:$0xff]  }
 0x29d   :  { %4852 = vmatpush1.bf16.msra.mxu1 %v6690_v25  ;;  %4893 = vmatpush1.bf16.msra.mxu0 %v6693_v27  ;;  %v6762_v25 = vld [vmem:[#allocation3 + $0x1a0] ss:$16 sps:$4 sm:$0xff]  }
 0x29e   :  { %4853 = vmatprep.subr.bf16.mxu1 %v6698_v43  ;;  %4894 = vmatprep.subr.bf16.mxu0 %v6701_v56  ;;  %v6765_v27 = vld [vmem:[#allocation3 + $0x3a0] ss:$16 sps:$4 sm:$0xff]   ;;  %v6770_v43 = vld [vmem:[#allocation3 + $0x1c4] ss:$16 sps:$4 sm:$0xff]  }
 0x29f   :  { %v6773_v56 = vld [vmem:[#allocation3 + $0x3c4] ss:$16 sps:$4 sm:$0xff]  }
 0x2a1   :  { %4854 = vmatpush1.bf16.msra.mxu1 %v6696_v11  ;;  %4895 = vmatpush1.bf16.msra.mxu0 %v6699_v49  ;;  %v6768_v11 = vld [vmem:[#allocation3 + $0x1c0] ss:$16 sps:$4 sm:$0xff]  }
 0x2a2   :  { %4855 = vmatprep.subr.bf16.mxu1 %v6704_v46  ;;  %4896 = vmatprep.subr.bf16.mxu0 %v6707_v4  ;;  %v6771_v49 = vld [vmem:[#allocation3 + $0x3c0] ss:$16 sps:$4 sm:$0xff]   ;;  %v6776_v46 = vld [vmem:[#allocation3 + $0x1e4] ss:$16 sps:$4 sm:$0xff]  }
 0x2a3   :  { %v6779_v4 = vld [vmem:[#allocation3 + $0x3e4] ss:$16 sps:$4 sm:$0xff]  }
 0x2a5   :  { %4856 = vmatpush1.bf16.msra.mxu1 %v6702_v41  ;;  %4897 = vmatpush1.bf16.msra.mxu0 %v6705_v50  ;;  %v6774_v41 = vld [vmem:[#allocation3 + $0x1e0] ss:$16 sps:$4 sm:$0xff]  }
 0x2a6   :  { %4857 = vmatprep.subr.bf16.mxu1 %v6710_v13  ;;  %4898 = vmatprep.subr.bf16.mxu0 %v6713_v6  ;;  %v6777_v50 = vld [vmem:[#allocation3 + $0x3e0] ss:$16 sps:$4 sm:$0xff]   ;;  %v6782_v13 = vld [vmem:[#allocation3 + $0x404] ss:$16 sps:$4 sm:$0xff]  }
 0x2a9   :  { %4858 = vmatpush1.bf16.msra.mxu1 %v6708_v12  ;;  %4899 = vmatpush1.bf16.msra.mxu0 %v6711_v19  ;;  %v6785_v12 = vld [vmem:[#allocation3 + $0xc] ss:$16 sps:$4 sm:$0xff]   ;;  %v7199_v19 = vmov 1966171168  }
 0x2aa   :  { %4859 = vmatprep.subr.bf16.mxu1 %v6716_v48  ;;  %4900 = vmatprep.subr.bf16.mxu0 %v6719_v52  ;;  %v2620_v6 = vunpack.c.l.s4 %v7199_v19  ;;  %v8744_v48 = vld [vmem:[%s9184_s8] sm:$0xff] }
 0x2ab   :  { %v9529_v52 = vld [vmem:[#allocation41_spill] sm:$0xff] }
 0x2ad   :  { %4860 = vmatpush1.bf16.msra.mxu1 %v6714_v9  ;;  %4901 = vmatpush1.bf16.msra.mxu0 %v6717_v53  ;;  %v2499_v9 = vld [vmem:[%s9183_s7] sm:$0xff]  ;;  %v2621_v53 = vunpack.c.0.s8 %v2620_v6 }
 0x2ae   :  { %4861 = vmatprep.subr.bf16.mxu1 %v6722_v44  ;;  %4902 = vmatprep.subr.bf16.mxu0 %v6725_v24  ;;  %v2504_v44 = vrot.slane %v2499_v9, %v9529_v52  ;;  %v9530_v24 = vld [vmem:[#allocation42_spill] sm:$0xff] }
 0x2b1   :  { %4862 = vmatpush1.bf16.msra.mxu1 %v6720_v22  ;;  %4903 = vmatpush1.bf16.msra.mxu0 %v6723_v51  ;;  %v2512_v22 = vrot.slane %v2499_v9, %v9530_v24  ;;  %v9531_v51 = vld [vmem:[#allocation43_spill] sm:$0xff] }
 0x2b2   :  { %4863 = vmatprep.subr.bf16.mxu1 %v6728_v36  ;;  %4904 = vmatprep.subr.bf16.mxu0 %v6731_v29  ;;  %v2508_v36 = vrot.slane %v2499_v9, %v9531_v51  ;;  %v9532_v29 = vld [vmem:[#allocation44_spill] sm:$0xff] }
 0x2b5   :  { %4864 = vmatpush1.bf16.msra.mxu1 %v6726_v17  ;;  %4905 = vmatpush1.bf16.msra.mxu0 %v6729_v60  ;;  %v2516_v17 = vrot.slane %v2499_v9, %v9532_v29  ;;  %v2562_v60 = vrot.slane %v8744_v48, %v9529_v52 }
 0x2b6   :  { %4865 = vmatprep.subr.bf16.mxu1 %v6734_v7  ;;  %4906 = vmatprep.subr.bf16.mxu0 %v6737_v55  ;;  %v2570_v7 = vrot.slane %v8744_v48, %v9530_v24 }
 0x2b9   :  { %4866 = vmatpush1.bf16.msra.mxu1 %v6732_v39  ;;  %4907 = vmatpush1.bf16.msra.mxu0 %v6735_v14  ;;  %v2566_v14 = vrot.slane %v8744_v48, %v9531_v51 }
 0x2ba   :  { %4867 = vmatprep.subr.bf16.mxu1 %v6740_v38  ;;  %4908 = vmatprep.subr.bf16.mxu0 %v6743_v26  ;;  %v9533_v38 = vld [vmem:[#allocation40_spill] sm:$0xff] }
 0x2bb   :  { %v8757_v26 = vsub.s32 %v2621_v53, %v9533_v38 }
 0x2bd   :  { %4868 = vmatpush1.bf16.msra.mxu1 %v6738_v33  ;;  %4909 = vmatpush1.bf16.msra.mxu0 %v6741_v35  ;;  %v2574_v33 = vrot.slane %v8744_v48, %v9532_v29  ;;  %v9534_v35 = vld [vmem:[#allocation45_spill] sm:$0xff] }
 0x2be   :  { %4869 = vmatprep.subr.bf16.mxu1 %v6746_v1  ;;  %4910 = vmatprep.subr.bf16.mxu0 %v6749_v34  ;;  %v2520_v1 = vrot.slane %v2499_v9, %v9534_v35 }
 0x2c1   :  { %4870 = vmatpush1.bf16.msra.mxu1 %v6744_v15  ;;  %4911 = vmatpush1.bf16.msra.mxu0 %v6747_v2 }
 0x2c2   :  { %4871 = vmatprep.subr.bf16.mxu1 %v6752_v30  ;;  %4912 = vmatprep.subr.bf16.mxu0 %v6755_v31  ;;  %v2578_v31 = vrot.slane %v8744_v48, %v9534_v35 }
 0x2c5   :  { %4872 = vmatpush1.bf16.msra.mxu1 %v6750_v61  ;;  %4913 = vmatpush1.bf16.msra.mxu0 %v6753_v59  ;;  %v9535_v61 = vld [vmem:[#allocation46_spill] sm:$0xff] }
 0x2c6   :  { %4873 = vmatprep.subr.bf16.mxu1 %v6758_v42  ;;  %4914 = vmatprep.subr.bf16.mxu0 %v6761_v0  ;;  %v2528_v59 = vrot.slane %v2499_v9, %v9535_v61 }
 0x2c9   :  { %4874 = vmatpush1.bf16.msra.mxu1 %v6756_v10  ;;  %4915 = vmatpush1.bf16.msra.mxu0 %v6759_v21  ;;  %v2586_v10 = vrot.slane %v8744_v48, %v9535_v61  ;;  %v9536_v21 = vld [vmem:[#allocation47_spill] sm:$0xff] }
 0x2ca   :  { %4875 = vmatprep.subr.bf16.mxu1 %v6764_v45  ;;  %4916 = vmatprep.subr.bf16.mxu0 %v6767_v28  ;;  %v2524_v45 = vrot.slane %v2499_v9, %v9536_v21 }
 0x2cd   :  { %4876 = vmatpush1.bf16.msra.mxu1 %v6762_v25  ;;  %4917 = vmatpush1.bf16.msra.mxu0 %v6765_v27  ;;  %v2582_v27 = vrot.slane %v8744_v48, %v9536_v21 }
 0x2ce   :  { %4877 = vmatprep.subr.bf16.mxu1 %v6770_v43  ;;  %4918 = vmatprep.subr.bf16.mxu0 %v6773_v56  ;;  %v9537_v43 = vld [vmem:[#allocation48_spill] sm:$0xff] }
 0x2cf   :  { %v2532_v56 = vrot.slane %v2499_v9, %v9537_v43 }
 0x2d1   :  { %4878 = vmatpush1.bf16.msra.mxu1 %v6768_v11  ;;  %4919 = vmatpush1.bf16.msra.mxu0 %v6771_v49 }
 0x2d2   :  { %4879 = vmatprep.subr.bf16.mxu1 %v6776_v46  ;;  %4920 = vmatprep.subr.bf16.mxu0 %v6779_v4 }
 0x2d5   :  { %4880 = vmatpush1.bf16.msra.mxu1 %v6774_v41  ;;  %4921 = vmatpush1.bf16.msra.mxu0 %v6777_v50 }
 0x2d6   :  { %5013 = vmatprep.subr.bf16.mxu1 %v6785_v12  ;;  %4931 = vmatprep.subr.bf16.mxu0 %v6782_v13 }
 0x316   :  { %v8722_v54 = vpop.f32.mrb[24].mxu0  ;;  %v8724_v5 = vpop.f32.mrb[24].mxu1 }
 0x317   :  { %v8726_v32 = vpop.f32.mrb[25].mxu0  ;;  %v8728_v18 = vpop.f32.mrb[25].mxu1 }
 0x31a   :  { %v8730_v37 = vpop.f32.mrb[26].mxu0  ;;  %v8732_v47 = vpop.f32.mrb[26].mxu1 }
 0x31b   :  { %v8734_v3 = vpop.f32.mrb[27].mxu0  ;;  %v8736_v57 = vpop.f32.mrb[27].mxu1 }
 0x367   :  { %v2281_v55 = vpop.f32.mrb[28].mxu0  ;;  %v2352_v39 = vpop.f32.mrb[28].mxu1 }
 0x368   :  { %v2541_v34 = vmul.f32 %v2504_v44, %v2281_v55  ;;  %v2543_v15 = vmul.f32 %v2512_v22, %v2352_v39  ;;  %v2283_v2 = vpop.f32.mrb[29].mxu0  ;;  %v2354_v30 = vpop.f32.mrb[29].mxu1 }
 0x369   :  { %v2542_v42 = vmul.f32 %v2508_v36, %v2283_v2  ;;  %v2544_v0 = vmul.f32 %v2516_v17, %v2354_v30 }
 0x36a   :  { %v2550_v28 = vmul.f32 %v2541_v34, %v8722_v54  ;;  %v2552_v25 = vmul.f32 %v2543_v15, %v8724_v5 }
 0x36b   :  { %v2551_v11 = vmul.f32 %v2542_v42, %v8726_v32  ;;  %v2615_v49 = vcombine.low %v2541_v34, %v2542_v42  ;;  %v2553_v46 = vmul.f32 %v2544_v0, %v8728_v18  ;;  %v2616_v4 = vcombine.low %v2543_v15, %v2544_v0  ;;  %v2423_v41 = vpop.f32.mrb[30].mxu0  ;;  %v2494_v50 = vpop.f32.mrb[30].mxu1 }
 0x36c   :  { %v2599_v12 = vsub.f32 %v2562_v60, %v2550_v28  ;;  %v2601_v13 = vsub.f32 %v2570_v7, %v2552_v25  ;;  %v2545_v19 = vmul.f32 %v2520_v1, %v2423_v41  ;;  %v2547_v6 = vmul.f32 %v2528_v59, %v2494_v50  ;;  %v2425_v54 = vpop.f32.mrb[31].mxu0  ;;  %v2496_v53 = vpop.f32.mrb[31].mxu1 }
 0x36d   :  { %v2600_v5 = vsub.f32 %v2566_v14, %v2551_v11  ;;  %v2625_v44 = vrot.slane %v2615_v49, %v8757_v26  ;;  %v2602_v22 = vsub.f32 %v2574_v33, %v2553_v46  ;;  %v2632_v9 = vrot.slane %v2616_v4, %v8757_v26 }
 0x36e   :  { %v2554_v32 = vmul.f32 %v2545_v19, %v8730_v37  ;;  %v2556_v36 = vmul.f32 %v2547_v6, %v8732_v47  ;;  %v2546_v18 = vmul.f32 %v2524_v45, %v2425_v54  ;;  %v2548_v17 = vmul.f32 %v2532_v56, %v2496_v53 }
 0x36f   :  { %v2689_v55 = vcombine.low %v2599_v12, %v2600_v5  ;;  %v2647_v39 = vcombine.low %v2625_v44, %v2632_v9  ;;  %v2648_v60 = vcombine.high %v2625_v44, %v2632_v9  ;;  %v2690_v7 = vcombine.low %v2601_v13, %v2602_v22 }
 0x370   :  { %v2603_v38 = vsub.f32 %v2578_v31, %v2554_v32  ;;  %v2555_v1 = vmul.f32 %v2546_v18, %v8734_v3  ;;  %v2617_v34 = vcombine.low %v2545_v19, %v2546_v18  ;;  %v2590_v14 = vrot.slane %v8744_v48, %v9537_v43 }
 0x371   :  { %v2699_v33 = vrot.slane %v2689_v55, %v8757_v26  ;;  %v2706_v15 = vrot.slane %v2690_v7, %v8757_v26  ;;  %v2605_v37 = vsub.f32 %v2586_v10, %v2556_v36  ;;  %v2557_v30 = vmul.f32 %v2548_v17, %v8736_v57  ;;  %v9538_v36 = vld [vmem:[#allocation57_spill] sm:$0xff]  ;;  %v9541_v7 = vld [vmem:[#allocation100_spill] sm:$0xff] }
 0x372   :  { %v2604_v2 = vsub.f32 %v2582_v27, %v2555_v1  ;;  %v2639_v47 = vrot.slane %v2617_v34, %v8757_v26  ;;  %v2618_v59 = vcombine.low %v2547_v6, %v2548_v17  ;;  %v2657_v11 = vrot.slane %v2647_v39, %v8757_v26  ;;  %v9539_v17 = vld [vmem:[#allocation74_spill] sm:$0xff] }
 0x373   :  { %v2721_v42 = vcombine.low %v2699_v33, %v2706_v15  ;;  %v2722_v0 = vcombine.high %v2699_v33, %v2706_v15  ;;  %v2606_v45 = vsub.f32 %v2590_v14, %v2557_v30  ;;  %v2664_v10 = vrot.slane %v2648_v60, %v8757_v26  ;;  %v9540_v39 = vld [vmem:[#allocation98_spill] sm:$0xff]  ;;  %v9543_v14 = vld [vmem:[#allocation77_spill] sm:$0xff]  ;;  %v9544_v30 = vld [vmem:[#allocation99_spill] sm:$0xff] }
 0x374   :  { %v2691_v31 = vcombine.low %v2603_v38, %v2604_v2  ;;  %v2646_v3 = vrot.slane %v2618_v59, %v8757_v26  ;;  %v9542_v1 = vld [vmem:[#allocation58_spill] sm:$0xff] }
 0x375   :  { %v2692_v56 = vcombine.low %v2605_v37, %v2606_v45  ;;  %v2731_v12 = vrot.slane %v2721_v42, %v8757_v26  ;;  %v2738_v13 = vrot.slane %v2722_v0, %v8757_v26  ;;  %v9545_v42 = vld [vmem:[#allocation101_spill] sm:$0xff] }
 0x376   :  { %v2713_v28 = vrot.slane %v2691_v31, %v8757_v26  ;;  %v2649_v48 = vcombine.low %v2639_v47, %v2646_v3  ;;  %v2650_v25 = vcombine.high %v2639_v47, %v2646_v3  ;;  %v9546_v31 = vld [vmem:[#allocation49_spill] sm:$0xff]  ;;  %v9547_v3 = vld [vmem:[#allocation62_spill] sm:$0xff] }
 0x377   :  { %v2720_v49 = vrot.slane %v2692_v56, %v8757_v26 }
 0x378   :  { %v2671_v27 = vrot.slane %v2649_v48, %v8757_v26  ;;  %v2678_v57 = vrot.slane %v2650_v25, %v8757_v26 }
 0x379   :  { %v2723_v41 = vcombine.low %v2713_v28, %v2720_v49  ;;  %v2724_v50 = vcombine.high %v2713_v28, %v2720_v49 }
 0x37a   :  { %v8793_v46 = vcombine.low %v2657_v11, %v2671_v27  ;;  %v8795_v4 = vcombine.low %v2664_v10, %v2678_v57 }
 0x37b   :  { %v2745_v19 = vrot.slane %v2723_v41, %v8757_v26  ;;  %v2752_v6 = vrot.slane %v2724_v50, %v8757_v26 }
 0x37c   :  { %v2762_v54 = vrot.slane %v8793_v46, %v9531_v51  ;;  %v2794_v53 = vrot.slane %v8795_v4, %v9531_v51  ;;  %v2770_v5 = vrot.slane %v8793_v46, %v9532_v29  ;;  %v2802_v44 = vrot.slane %v8795_v4, %v9532_v29 }
 0x37d   :  { %v8811_v22 = vrot.slane %v8793_v46, %v9529_v52  ;;  %v8815_v9 = vrot.slane %v8795_v4, %v9529_v52  ;;  %v8817_v26 = vcombine.low %v2731_v12, %v2745_v19  ;;  %v8819_v32 = vcombine.low %v2738_v13, %v2752_v6 }
 0x37e   :  { %v2836_v18 = vmul.f32 %v2762_v54, %v9538_v36  ;;  %v2844_v55 = vmul.f32 %v2794_v53, %v9539_v17  ;;  %v3060_v60 = vmul.f32 %v2762_v54, %v9540_v39  ;;  %v3068_v38 = vmul.f32 %v2794_v53, %v9541_v7 }
 0x37f   :  { %v2838_v34 = vmul.f32 %v2770_v5, %v9542_v1  ;;  %v2846_v33 = vmul.f32 %v2802_v44, %v9543_v14  ;;  %v2858_v15 = vrot.slane %v8817_v26, %v9531_v51  ;;  %v2890_v37 = vrot.slane %v8819_v32, %v9531_v51 }
 0x380   :  { %v2866_v2 = vrot.slane %v8817_v26, %v9532_v29  ;;  %v2898_v47 = vrot.slane %v8819_v32, %v9532_v29  ;;  %v3062_v59 = vmul.f32 %v2770_v5, %v9544_v30  ;;  %v3070_v0 = vmul.f32 %v2802_v44, %v9545_v42 }
 0x381   :  { %v8839_v45 = vmul.f32 %v8811_v22, %v9546_v31  ;;  %v8843_v28 = vmul.f32 %v8815_v9, %v9547_v3  ;;  %v2932_v48 = vadd.f32 %v2858_v15, %v2836_v18  ;;  %v2940_v25 = vadd.f32 %v2890_v37, %v2844_v55 }
 0x382   :  { %v3076_v56 = vadd.f32 %v3060_v60, %v2858_v15  ;;  %v3084_v11 = vadd.f32 %v3068_v38, %v2890_v37  ;;  %v2934_v10 = vadd.f32 %v2866_v2, %v2838_v34  ;;  %v2942_v27 = vadd.f32 %v2898_v47, %v2846_v33 }
 0x383   :  { %v3078_v57 = vadd.f32 %v3062_v59, %v2866_v2  ;;  %v3086_v49 = vadd.f32 %v3070_v0, %v2898_v47  ;;  %v2948_v41 = vmax.f32 %v2932_v48, 0.0  ;;  %v2956_v50 = vmax.f32 %v2940_v25, 0.0 }
 0x384   :  { %v3092_v12 = vmax.f32 %v3076_v56, 0.0  ;;  %v3100_v13 = vmax.f32 %v3084_v11, 0.0  ;;  %v2950_v19 = vmax.f32 %v2934_v10, 0.0  ;;  %v2958_v6 = vmax.f32 %v2942_v27, 0.0 }
 0x385   :  { %v3094_v54 = vmax.f32 %v3078_v57, 0.0  ;;  %v3102_v53 = vmax.f32 %v3086_v49, 0.0  ;;  %v2969_v5 = vrot.slane %v2948_v41, 4  ;;  %v3017_v44 = vrot.slane %v2956_v50, 4 }
 0x386   :  { %v3113_v36 = vrot.slane %v3092_v12, 4  ;;  %v3161_v17 = vrot.slane %v3100_v13, 4  ;;  %v2981_v18 = vrot.slane %v2950_v19, 4  ;;  %v3029_v55 = vrot.slane %v2958_v6, 4 }
 0x387   :  { %v3125_v39 = vrot.slane %v3094_v54, 4  ;;  %v3173_v60 = vrot.slane %v3102_v53, 4  ;;  %v2970_v7 = vmax.f32 %v2948_v41, %v2969_v5  ;;  %v3018_v38 = vmax.f32 %v2956_v50, %v3017_v44 }
 0x388   :  { %v3114_v1 = vmax.f32 %v3092_v12, %v3113_v36  ;;  %v3162_v34 = vmax.f32 %v3100_v13, %v3161_v17  ;;  %v2982_v14 = vmax.f32 %v2950_v19, %v2981_v18  ;;  %v3030_v33 = vmax.f32 %v2958_v6, %v3029_v55 }
 0x389   :  { %v3126_v15 = vmax.f32 %v3094_v54, %v3125_v39  ;;  %v3174_v37 = vmax.f32 %v3102_v53, %v3173_v60  ;;  %v2971_v2 = vrot.slane %v2970_v7, 2  ;;  %v3019_v47 = vrot.slane %v3018_v38, 2 }
 0x38a   :  { %v3115_v30 = vrot.slane %v3114_v1, 2  ;;  %v3163_v59 = vrot.slane %v3162_v34, 2  ;;  %v2983_v42 = vrot.slane %v2982_v14, 2  ;;  %v3031_v0 = vrot.slane %v3030_v33, 2 }
 0x38b   :  { %v3127_v31 = vrot.slane %v3126_v15, 2  ;;  %v3175_v3 = vrot.slane %v3174_v37, 2  ;;  %v2972_v48 = vmax.f32 %v2970_v7, %v2971_v2  ;;  %v3020_v25 = vmax.f32 %v3018_v38, %v3019_v47  ;;  %v9549_v2 = vld [vmem:[#allocation95_spill] sm:$0xff] }
 0x38c   :  { %v3116_v56 = vmax.f32 %v3114_v1, %v3115_v30  ;;  %v3164_v11 = vmax.f32 %v3162_v34, %v3163_v59  ;;  %v2984_v10 = vmax.f32 %v2982_v14, %v2983_v42  ;;  %v3032_v27 = vmax.f32 %v3030_v33, %v3031_v0 }
 0x38d   :  { %v3128_v57 = vmax.f32 %v3126_v15, %v3127_v31  ;;  %v3176_v49 = vmax.f32 %v3174_v37, %v3175_v3  ;;  %v2973_v41 = vrot.slane %v2972_v48, 1  ;;  %v3021_v50 = vrot.slane %v3020_v25, 1  ;;  %v9548_v15 = vld [vmem:[#allocation92_spill] sm:$0xff] }
 0x38e   :  { %v3117_v12 = vrot.slane %v3116_v56, 1  ;;  %v3165_v13 = vrot.slane %v3164_v11, 1  ;;  %v2985_v19 = vrot.slane %v2984_v10, 1  ;;  %v3033_v6 = vrot.slane %v3032_v27, 1 }
 0x38f   :  { %v3129_v54 = vrot.slane %v3128_v57, 1  ;;  %v3177_v53 = vrot.slane %v3176_v49, 1  ;;  %v2974_v5 = vmax.f32 %v2972_v48, %v2973_v41  ;;  %v3022_v44 = vmax.f32 %v3020_v25, %v3021_v50 }
 0x390   :  { %v3118_v36 = vmax.f32 %v3116_v56, %v3117_v12  ;;  %v3166_v17 = vmax.f32 %v3164_v11, %v3165_v13  ;;  %v2986_v18 = vmax.f32 %v2984_v10, %v2985_v19  ;;  %v3034_v55 = vmax.f32 %v3032_v27, %v3033_v6 }
 0x391   :  { %v3130_v39 = vmax.f32 %v3128_v57, %v3129_v54  ;;  %v3178_v60 = vmax.f32 %v3176_v49, %v3177_v53  ;;  %v2854_v1 = vrot.slane %v8817_v26, %v9529_v52  ;;  %v2886_v34 = vrot.slane %v8819_v32, %v9529_v52 }
 0x392   :  { %v3204_v7 = vmax.f32 %v2974_v5, %v3118_v36  ;;  %v3212_v38 = vmax.f32 %v3022_v44, %v3166_v17  ;;  %v3059_v37 = vmul.f32 %v8811_v22, %v9548_v15  ;;  %v3067_v47 = vmul.f32 %v8815_v9, %v9549_v2 }
 0x393   :  { %v3206_v14 = vmax.f32 %v2986_v18, %v3130_v39  ;;  %v3214_v33 = vmax.f32 %v3034_v55, %v3178_v60  ;;  %v2931_v42 = vadd.f32 %v2854_v1, %v8839_v45  ;;  %v2939_v0 = vadd.f32 %v2886_v34, %v8843_v28  ;;  %v9550_v18 = vld [vmem:[#allocation56_spill] sm:$0xff] }
 0x394   :  { %v3220_v30 = vpack.c.bf16 %v3204_v7, %v3204_v7  ;;  %v3228_v59 = vpack.c.bf16 %v3212_v38, %v3212_v38  ;;  %v3075_v48 = vadd.f32 %v3059_v37, %v2854_v1  ;;  %v3083_v25 = vadd.f32 %v3067_v47, %v2886_v34  ;;  %v9551_v38 = vld [vmem:[#allocation70_spill] sm:$0xff] }
 0x395   :  { %v3222_v31 = vpack.c.bf16 %v3206_v14, %v3206_v14  ;;  %v3230_v3 = vpack.c.bf16 %v3214_v33, %v3214_v33  ;;  %v2947_v10 = vmax.f32 %v2931_v42, 0.0  ;;  %v2955_v27 = vmax.f32 %v2939_v0, 0.0  ;;  %v9552_v37 = vld [vmem:[#allocation94_spill] sm:$0xff]  ;;  %v9553_v42 = vld [vmem:[#allocation96_spill] sm:$0xff] }
 0x396   :  { %v3530_v56 = vunpack.c.l.b16 %v3220_v30  ;;  %v3538_v11 = vunpack.c.l.b16 %v3228_v59  ;;  %v3091_v22 = vmax.f32 %v3075_v48, 0.0  ;;  %v3099_v41 = vmax.f32 %v3083_v25, 0.0 }
 0x397   :  { %v3532_v57 = vunpack.c.l.b16 %v3222_v31  ;;  %v3540_v49 = vunpack.c.l.b16 %v3230_v3  ;;  %v2963_v50 = vrot.slane %v2947_v10, 4  ;;  %v3011_v12 = vrot.slane %v2955_v27, 4 }
 0x398   :  { %v3546_v9 = vsel %vm1292_vm1, %v3538_v11, %v3530_v56  ;;  %v2766_v45 = vrot.slane %v8793_v46, %v9530_v24  ;;  %v3107_v19 = vrot.slane %v3091_v22, 4  ;;  %v3155_v6 = vrot.slane %v3099_v41, 4 }
 0x399   :  { %v8858_v28 = vpack.c.b16 %v3546_v9, %v3546_v9  ;;  %v3548_v13 = vsel %vm1292_vm1, %v3540_v49, %v3532_v57  ;;  %v2964_v53 = vmax.f32 %v2947_v10, %v2963_v50  ;;  %v3012_v5 = vmax.f32 %v2955_v27, %v3011_v12 }
 0x39a   :  { %v8861_v54 = vpack.c.b16 %v3548_v13, %v3548_v13  ;;  %v2798_v44 = vrot.slane %v8795_v4, %v9530_v24  ;;  %v3108_v36 = vmax.f32 %v3091_v22, %v3107_v19  ;;  %v3156_v17 = vmax.f32 %v3099_v41, %v3155_v6 }
 0x39b   :  { %4881 = vmatprep.mubr.bf16.mxu1 %v8858_v28  ;;  %v2837_v55 = vmul.f32 %v2766_v45, %v9550_v18  ;;  %v2862_v39 = vrot.slane %v8817_v26, %v9530_v24  ;;  %v2965_v60 = vrot.slane %v2964_v53, 2  ;;  %v3013_v7 = vrot.slane %v3012_v5, 2 }
 0x39c   :  { %4922 = vmatprep.mubr.bf16.mxu0 %v8861_v54  ;;  %v2845_v1 = vmul.f32 %v2798_v44, %v9551_v38  ;;  %v2894_v34 = vrot.slane %v8819_v32, %v9530_v24  ;;  %v3109_v14 = vrot.slane %v3108_v36, 2  ;;  %v3157_v33 = vrot.slane %v3156_v17, 2 }
 0x39d   :  { %v2933_v15 = vadd.f32 %v2862_v39, %v2837_v55  ;;  %v3061_v2 = vmul.f32 %v2766_v45, %v9552_v37  ;;  %v2966_v47 = vmax.f32 %v2964_v53, %v2965_v60  ;;  %v3014_v30 = vmax.f32 %v3012_v5, %v3013_v7 }
 0x39e   :  { %v2941_v59 = vadd.f32 %v2894_v34, %v2845_v1  ;;  %v3069_v0 = vmul.f32 %v2798_v44, %v9553_v42  ;;  %v3110_v31 = vmax.f32 %v3108_v36, %v3109_v14  ;;  %v3158_v3 = vmax.f32 %v3156_v17, %v3157_v33  ;;  %v9554_v1 = vld [vmem:[#allocation81_spill] sm:$0xff]  ;;  %v9555_v14 = vld [vmem:[#allocation91_spill] sm:$0xff] }
 0x39f   :  { %v2949_v48 = vmax.f32 %v2933_v15, 0.0  ;;  %v3077_v25 = vadd.f32 %v3061_v2, %v2862_v39  ;;  %v2967_v56 = vrot.slane %v2966_v47, 1  ;;  %v3015_v11 = vrot.slane %v3014_v30, 1 }
 0x3a0   :  { %v2957_v10 = vmax.f32 %v2941_v59, 0.0  ;;  %v3085_v27 = vadd.f32 %v3069_v0, %v2894_v34  ;;  %v3111_v57 = vrot.slane %v3110_v31, 1  ;;  %v3159_v49 = vrot.slane %v3158_v3, 1 }
 0x3a1   :  { %v2975_v22 = vrot.slane %v2949_v48, 4  ;;  %v3093_v41 = vmax.f32 %v3077_v25, 0.0  ;;  %v2968_v9 = vmax.f32 %v2966_v47, %v2967_v56  ;;  %v3016_v50 = vmax.f32 %v3014_v30, %v3015_v11 }
 0x3a2   :  { %v3023_v12 = vrot.slane %v2957_v10, 4  ;;  %v3101_v45 = vmax.f32 %v3085_v27, 0.0  ;;  %v3112_v13 = vmax.f32 %v3110_v31, %v3111_v57  ;;  %v3160_v19 = vmax.f32 %v3158_v3, %v3159_v49  ;;  %v6783_v57 = vld [vmem:[#allocation3 + $0x8] ss:$16 sps:$4 sm:$0xff]  }
 0x3a3   :  { %v2976_v6 = vmax.f32 %v2949_v48, %v2975_v22  ;;  %v3119_v53 = vrot.slane %v3093_v41, 4  ;;  %v2778_v36 = vrot.slane %v8793_v46, %v9536_v21  ;;  %v2810_v17 = vrot.slane %v8795_v4, %v9536_v21 }
 0x3a4   :  { %v3024_v5 = vmax.f32 %v2957_v10, %v3023_v12  ;;  %v3167_v44 = vrot.slane %v3101_v45, 4  ;;  %v3203_v18 = vmax.f32 %v2968_v9, %v3112_v13  ;;  %v3211_v55 = vmax.f32 %v3016_v50, %v3160_v19  ;;  %v9556_v9 = vld [vmem:[#allocation102_spill] sm:$0xff]  ;;  %v6791_v19 = vld [vmem:[#allocation3 + $0x2c] ss:$16 sps:$4 sm:$0xff]  }
 0x3a5   :  { %v2977_v39 = vrot.slane %v2976_v6, 2  ;;  %v3120_v60 = vmax.f32 %v3093_v41, %v3119_v53  ;;  %v2840_v34 = vmul.f32 %v2778_v36, %v9554_v1  ;;  %v2848_v33 = vmul.f32 %v2810_v17, %v9555_v14  ;;  %v6789_v1 = vld [vmem:[#allocation3 + $0x28] ss:$16 sps:$4 sm:$0xff]  }
 0x3a6   :  { %v3025_v7 = vrot.slane %v3024_v5, 2  ;;  %v3168_v38 = vmax.f32 %v3101_v45, %v3167_v44  ;;  %v3219_v15 = vpack.c.bf16 %v3203_v18, %v3203_v18  ;;  %v3227_v37 = vpack.c.bf16 %v3211_v55, %v3211_v55 }
 0x3a7   :  { %v2978_v2 = vmax.f32 %v2976_v6, %v2977_v39  ;;  %v3121_v47 = vrot.slane %v3120_v60, 2  ;;  %v2874_v42 = vrot.slane %v8817_v26, %v9536_v21  ;;  %v2906_v0 = vrot.slane %v8819_v32, %v9536_v21 }
 0x3a8   :  { %v3026_v30 = vmax.f32 %v3024_v5, %v3025_v7  ;;  %v3169_v59 = vrot.slane %v3168_v38, 2  ;;  %v3529_v31 = vunpack.c.l.b16 %v3219_v15  ;;  %v3537_v3 = vunpack.c.l.b16 %v3227_v37  ;;  %v9557_v5 = vld [vmem:[#allocation104_spill] sm:$0xff] }
 0x3a9   :  { %v2979_v48 = vrot.slane %v2978_v2, 1  ;;  %v3122_v25 = vmax.f32 %v3120_v60, %v3121_v47  ;;  %v2936_v10 = vadd.f32 %v2874_v42, %v2840_v34  ;;  %v2944_v27 = vadd.f32 %v2906_v0, %v2848_v33  ;;  %v6797_v33 = vld [vmem:[#allocation3 + $0x4c] ss:$16 sps:$4 sm:$0xff]  }
 0x3aa   :  { %v3027_v56 = vrot.slane %v3026_v30, 1  ;;  %v3170_v11 = vmax.f32 %v3168_v38, %v3169_v59  ;;  %v3545_v49 = vsel %vm1292_vm1, %v3537_v3, %v3529_v31  ;;  %v3064_v50 = vmul.f32 %v2778_v36, %v9556_v9 }
 0x3ab   :  { %v2980_v22 = vmax.f32 %v2978_v2, %v2979_v48  ;;  %v3123_v41 = vrot.slane %v3122_v25, 1  ;;  %v8887_v12 = vpack.c.b16 %v3545_v49, %v3545_v49  ;;  %v2952_v21 = vmax.f32 %v2936_v10, 0.0 }
 0x3ac   :  { %v3028_v45 = vmax.f32 %v3026_v30, %v3027_v56  ;;  %v3171_v13 = vrot.slane %v3170_v11, 1  ;;  %v2960_v53 = vmax.f32 %v2944_v27, 0.0  ;;  %v3072_v44 = vmul.f32 %v2810_v17, %v9557_v5  ;;  %v6780_v27 = vld [vmem:[#allocation3 + $0x400] ss:$16 sps:$4 sm:$0xff]  }
 0x3ad   :  { %v3124_v6 = vmax.f32 %v3122_v25, %v3123_v41  ;;  %v3080_v18 = vadd.f32 %v3064_v50, %v2874_v42  ;;  %4882 = vmatmul.mubr.bf16.vlgmr.msra.gmra.mrb[32].mxu1 %v8887_v12  ;;  %v2993_v39 = vrot.slane %v2952_v21, 4  ;;  %v6786_v5 = vld [vmem:[#allocation3 + $0x420] ss:$16 sps:$4 sm:$0xff]  }
 0x3ae   :  { %v3172_v55 = vmax.f32 %v3170_v11, %v3171_v13  ;;  %5014 = vmatpush1.bf16.msra.mxu1 %v6783_v57  ;;  %v3041_v7 = vrot.slane %v2960_v53, 4  ;;  %v3088_v38 = vadd.f32 %v3072_v44, %v2906_v0  ;;  %5045 = vmatprep.mubr.bf16.mxu1 %v8858_v28  ;;  %v6795_v0 = vld [vmem:[#allocation3 + $0x48] ss:$16 sps:$4 sm:$0xff]   ;;  %v6803_v28 = vld [vmem:[#allocation3 + $0x6c] ss:$16 sps:$4 sm:$0xff]  }
 0x3af   :  { %v3205_v60 = vmax.f32 %v2980_v22, %v3124_v6  ;;  %v3096_v36 = vmax.f32 %v3080_v18, 0.0  ;;  %v2994_v14 = vmax.f32 %v2952_v21, %v2993_v39  ;;  %5015 = vmatprep.subr.bf16.mxu1 %v6791_v19  ;;  %v6801_v13 = vld [vmem:[#allocation3 + $0x68] ss:$16 sps:$4 sm:$0xff]   ;;  %v6809_v21 = vld [vmem:[#allocation3 + $0x8c] ss:$16 sps:$4 sm:$0xff]  }
 0x3b0   :  { %v3213_v34 = vmax.f32 %v3028_v45, %v3172_v55  ;;  %v3042_v37 = vmax.f32 %v2960_v53, %v3041_v7  ;;  %v3104_v17 = vmax.f32 %v3088_v38, 0.0  ;;  %v6788_v45 = vld [vmem:[#allocation3 + $0x424] ss:$16 sps:$4 sm:$0xff]   ;;  %v6815_v7 = vld [vmem:[#allocation3 + $0xac] ss:$16 sps:$4 sm:$0xff]  }
 0x3b1   :  { %v3221_v15 = vpack.c.bf16 %v3205_v60, %v3205_v60  ;;  %v3137_v2 = vrot.slane %v3096_v36, 4  ;;  %v2995_v30 = vrot.slane %v2994_v14, 2  ;;  %v6794_v39 = vld [vmem:[#allocation3 + $0x444] ss:$16 sps:$4 sm:$0xff]   ;;  %v6807_v60 = vld [vmem:[#allocation3 + $0x88] ss:$16 sps:$4 sm:$0xff]  }
 0x3b2   :  { %v3229_v47 = vpack.c.bf16 %v3213_v34, %v3213_v34  ;;  %v3043_v42 = vrot.slane %v3042_v37, 2  ;;  %v3185_v3 = vrot.slane %v3104_v17, 4  ;;  %5016 = vmatpush1.bf16.msra.mxu1 %v6789_v1  ;;  %v6792_v1 = vld [vmem:[#allocation3 + $0x440] ss:$16 sps:$4 sm:$0xff]  }
 0x3b3   :  { %v3531_v59 = vunpack.c.l.b16 %v3221_v15  ;;  %v3138_v31 = vmax.f32 %v3096_v36, %v3137_v2  ;;  %v2996_v25 = vmax.f32 %v2994_v14, %v2995_v30  ;;  %5017 = vmatprep.subr.bf16.mxu1 %v6797_v33  ;;  %v6800_v33 = vld [vmem:[#allocation3 + $0x464] ss:$16 sps:$4 sm:$0xff]   ;;  %v6813_v15 = vld [vmem:[#allocation3 + $0xa8] ss:$16 sps:$4 sm:$0xff]   ;;  %v2806_v2 = vrot.slane %v8795_v4, %v9534_v35 }
 0x3b4   :  { %v3539_v48 = vunpack.c.l.b16 %v3229_v47  ;;  %v3044_v56 = vmax.f32 %v3042_v37, %v3043_v42  ;;  %v3186_v10 = vmax.f32 %v3104_v17, %v3185_v3  ;;  %v2774_v37 = vrot.slane %v8793_v46, %v9534_v35  ;;  %v6821_v17 = vld [vmem:[#allocation3 + $0xcc] ss:$16 sps:$4 sm:$0xff]   ;;  %v6798_v42 = vld [vmem:[#allocation3 + $0x460] ss:$16 sps:$4 sm:$0xff]  }
 0x3b5   :  { %v3139_v11 = vrot.slane %v3138_v31, 2  ;;  %v2997_v49 = vrot.slane %v2996_v25, 1 }
 0x3b6   :  { %v3547_v57 = vsel %vm1292_vm1, %v3539_v48, %v3531_v59  ;;  %v3045_v41 = vrot.slane %v3044_v56, 1  ;;  %v3187_v50 = vrot.slane %v3186_v10, 2  ;;  %5018 = vmatpush1.bf16.msra.mxu1 %v6795_v0  ;;  %v2870_v59 = vrot.slane %v8817_v26, %v9534_v35  ;;  %v6806_v0 = vld [vmem:[#allocation3 + $0x484] ss:$16 sps:$4 sm:$0xff]   ;;  %v6819_v48 = vld [vmem:[#allocation3 + $0xc8] ss:$16 sps:$4 sm:$0xff]  }
 0x3b7   :  { %v8893_v22 = vpack.c.b16 %v3547_v57, %v3547_v57  ;;  %v3140_v9 = vmax.f32 %v3138_v31, %v3139_v11  ;;  %5019 = vmatprep.subr.bf16.mxu1 %v6803_v28  ;;  %v2998_v19 = vmax.f32 %v2996_v25, %v2997_v49  ;;  %v2786_v31 = vrot.slane %v8793_v46, %v9537_v43 }
 0x3b8   :  { %v3188_v53 = vmax.f32 %v3186_v10, %v3187_v50  ;;  %v3046_v44 = vmax.f32 %v3044_v56, %v3045_v41  ;;  %v2839_v25 = vmul.f32 %v2774_v37, %v8254_v23  ;;  %v2818_v28 = vrot.slane %v8795_v4, %v9537_v43  ;;  %v6827_v56 = vld [vmem:[#allocation3 + $0xec] ss:$16 sps:$4 sm:$0xff]  }
 0x3b9   :  { %4923 = vmatmul.mubr.bf16.vlgmr.msra.gmra.mrb[32].mxu0 %v8893_v22  ;;  %v3141_v6 = vrot.slane %v3140_v9, 1  ;;  %v2847_v11 = vmul.f32 %v2806_v2, %v9509_v63  ;;  %v2902_v10 = vrot.slane %v8819_v32, %v9534_v35  ;;  %v2882_v49 = vrot.slane %v8817_v26, %v9537_v43 }
 0x3ba   :  { %4932 = vmatpush1.bf16.msra.mxu0 %v6780_v27  ;;  %v3189_v55 = vrot.slane %v3188_v53, 1  ;;  %5020 = vmatpush1.bf16.msra.mxu1 %v6801_v13  ;;  %v8911_v57 = vadd.f32 %v2870_v59, %v2839_v25  ;;  %v2914_v23 = vrot.slane %v8819_v32, %v9537_v43  ;;  %v3063_v50 = vmul.f32 %v2774_v37, %v8411_v16  ;;  %v6812_v13 = vld [vmem:[#allocation3 + $0x4a4] ss:$16 sps:$4 sm:$0xff]  }
 0x3bb   :  { %v3142_v18 = vmax.f32 %v3140_v9, %v3141_v6  ;;  %4933 = vmatprep.subr.bf16.mxu0 %v6788_v45  ;;  %5021 = vmatprep.subr.bf16.mxu1 %v6809_v21  ;;  %v6804_v9 = vld [vmem:[#allocation3 + $0x480] ss:$16 sps:$4 sm:$0xff]   ;;  %v3071_v63 = vmul.f32 %v2806_v2, %v8415_v8  ;;  %v6825_v21 = vld [vmem:[#allocation3 + $0xe8] ss:$16 sps:$4 sm:$0xff]  }
 0x3bc   :  { %v3190_v38 = vmax.f32 %v3188_v53, %v3189_v55  ;;  %v9558_v45 = vld [vmem:[#allocation82_spill] sm:$0xff]  ;;  %v9560_v53 = vld [vmem:[#allocation103_spill] sm:$0xff]  ;;  %v2943_v55 = vadd.f32 %v2902_v10, %v2847_v11  ;;  %v3079_v16 = vadd.f32 %v3063_v50, %v2870_v59 }
 0x3bd   :  { %v3208_v36 = vmax.f32 %v2998_v19, %v3142_v18  ;;  %v2842_v35 = vmul.f32 %v2786_v31, %v9558_v45  ;;  %v9559_v19 = vld [vmem:[#allocation93_spill] sm:$0xff] }
 0x3be   :  { %4934 = vmatpush1.bf16.msra.mxu0 %v6786_v5  ;;  %v3216_v34 = vmax.f32 %v3046_v44, %v3190_v38  ;;  %5022 = vmatpush1.bf16.msra.mxu1 %v6807_v60  ;;  %v2850_v6 = vmul.f32 %v2818_v28, %v9559_v19  ;;  %v3066_v5 = vmul.f32 %v2786_v31, %v9560_v53  ;;  %v9561_v44 = vld [vmem:[#allocation105_spill] sm:$0xff]  ;;  %v3095_v37 = vmax.f32 %v3079_v16, 0.0  ;;  %v6824_v31 = vld [vmem:[#allocation3 + $0x4e4] ss:$16 sps:$4 sm:$0xff]  }
 0x3bf   :  { %v3224_v14 = vpack.c.bf16 %v3208_v36, %v3208_v36  ;;  %4935 = vmatprep.subr.bf16.mxu0 %v6794_v39  ;;  %5023 = vmatprep.subr.bf16.mxu1 %v6815_v7  ;;  %v3074_v43 = vmul.f32 %v2818_v28, %v9561_v44  ;;  %v6833_v18 = vld [vmem:[#allocation3 + $0x10c] ss:$16 sps:$4 sm:$0xff]   ;;  %v3087_v39 = vadd.f32 %v3071_v63, %v2902_v10  ;;  %v6810_v36 = vld [vmem:[#allocation3 + $0x4a0] ss:$16 sps:$4 sm:$0xff]   ;;  %v6836_v44 = vld [vmem:[#allocation3 + $0x524] ss:$16 sps:$4 sm:$0xff]  }
 0x3c0   :  { %v3232_v47 = vpack.c.bf16 %v3216_v34, %v3216_v34  ;;  %v2938_v8 = vadd.f32 %v2882_v49, %v2842_v35  ;;  %v2946_v60 = vadd.f32 %v2914_v23, %v2850_v6  ;;  %v3082_v7 = vadd.f32 %v3066_v5, %v2882_v49  ;;  %v6831_v34 = vld [vmem:[#allocation3 + $0x108] ss:$16 sps:$4 sm:$0xff]   ;;  %v6822_v49 = vld [vmem:[#allocation3 + $0x4e0] ss:$16 sps:$4 sm:$0xff]   ;;  %v6851_v50 = vld [vmem:[#allocation3 + $0x16c] ss:$16 sps:$4 sm:$0xff]  }
 0x3c1   :  { %v3534_v30 = vunpack.c.l.b16 %v3224_v14  ;;  %v3090_v38 = vadd.f32 %v3074_v43, %v2914_v23  ;;  %v6839_v14 = vld [vmem:[#allocation3 + $0x12c] ss:$16 sps:$4 sm:$0xff]   ;;  %v3131_v28 = vrot.slane %v3095_v37, 4  ;;  %v6830_v23 = vld [vmem:[#allocation3 + $0x504] ss:$16 sps:$4 sm:$0xff]  }
 0x3c2   :  { %4936 = vmatpush1.bf16.msra.mxu0 %v6792_v1  ;;  %v3542_v3 = vunpack.c.l.b16 %v3232_v47  ;;  %5024 = vmatpush1.bf16.msra.mxu1 %v6813_v15  ;;  %v6818_v1 = vld [vmem:[#allocation3 + $0x4c4] ss:$16 sps:$4 sm:$0xff]   ;;  %v2959_v15 = vmax.f32 %v2943_v55, 0.0  ;;  %v2954_v2 = vmax.f32 %v2938_v8, 0.0  ;;  %v2962_v47 = vmax.f32 %v2946_v60, 0.0 }
 0x3c3   :  { %4937 = vmatprep.subr.bf16.mxu0 %v6800_v33  ;;  %5025 = vmatprep.subr.bf16.mxu1 %v6821_v17  ;;  %v2951_v33 = vmax.f32 %v8911_v57, 0.0  ;;  %v3103_v17 = vmax.f32 %v3087_v39, 0.0  ;;  %v3106_v59 = vmax.f32 %v3090_v38, 0.0  ;;  %v3132_v35 = vmax.f32 %v3095_v37, %v3131_v28  ;;  %v6828_v5 = vld [vmem:[#allocation3 + $0x500] ss:$16 sps:$4 sm:$0xff]  }
 0x3c4   :  { %v3550_v27 = vsel %vm1292_vm1, %v3542_v3, %v3534_v30  ;;  %v3098_v30 = vmax.f32 %v3082_v7, 0.0  ;;  %v6837_v3 = vld [vmem:[#allocation3 + $0x128] ss:$16 sps:$4 sm:$0xff]   ;;  %v3035_v25 = vrot.slane %v2959_v15, 4  ;;  %v3005_v11 = vrot.slane %v2954_v2, 4 }
 0x3c5   :  { %v8917_v41 = vpack.c.b16 %v3550_v27, %v3550_v27  ;;  %v3053_v10 = vrot.slane %v2962_v47, 4  ;;  %v3197_v57 = vrot.slane %v3106_v59, 4  ;;  %v6849_v43 = vld [vmem:[#allocation3 + $0x168] ss:$16 sps:$4 sm:$0xff]   ;;  %v3133_v39 = vrot.slane %v3132_v35, 2 }
 0x3c6   :  { %4938 = vmatpush1.bf16.msra.mxu0 %v6798_v42  ;;  %5026 = vmatpush1.bf16.msra.mxu1 %v6819_v48  ;;  %v6816_v42 = vld [vmem:[#allocation3 + $0x4c0] ss:$16 sps:$4 sm:$0xff]   ;;  %v2987_v48 = vrot.slane %v2951_v33, 4  ;;  %v3149_v27 = vrot.slane %v3098_v30, 4  ;;  %v3036_v45 = vmax.f32 %v2959_v15, %v3035_v25 }
 0x3c7   :  { %4939 = vmatprep.subr.bf16.mxu0 %v6806_v0  ;;  %4963 = vmatprep.mubr.bf16.mxu0 %v8917_v41  ;;  %v6845_v0 = vld [vmem:[#allocation3 + $0x14c] ss:$16 sps:$4 sm:$0xff]   ;;  %v3054_v19 = vmax.f32 %v2962_v47, %v3053_v10  ;;  %v3198_v53 = vmax.f32 %v3106_v59, %v3197_v57 }
 0x3c8   :  { %5027 = vmatprep.subr.bf16.mxu1 %v6827_v56  ;;  %v3179_v56 = vrot.slane %v3103_v17, 4  ;;  %v2988_v63 = vmax.f32 %v2951_v33, %v2987_v48  ;;  %v3150_v6 = vmax.f32 %v3098_v30, %v3149_v27  ;;  %v3037_v16 = vrot.slane %v3036_v45, 2  ;;  %v6863_v33 = vld [vmem:[#allocation3 + $0x1ac] ss:$16 sps:$4 sm:$0xff]  }
 0x3c9   :  { %v3055_v7 = vrot.slane %v3054_v19, 2  ;;  %v6869_v48 = vld [vmem:[#allocation3 + $0x1cc] ss:$16 sps:$4 sm:$0xff]  }
 0x3ca   :  { %4940 = vmatpush1.bf16.msra.mxu0 %v6804_v9  ;;  %5028 = vmatpush1.bf16.msra.mxu1 %v6825_v21  ;;  %v6843_v9 = vld [vmem:[#allocation3 + $0x148] ss:$16 sps:$4 sm:$0xff]   ;;  %v3006_v21 = vmax.f32 %v2954_v2, %v3005_v11  ;;  %v2989_v55 = vrot.slane %v2988_v63, 2  ;;  %v3151_v38 = vrot.slane %v3150_v6, 2  ;;  %v3038_v37 = vmax.f32 %v3036_v45, %v3037_v16 }
 0x3cb   :  { %4941 = vmatprep.subr.bf16.mxu0 %v6812_v13  ;;  %5029 = vmatprep.subr.bf16.mxu1 %v6833_v18  ;;  %v3180_v13 = vmax.f32 %v3103_v17, %v3179_v56  ;;  %v6857_v18 = vld [vmem:[#allocation3 + $0x18c] ss:$16 sps:$4 sm:$0xff]   ;;  %v3134_v17 = vmax.f32 %v3132_v35, %v3133_v39  ;;  %v3056_v30 = vmax.f32 %v3054_v19, %v3055_v7  ;;  %v6858_v7 = vld [vmem:[#allocation3 + $0x5a0] ss:$16 sps:$4 sm:$0xff]  }
 0x3cc   :  { %v3007_v60 = vrot.slane %v3006_v21, 2  ;;  %v2990_v15 = vmax.f32 %v2988_v63, %v2989_v55  ;;  %v3152_v59 = vmax.f32 %v3150_v6, %v3151_v38  ;;  %v3039_v28 = vrot.slane %v3038_v37, 1  ;;  %v6875_v63 = vld [vmem:[#allocation3 + $0x1ec] ss:$16 sps:$4 sm:$0xff]   ;;  %v6866_v38 = vld [vmem:[#allocation3 + $0x5c4] ss:$16 sps:$4 sm:$0xff]  }
 0x3cd   :  { %v3181_v8 = vrot.slane %v3180_v13, 2  ;;  %v3135_v56 = vrot.slane %v3134_v17, 1  ;;  %v3057_v27 = vrot.slane %v3056_v30, 1  ;;  %v6881_v39 = vld [vmem:[#allocation3 + $0x20c] ss:$16 sps:$4 sm:$0xff]  }
 0x3ce   :  { %4942 = vmatpush1.bf16.msra.mxu0 %v6810_v36  ;;  %5030 = vmatpush1.bf16.msra.mxu1 %v6831_v34  ;;  %v3199_v36 = vrot.slane %v3198_v53, 2  ;;  %v6842_v34 = vld [vmem:[#allocation3 + $0x544] ss:$16 sps:$4 sm:$0xff]   ;;  %v3008_v47 = vmax.f32 %v3006_v21, %v3007_v60  ;;  %v2991_v25 = vrot.slane %v2990_v15, 1  ;;  %v3153_v57 = vrot.slane %v3152_v59, 1 }
 0x3cf   :  { %4943 = vmatprep.subr.bf16.mxu0 %v6818_v1  ;;  %5031 = vmatprep.subr.bf16.mxu1 %v6839_v14  ;;  %v6834_v1 = vld [vmem:[#allocation3 + $0x520] ss:$16 sps:$4 sm:$0xff]   ;;  %v6855_v14 = vld [vmem:[#allocation3 + $0x188] ss:$16 sps:$4 sm:$0xff]   ;;  %v3182_v2 = vmax.f32 %v3180_v13, %v3181_v8  ;;  %v3040_v35 = vmax.f32 %v3038_v37, %v3039_v28  ;;  %v3136_v13 = vmax.f32 %v3134_v17, %v3135_v56  ;;  %v6872_v17 = vld [vmem:[#allocation3 + $0x5e4] ss:$16 sps:$4 sm:$0xff]  }
 0x3d0   :  { %v3009_v10 = vrot.slane %v3008_v47, 1  ;;  %v2992_v45 = vmax.f32 %v2990_v15, %v2991_v25  ;;  %v3058_v6 = vmax.f32 %v3056_v30, %v3057_v27  ;;  %v6864_v37 = vld [vmem:[#allocation3 + $0x5c0] ss:$16 sps:$4 sm:$0xff]   ;;  %v6899_v25 = vld [vmem:[#allocation3 + $0x26c] ss:$16 sps:$4 sm:$0xff]  }
 0x3d1   :  { %v3183_v11 = vrot.slane %v3182_v2, 1  ;;  %v6876_v56 = vld [vmem:[#allocation3 + $0x600] ss:$16 sps:$4 sm:$0xff]  }
 0x3d2   :  { %4944 = vmatpush1.bf16.msra.mxu0 %v6816_v42  ;;  %5032 = vmatpush1.bf16.msra.mxu1 %v6837_v3  ;;  %v3200_v42 = vmax.f32 %v3198_v53, %v3199_v36  ;;  %v6848_v3 = vld [vmem:[#allocation3 + $0x564] ss:$16 sps:$4 sm:$0xff]   ;;  %v3010_v19 = vmax.f32 %v3008_v47, %v3009_v10  ;;  %v3154_v53 = vmax.f32 %v3152_v59, %v3153_v57  ;;  %v6879_v36 = vld [vmem:[#allocation3 + $0x208] ss:$16 sps:$4 sm:$0xff]   ;;  %v6893_v59 = vld [vmem:[#allocation3 + $0x24c] ss:$16 sps:$4 sm:$0xff]  }
 0x3d3   :  { %4945 = vmatprep.subr.bf16.mxu0 %v6824_v31  ;;  %5033 = vmatprep.subr.bf16.mxu1 %v6845_v0  ;;  %v6840_v31 = vld [vmem:[#allocation3 + $0x540] ss:$16 sps:$4 sm:$0xff]   ;;  %v6861_v0 = vld [vmem:[#allocation3 + $0x1a8] ss:$16 sps:$4 sm:$0xff]   ;;  %v3184_v21 = vmax.f32 %v3182_v2, %v3183_v11  ;;  %v3207_v55 = vmax.f32 %v2992_v45, %v3136_v13  ;;  %v6905_v57 = vld [vmem:[#allocation3 + $0x28c] ss:$16 sps:$4 sm:$0xff]  }
 0x3d4   :  { %v3210_v8 = vmax.f32 %v3010_v19, %v3154_v53  ;;  %v6885_v2 = vld [vmem:[#allocation3 + $0x228] ss:$16 sps:$4 sm:$0xff]   ;;  %v6896_v45 = vld [vmem:[#allocation3 + $0x664] ss:$16 sps:$4 sm:$0xff]   ;;  %v6917_v13 = vld [vmem:[#allocation3 + $0x2cc] ss:$16 sps:$4 sm:$0xff]   ;;  %v2782_v19 = vrot.slane %v8793_v46, %v9535_v61 }
 0x3d5   :  { %v3215_v16 = vmax.f32 %v3040_v35, %v3184_v21  ;;  %v6897_v10 = vld [vmem:[#allocation3 + $0x268] ss:$16 sps:$4 sm:$0xff]   ;;  %v6894_v21 = vld [vmem:[#allocation3 + $0x660] ss:$16 sps:$4 sm:$0xff]   ;;  %v6902_v53 = vld [vmem:[#allocation3 + $0x684] ss:$16 sps:$4 sm:$0xff]  }
 0x3d6   :  { %4946 = vmatpush1.bf16.msra.mxu0 %v6822_v49  ;;  %5034 = vmatpush1.bf16.msra.mxu1 %v6843_v9  ;;  %v3201_v49 = vrot.slane %v3200_v42, 1  ;;  %v6854_v9 = vld [vmem:[#allocation3 + $0x584] ss:$16 sps:$4 sm:$0xff]   ;;  %v6909_v35 = vld [vmem:[#allocation3 + $0x2a8] ss:$16 sps:$4 sm:$0xff]  }
 0x3d7   :  { %4947 = vmatprep.subr.bf16.mxu0 %v6830_v23  ;;  %5035 = vmatprep.subr.bf16.mxu1 %v6851_v50  ;;  %v6846_v23 = vld [vmem:[#allocation3 + $0x560] ss:$16 sps:$4 sm:$0xff]   ;;  %v6867_v50 = vld [vmem:[#allocation3 + $0x1c8] ss:$16 sps:$4 sm:$0xff]  }
 0x3da   :  { %4948 = vmatpush1.bf16.msra.mxu0 %v6828_v5  ;;  %5036 = vmatpush1.bf16.msra.mxu1 %v6849_v43  ;;  %v3202_v5 = vmax.f32 %v3200_v42, %v3201_v49  ;;  %v6860_v43 = vld [vmem:[#allocation3 + $0x5a4] ss:$16 sps:$4 sm:$0xff]   ;;  %v6882_v49 = vld [vmem:[#allocation3 + $0x620] ss:$16 sps:$4 sm:$0xff]  }
 0x3db   :  { %4949 = vmatprep.subr.bf16.mxu0 %v6836_v44  ;;  %5037 = vmatprep.subr.bf16.mxu1 %v6857_v18  ;;  %v6852_v44 = vld [vmem:[#allocation3 + $0x580] ss:$16 sps:$4 sm:$0xff]   ;;  %v6873_v18 = vld [vmem:[#allocation3 + $0x1e8] ss:$16 sps:$4 sm:$0xff]  }
 0x3dc   :  { %v3218_v60 = vmax.f32 %v3058_v6, %v3202_v5  ;;  %v2814_v6 = vrot.slane %v8795_v4, %v9535_v61  ;;  %v6915_v5 = vld [vmem:[#allocation3 + $0x2c8] ss:$16 sps:$4 sm:$0xff]   ;;  %v3065_v4 = vmul.f32 %v2782_v19, %v8474_v62  ;;  %v6935_v62 = vld [vmem:[#allocation3 + $0x32c] ss:$16 sps:$4 sm:$0xff]  }
 0x3de   :  { %4950 = vmatpush1.bf16.msra.mxu0 %v6834_v1  ;;  %5038 = vmatpush1.bf16.msra.mxu1 %v6855_v14  ;;  %v3223_v1 = vpack.c.bf16 %v3207_v55, %v3207_v55  ;;  %v6887_v14 = vld [vmem:[#allocation3 + $0x22c] ss:$16 sps:$4 sm:$0xff]   ;;  %v3234_v15 = vpack.c.bf16 %v3218_v60, %v3218_v60  ;;  %v6900_v55 = vld [vmem:[#allocation3 + $0x680] ss:$16 sps:$4 sm:$0xff]   ;;  %v2849_v46 = vmul.f32 %v2814_v6, %v8316_v40  ;;  %v6921_v60 = vld [vmem:[#allocation3 + $0x2e8] ss:$16 sps:$4 sm:$0xff]  }
 0x3df   :  { %4951 = vmatprep.subr.bf16.mxu0 %v6842_v34  ;;  %5039 = vmatprep.subr.bf16.mxu1 %v6863_v33  ;;  %v3231_v34 = vpack.c.bf16 %v3215_v16, %v3215_v16  ;;  %v3226_v33 = vpack.c.bf16 %v3210_v8, %v3210_v8  ;;  %v2841_v16 = vmul.f32 %v2782_v19, %v8273_v20  ;;  %v6908_v8 = vld [vmem:[#allocation3 + $0x6a4] ss:$16 sps:$4 sm:$0xff]   ;;  %v6927_v40 = vld [vmem:[#allocation3 + $0x308] ss:$16 sps:$4 sm:$0xff]  }
 0x3e0   :  { %v3533_v47 = vunpack.c.l.b16 %v3223_v1  ;;  %v6914_v20 = vld [vmem:[#allocation3 + $0x6c4] ss:$16 sps:$4 sm:$0xff]  }
 0x3e1   :  { %v3541_v30 = vunpack.c.l.b16 %v3231_v34  ;;  %v3536_v42 = vunpack.c.l.b16 %v3226_v33  ;;  %v6912_v33 = vld [vmem:[#allocation3 + $0x6c0] ss:$16 sps:$4 sm:$0xff]  }
 0x3e2   :  { %4952 = vmatpush1.bf16.msra.mxu0 %v6840_v31  ;;  %5040 = vmatpush1.bf16.msra.mxu1 %v6861_v0  ;;  %v3544_v31 = vunpack.c.l.b16 %v3234_v15  ;;  %v6878_v0 = vld [vmem:[#allocation3 + $0x604] ss:$16 sps:$4 sm:$0xff]  }
 0x3e3   :  { %4953 = vmatprep.subr.bf16.mxu0 %v6848_v3  ;;  %5041 = vmatprep.subr.bf16.mxu1 %v6869_v48  ;;  %v6870_v3 = vld [vmem:[#allocation3 + $0x5e0] ss:$16 sps:$4 sm:$0xff]   ;;  %v6891_v48 = vld [vmem:[#allocation3 + $0x248] ss:$16 sps:$4 sm:$0xff]   ;;  %v6920_v15 = vld [vmem:[#allocation3 + $0x6e4] ss:$16 sps:$4 sm:$0xff]  }
 0x3e4   :  { %v3552_v28 = vsel %vm1292_vm1, %v3544_v31, %v3536_v42  ;;  %v6918_v42 = vld [vmem:[#allocation3 + $0x6e0] ss:$16 sps:$4 sm:$0xff]   ;;  %v6926_v31 = vld [vmem:[#allocation3 + $0x704] ss:$16 sps:$4 sm:$0xff]  }
 0x3e5   :  { %v8933_v27 = vpack.c.b16 %v3552_v28, %v3552_v28 }
 0x3e6   :  { %4954 = vmatpush1.bf16.msra.mxu0 %v6846_v23  ;;  %5042 = vmatpush1.bf16.msra.mxu1 %v6867_v50  ;;  %v6890_v23 = vld [vmem:[#allocation3 + $0x644] ss:$16 sps:$4 sm:$0xff]   ;;  %v6911_v50 = vld [vmem:[#allocation3 + $0x2ac] ss:$16 sps:$4 sm:$0xff]  }
 0x3e7   :  { %4955 = vmatprep.subr.bf16.mxu0 %v6854_v9  ;;  %5043 = vmatprep.subr.bf16.mxu1 %v6875_v63  ;;  %v6903_v9 = vld [vmem:[#allocation3 + $0x288] ss:$16 sps:$4 sm:$0xff]   ;;  %v6888_v63 = vld [vmem:[#allocation3 + $0x640] ss:$16 sps:$4 sm:$0xff]  }
 0x3ea   :  { %4956 = vmatpush1.bf16.msra.mxu0 %v6852_v44  ;;  %5044 = vmatpush1.bf16.msra.mxu1 %v6873_v18  ;;  %v6923_v44 = vld [vmem:[#allocation3 + $0x2ec] ss:$16 sps:$4 sm:$0xff]   ;;  %v2910_v18 = vrot.slane %v8819_v32, %v9535_v61  ;;  %v6906_v32 = vld [vmem:[#allocation3 + $0x6a0] ss:$16 sps:$4 sm:$0xff]  }
 0x3eb   :  { %4957 = vmatprep.subr.bf16.mxu0 %v6860_v43  ;;  %5054 = vmatprep.subr.bf16.mxu1 %v6881_v39  ;;  %v2878_v43 = vrot.slane %v8817_v26, %v9535_v61  ;;  %v3073_v39 = vmul.f32 %v2814_v6, %v8419_v58 }
 0x3ed   :  { %5046 = vmatmul.mubr.bf16.vlgmr.msra.gmra.mrb[36].mxu1 %v8887_v12  ;;  %v3549_v12 = vsel %vm1292_vm1, %v3541_v30, %v3533_v47  ;;  %v2937_v26 = vadd.f32 %v2878_v43, %v2841_v16  ;;  %v3089_v61 = vadd.f32 %v3073_v39, %v2910_v18  ;;  %v6942_v39 = vld [vmem:[#allocation3 + $0x760] ss:$16 sps:$4 sm:$0xff]  }
 0x3ee   :  { %4958 = vmatpush1.bf16.msra.mxu0 %v6858_v7  ;;  %5055 = vmatpush1.bf16.msra.mxu1 %v6879_v36  ;;  %v8931_v11 = vpack.c.b16 %v3549_v12, %v3549_v12  ;;  %v6929_v7 = vld [vmem:[#allocation3 + $0x30c] ss:$16 sps:$4 sm:$0xff]   ;;  %v3081_v36 = vadd.f32 %v3065_v4, %v2878_v43  ;;  %v6957_v43 = vld [vmem:[#allocation3 + $0x3a8] ss:$16 sps:$4 sm:$0xff]  }
 0x3ef   :  { %4959 = vmatprep.subr.bf16.mxu0 %v6866_v38  ;;  %5086 = vmatprep.mubr.bf16.mxu1 %v8861_v54  ;;  %v6884_v54 = vld [vmem:[#allocation3 + $0x624] ss:$16 sps:$4 sm:$0xff]   ;;  %v2945_v38 = vadd.f32 %v2910_v18, %v2849_v46  ;;  %v2953_v1 = vmax.f32 %v2937_v26, 0.0  ;;  %v6965_v18 = vld [vmem:[#allocation3 + $0x3cc] ss:$16 sps:$4 sm:$0xff]  }
 0x3f0   :  { %5056 = vmatprep.subr.bf16.mxu1 %v6887_v14  ;;  %v3097_v34 = vmax.f32 %v3081_v36, 0.0  ;;  %v3105_v14 = vmax.f32 %v3089_v61, 0.0 }
 0x3f1   :  { %v2961_v58 = vmax.f32 %v2945_v38, 0.0 }
 0x3f2   :  { %4960 = vmatpush1.bf16.msra.mxu0 %v6864_v37  ;;  %5057 = vmatpush1.bf16.msra.mxu1 %v6885_v2  ;;  %v6933_v37 = vld [vmem:[#allocation3 + $0x328] ss:$16 sps:$4 sm:$0xff]   ;;  %v2999_v2 = vrot.slane %v2953_v1, 4  ;;  %v3143_v30 = vrot.slane %v3097_v34, 4 }
 0x3f3   :  { %4961 = vmatprep.subr.bf16.mxu0 %v6872_v17  ;;  %5058 = vmatprep.subr.bf16.mxu1 %v6893_v59  ;;  %v6941_v17 = vld [vmem:[#allocation3 + $0x34c] ss:$16 sps:$4 sm:$0xff]   ;;  %v3047_v47 = vrot.slane %v2961_v58, 4  ;;  %v3191_v59 = vrot.slane %v3105_v14, 4 }
 0x3f5   :  { %v3048_v12 = vmax.f32 %v2961_v58, %v3047_v47  ;;  %v3192_v28 = vmax.f32 %v3105_v14, %v3191_v59  ;;  %v6974_v58 = vld [vmem:[#allocation3 + $0x40c] ss:$16 sps:$4 sm:$0xff]   ;;  %v6962_v14 = vld [vmem:[#allocation3 + $0x7c4] ss:$16 sps:$4 sm:$0xff]  }
 0x3f6   :  { %4962 = vmatpush1.bf16.msra.mxu0 %v6870_v3  ;;  %5059 = vmatpush1.bf16.msra.mxu1 %v6891_v48  ;;  %v6939_v3 = vld [vmem:[#allocation3 + $0x348] ss:$16 sps:$4 sm:$0xff]   ;;  %v3000_v48 = vmax.f32 %v2953_v1, %v2999_v2  ;;  %v6960_v2 = vld [vmem:[#allocation3 + $0x7c0] ss:$16 sps:$4 sm:$0xff]   ;;  %v6968_v47 = vld [vmem:[#allocation3 + $0x7e4] ss:$16 sps:$4 sm:$0xff]  }
 0x3f7   :  { %4972 = vmatprep.subr.bf16.mxu0 %v6878_v0  ;;  %5060 = vmatprep.subr.bf16.mxu1 %v6899_v25  ;;  %v6947_v0 = vld [vmem:[#allocation3 + $0x36c] ss:$16 sps:$4 sm:$0xff]   ;;  %v3144_v25 = vmax.f32 %v3097_v34, %v3143_v30  ;;  %v6954_v34 = vld [vmem:[#allocation3 + $0x7a0] ss:$16 sps:$4 sm:$0xff]   ;;  %v6975_v30 = vld [vmem:[#allocation3 + $0x428] ss:$16 sps:$4 sm:$0xff]  }
 0x3f9   :  { %4964 = vmatmul.mubr.bf16.vlgmr.msra.gmra.mrb[32].mxu0 %v8931_v11 }
 0x3fa   :  { %4973 = vmatpush1.bf16.msra.mxu0 %v6876_v56  ;;  %5004 = vmatprep.mubr.bf16.mxu0 %v8933_v27  ;;  %v6924_v56 = vld [vmem:[#allocation3 + $0x700] ss:$16 sps:$4 sm:$0xff]  }
 0x3fb   :  { %4974 = vmatprep.subr.bf16.mxu0 %v6884_v54  ;;  %5061 = vmatpush1.bf16.msra.mxu1 %v6897_v10  ;;  %v6932_v54 = vld [vmem:[#allocation3 + $0x724] ss:$16 sps:$4 sm:$0xff]   ;;  %v6945_v10 = vld [vmem:[#allocation3 + $0x368] ss:$16 sps:$4 sm:$0xff]  }
 0x3fc   :  { %5062 = vmatprep.subr.bf16.mxu1 %v6905_v57  ;;  %v6953_v57 = vld [vmem:[#allocation3 + $0x38c] ss:$16 sps:$4 sm:$0xff]  }
 0x3fe   :  { %4975 = vmatpush1.bf16.msra.mxu0 %v6882_v49  ;;  %v3001_v49 = vrot.slane %v3000_v48, 2 }
 0x3ff   :  { %4976 = vmatprep.subr.bf16.mxu0 %v6890_v23  ;;  %5063 = vmatpush1.bf16.msra.mxu1 %v6903_v9  ;;  %v3049_v23 = vrot.slane %v3048_v12, 2  ;;  %v3145_v9 = vrot.slane %v3144_v25, 2 }
 0x400   :  { %5064 = vmatprep.subr.bf16.mxu1 %v6911_v50  ;;  %v3193_v50 = vrot.slane %v3192_v28, 2 }
 0x401   :  { %v3050_v19 = vmax.f32 %v3048_v12, %v3049_v23  ;;  %v3146_v6 = vmax.f32 %v3144_v25, %v3145_v9  ;;  %v6983_v12 = vld [vmem:[#allocation3 + $0x46c] ss:$16 sps:$4 sm:$0xff]  }
 0x402   :  { %4977 = vmatpush1.bf16.msra.mxu0 %v6888_v63  ;;  %v6930_v63 = vld [vmem:[#allocation3 + $0x720] ss:$16 sps:$4 sm:$0xff]   ;;  %v6989_v23 = vld [vmem:[#allocation3 + $0x4ac] ss:$16 sps:$4 sm:$0xff]  }
 0x403   :  { %4978 = vmatprep.subr.bf16.mxu0 %v6896_v45  ;;  %5065 = vmatpush1.bf16.msra.mxu1 %v6909_v35  ;;  %v6938_v45 = vld [vmem:[#allocation3 + $0x744] ss:$16 sps:$4 sm:$0xff]   ;;  %v6951_v35 = vld [vmem:[#allocation3 + $0x388] ss:$16 sps:$4 sm:$0xff]   ;;  %v3051_v16 = vrot.slane %v3050_v19, 1  ;;  %v3147_v46 = vrot.slane %v3146_v6, 1 }
 0x404   :  { %5066 = vmatprep.subr.bf16.mxu1 %v6917_v13  ;;  %v6959_v13 = vld [vmem:[#allocation3 + $0x3ac] ss:$16 sps:$4 sm:$0xff]  }
 0x405   :  { %v3052_v38 = vmax.f32 %v3050_v19, %v3051_v16  ;;  %v3148_v36 = vmax.f32 %v3146_v6, %v3147_v46  ;;  %v7074_v9 = vld [vmem:[%s9187_s11 + $0x20] ss:$8 sps:$4 sm:$0xff]  }
 0x406   :  { %4979 = vmatpush1.bf16.msra.mxu0 %v6894_v21  ;;  %v3002_v21 = vmax.f32 %v3000_v48, %v3001_v49  ;;  %v7070_v48 = vld [vmem:[%s9187_s11 + $0x4] ss:$8 sps:$4 sm:$0xff]   ;;  %v7080_v6 = vld [vmem:[%s9187_s11 + $0x40] ss:$8 sps:$4 sm:$0xff]  }
 0x407   :  { %4980 = vmatprep.subr.bf16.mxu0 %v6902_v53  ;;  %5067 = vmatpush1.bf16.msra.mxu1 %v6915_v5  ;;  %v3194_v53 = vmax.f32 %v3192_v28, %v3193_v50  ;;  %v6936_v5 = vld [vmem:[#allocation3 + $0x740] ss:$16 sps:$4 sm:$0xff]   ;;  %v6981_v28 = vld [vmem:[#allocation3 + $0x468] ss:$16 sps:$4 sm:$0xff]   ;;  %v6995_v19 = vld [vmem:[#allocation3 + $0x4ec] ss:$16 sps:$4 sm:$0xff]  }
 0x408   :  { %5068 = vmatprep.subr.bf16.mxu1 %v6923_v44  ;;  %v6944_v44 = vld [vmem:[#allocation3 + $0x764] ss:$16 sps:$4 sm:$0xff]   ;;  %v6987_v50 = vld [vmem:[#allocation3 + $0x4a8] ss:$16 sps:$4 sm:$0xff]   ;;  %v7001_v16 = vld [vmem:[#allocation3 + $0x52c] ss:$16 sps:$4 sm:$0xff]  }
 0x409   :  { %v3195_v4 = vrot.slane %v3194_v53, 1  ;;  %v7076_v49 = vld [vmem:[%s9187_s11 + $0x24] ss:$8 sps:$4 sm:$0xff]   ;;  %v7086_v46 = vld [vmem:[%s9187_s11 + $0x60] ss:$8 sps:$4 sm:$0xff]  }
 0x40a   :  { %4981 = vmatpush1.bf16.msra.mxu0 %v6900_v55  ;;  %v3003_v55 = vrot.slane %v3002_v21, 1 }
 0x40b   :  { %4982 = vmatprep.subr.bf16.mxu0 %v6908_v8  ;;  %5069 = vmatpush1.bf16.msra.mxu1 %v6921_v60  ;;  %v6950_v8 = vld [vmem:[#allocation3 + $0x784] ss:$16 sps:$4 sm:$0xff]   ;;  %v6963_v60 = vld [vmem:[#allocation3 + $0x3c8] ss:$16 sps:$4 sm:$0xff]   ;;  %v3196_v61 = vmax.f32 %v3194_v53, %v3195_v4 }
 0x40c   :  { %5070 = vmatprep.subr.bf16.mxu1 %v6929_v7  ;;  %v6971_v7 = vld [vmem:[#allocation3 + $0x3ec] ss:$16 sps:$4 sm:$0xff]   ;;  %v3004_v26 = vmax.f32 %v3002_v21, %v3003_v55  ;;  %v6993_v53 = vld [vmem:[#allocation3 + $0x4e8] ss:$16 sps:$4 sm:$0xff]  }
 0x40d   :  { %v3217_v1 = vmax.f32 %v3052_v38, %v3196_v61  ;;  %v7082_v21 = vld [vmem:[%s9187_s11 + $0x44] ss:$8 sps:$4 sm:$0xff]  }
 0x40e   :  { %4983 = vmatpush1.bf16.msra.mxu0 %v6906_v32  ;;  %v6948_v32 = vld [vmem:[#allocation3 + $0x780] ss:$16 sps:$4 sm:$0xff]   ;;  %v6999_v4 = vld [vmem:[#allocation3 + $0x528] ss:$16 sps:$4 sm:$0xff]   ;;  %v7007_v38 = vld [vmem:[#allocation3 + $0x56c] ss:$16 sps:$4 sm:$0xff]  }
 0x40f   :  { %4984 = vmatprep.subr.bf16.mxu0 %v6914_v20  ;;  %5071 = vmatpush1.bf16.msra.mxu1 %v6927_v40  ;;  %v6956_v20 = vld [vmem:[#allocation3 + $0x7a4] ss:$16 sps:$4 sm:$0xff]   ;;  %v6969_v40 = vld [vmem:[#allocation3 + $0x3e8] ss:$16 sps:$4 sm:$0xff]  }
 0x410   :  { %5072 = vmatprep.subr.bf16.mxu1 %v6935_v62  ;;  %v3209_v62 = vmax.f32 %v3004_v26, %v3148_v36  ;;  %v7088_v55 = vld [vmem:[%s9187_s11 + $0x64] ss:$8 sps:$4 sm:$0xff]   ;;  %v7092_v36 = vld [vmem:[%s9187_s11 + $0x80] ss:$8 sps:$4 sm:$0xff]  }
 0x411   :  { %v7094_v26 = vld [vmem:[%s9187_s11 + $0x84] ss:$8 sps:$4 sm:$0xff]  }
 0x412   :  { %4985 = vmatpush1.bf16.msra.mxu0 %v6912_v33  ;;  %v6972_v33 = vld [vmem:[#allocation3 + $0x408] ss:$16 sps:$4 sm:$0xff]  }
 0x413   :  { %4986 = vmatprep.subr.bf16.mxu0 %v6920_v15  ;;  %5073 = vmatpush1.bf16.msra.mxu1 %v6933_v37  ;;  %v3225_v15 = vpack.c.bf16 %v3209_v62, %v3209_v62  ;;  %v3233_v37 = vpack.c.bf16 %v3217_v1, %v3217_v1  ;;  %v7005_v61 = vld [vmem:[#allocation3 + $0x568] ss:$16 sps:$4 sm:$0xff]  }
 0x414   :  { %5074 = vmatprep.subr.bf16.mxu1 %v6941_v17  ;;  %v6977_v17 = vld [vmem:[#allocation3 + $0x42c] ss:$16 sps:$4 sm:$0xff]   ;;  %v7008_v62 = vld [vmem:[#allocation3 + $0x588] ss:$16 sps:$4 sm:$0xff]  }
 0x415   :  { %v3535_v59 = vunpack.c.l.b16 %v3225_v15  ;;  %v7100_v1 = vld [vmem:[%s9187_s11 + $0xa4] ss:$8 sps:$4 sm:$0xff]  }
 0x416   :  { %4987 = vmatpush1.bf16.msra.mxu0 %v6918_v42  ;;  %v3543_v42 = vunpack.c.l.b16 %v3233_v37  ;;  %v7016_v15 = vld [vmem:[#allocation3 + $0x5cc] ss:$16 sps:$4 sm:$0xff]  }
 0x417   :  { %4988 = vmatprep.subr.bf16.mxu0 %v6926_v31  ;;  %5075 = vmatpush1.bf16.msra.mxu1 %v6939_v3  ;;  %v6980_v31 = vld [vmem:[#allocation3 + $0x44c] ss:$16 sps:$4 sm:$0xff]   ;;  %v6966_v3 = vld [vmem:[#allocation3 + $0x7e0] ss:$16 sps:$4 sm:$0xff]  }
 0x418   :  { %5076 = vmatprep.subr.bf16.mxu1 %v6947_v0  ;;  %v6978_v0 = vld [vmem:[#allocation3 + $0x448] ss:$16 sps:$4 sm:$0xff]  }
 0x419   :  { %v7101_v37 = vld [vmem:[%s9187_s11 + $0xb0] ss:$8 sps:$4 sm:$0xff]  }
 0x41a   :  { %4989 = vmatpush1.bf16.msra.mxu0 %v6924_v56  ;;  %v7073_v56 = vld [vmem:[%s9187_s11 + $0x14] ss:$8 sps:$4 sm:$0xff]  }
 0x41b   :  { %4990 = vmatprep.subr.bf16.mxu0 %v6932_v54  ;;  %5077 = vmatpush1.bf16.msra.mxu1 %v6945_v10  ;;  %v6986_v54 = vld [vmem:[#allocation3 + $0x48c] ss:$16 sps:$4 sm:$0xff]  }
 0x41c   :  { %5078 = vmatprep.subr.bf16.mxu1 %v6953_v57  ;;  %v7071_v10 = vld [vmem:[%s9187_s11 + $0x10] ss:$8 sps:$4 sm:$0xff]  }
 0x41d   :  { %v6984_v57 = vld [vmem:[#allocation3 + $0x488] ss:$16 sps:$4 sm:$0xff]  }
 0x41e   :  { %4991 = vmatpush1.bf16.msra.mxu0 %v6930_v63  ;;  %v7079_v63 = vld [vmem:[%s9187_s11 + $0x34] ss:$8 sps:$4 sm:$0xff]  }
 0x41f   :  { %4992 = vmatprep.subr.bf16.mxu0 %v6938_v45  ;;  %5079 = vmatpush1.bf16.msra.mxu1 %v6951_v35  ;;  %v6992_v45 = vld [vmem:[#allocation3 + $0x4cc] ss:$16 sps:$4 sm:$0xff]  }
 0x420   :  { %5080 = vmatprep.subr.bf16.mxu1 %v6959_v13  ;;  %v7077_v35 = vld [vmem:[%s9187_s11 + $0x30] ss:$8 sps:$4 sm:$0xff]  }
 0x421   :  { %v6990_v13 = vld [vmem:[#allocation3 + $0x4c8] ss:$16 sps:$4 sm:$0xff]  }
 0x422   :  { %4993 = vmatpush1.bf16.msra.mxu0 %v6936_v5  ;;  %v7085_v5 = vld [vmem:[%s9187_s11 + $0x54] ss:$8 sps:$4 sm:$0xff]  }
 0x423   :  { %4994 = vmatprep.subr.bf16.mxu0 %v6944_v44  ;;  %5081 = vmatpush1.bf16.msra.mxu1 %v6957_v43  ;;  %v6998_v44 = vld [vmem:[#allocation3 + $0x50c] ss:$16 sps:$4 sm:$0xff]  }
 0x424   :  { %5082 = vmatprep.subr.bf16.mxu1 %v6965_v18  ;;  %v7083_v43 = vld [vmem:[%s9187_s11 + $0x50] ss:$8 sps:$4 sm:$0xff]  }
 0x425   :  { %v6996_v18 = vld [vmem:[#allocation3 + $0x508] ss:$16 sps:$4 sm:$0xff]  }
 0x426   :  { %4995 = vmatpush1.bf16.msra.mxu0 %v6942_v39  ;;  %v7091_v39 = vld [vmem:[%s9187_s11 + $0x74] ss:$8 sps:$4 sm:$0xff]  }
 0x427   :  { %4996 = vmatprep.subr.bf16.mxu0 %v6950_v8  ;;  %5083 = vmatpush1.bf16.msra.mxu1 %v6963_v60  ;;  %v7004_v8 = vld [vmem:[#allocation3 + $0x54c] ss:$16 sps:$4 sm:$0xff]  }
 0x428   :  { %5084 = vmatprep.subr.bf16.mxu1 %v6971_v7  ;;  %v7089_v60 = vld [vmem:[%s9187_s11 + $0x70] ss:$8 sps:$4 sm:$0xff]  }
 0x429   :  { %v7002_v7 = vld [vmem:[#allocation3 + $0x548] ss:$16 sps:$4 sm:$0xff]  }
 0x42a   :  { %4997 = vmatpush1.bf16.msra.mxu0 %v6948_v32  ;;  %v7097_v32 = vld [vmem:[%s9187_s11 + $0x94] ss:$8 sps:$4 sm:$0xff]  }
 0x42b   :  { %4998 = vmatprep.subr.bf16.mxu0 %v6956_v20  ;;  %5085 = vmatpush1.bf16.msra.mxu1 %v6969_v40  ;;  %v7010_v20 = vld [vmem:[#allocation3 + $0x58c] ss:$16 sps:$4 sm:$0xff]  }
 0x42c   :  { %5095 = vmatprep.subr.bf16.mxu1 %v6974_v58  ;;  %v7095_v40 = vld [vmem:[%s9187_s11 + $0x90] ss:$8 sps:$4 sm:$0xff]  }
 0x42d   :  { %v7013_v58 = vld [vmem:[#allocation3 + $0x5ac] ss:$16 sps:$4 sm:$0xff]  }
 0x42e   :  { %4999 = vmatpush1.bf16.msra.mxu0 %v6954_v34  ;;  %5087 = vmatmul.mubr.bf16.vlgmr.msra.gmra.mrb[36].mxu1 %v8893_v22  ;;  %v3551_v22 = vsel %vm1292_vm1, %v3543_v42, %v3535_v59  ;;  %v7098_v34 = vld [vmem:[%s9187_s11 + $0xa0] ss:$8 sps:$4 sm:$0xff]   ;;  %v7109_v42 = vld [vmem:[%s9187_s11 + $0xd4] ss:$8 sps:$4 sm:$0xff]  }
 0x42f   :  { %5000 = vmatprep.subr.bf16.mxu0 %v6962_v14  ;;  %5096 = vmatpush1.bf16.msra.mxu1 %v6972_v33  ;;  %v8958_v25 = vpack.c.b16 %v3551_v22, %v3551_v22  ;;  %v7011_v14 = vld [vmem:[#allocation3 + $0x5a8] ss:$16 sps:$4 sm:$0xff]  }
 0x430   :  { %5127 = vmatprep.mubr.bf16.mxu1 %v8917_v41  ;;  %5097 = vmatprep.subr.bf16.mxu1 %v6977_v17  ;;  %v7068_v41 = vld [vmem:[%s9187_s11] ss:$8 sps:$4 sm:$0xff]   ;;  %v7103_v33 = vld [vmem:[%s9187_s11 + $0xb4] ss:$8 sps:$4 sm:$0xff]   ;;  %v7112_v22 = vld [vmem:[%s9187_s11 + $0xe4] ss:$8 sps:$4 sm:$0xff]  }
 0x431   :  { %v7014_v17 = vld [vmem:[#allocation3 + $0x5c8] ss:$16 sps:$4 sm:$0xff]  }
 0x432   :  { %5001 = vmatpush1.bf16.msra.mxu0 %v6960_v2  ;;  %v7106_v2 = vld [vmem:[%s9187_s11 + $0xc4] ss:$8 sps:$4 sm:$0xff]  }
 0x433   :  { %5002 = vmatprep.subr.bf16.mxu0 %v6968_v47  ;;  %5098 = vmatpush1.bf16.msra.mxu1 %v6975_v30  ;;  %v7019_v47 = vld [vmem:[#allocation3 + $0x5ec] ss:$16 sps:$4 sm:$0xff]   ;;  %v7017_v59 = vld [vmem:[#allocation3 + $0x5e8] ss:$16 sps:$4 sm:$0xff]  }
 0x434   :  { %5099 = vmatprep.subr.bf16.mxu1 %v6980_v31  ;;  %v7104_v30 = vld [vmem:[%s9187_s11 + $0xc0] ss:$8 sps:$4 sm:$0xff]  }
 0x435   :  { %v7022_v31 = vld [vmem:[#allocation3 + $0x60c] ss:$16 sps:$4 sm:$0xff]  }
 0x436   :  { %5003 = vmatpush1.bf16.msra.mxu0 %v6966_v3  ;;  %v7107_v3 = vld [vmem:[%s9187_s11 + $0xd0] ss:$8 sps:$4 sm:$0xff]  }
 0x437   :  { %5100 = vmatpush1.bf16.msra.mxu1 %v6978_v0  ;;  %5577 = vmatprep.subr.bf16.mxu0 %v7070_v48  ;;  %v7020_v0 = vld [vmem:[#allocation3 + $0x608] ss:$16 sps:$4 sm:$0xff]   ;;  %v7025_v48 = vld [vmem:[#allocation3 + $0x62c] ss:$16 sps:$4 sm:$0xff]  }
 0x438   :  { %5101 = vmatprep.subr.bf16.mxu1 %v6983_v12  ;;  %v7110_v12 = vld [vmem:[%s9187_s11 + $0xe0] ss:$8 sps:$4 sm:$0xff]  }
 0x439   :  { %5005 = vmatmul.mubr.bf16.vlgmr.msra.gmra.mrb[32].mxu0 %v8958_v25 }
 0x43a   :  { %5578 = vmatpush1.bf16.msra.mxu0 %v7068_v41  ;;  %v7023_v41 = vld [vmem:[#allocation3 + $0x628] ss:$16 sps:$4 sm:$0xff]  }
 0x43b   :  { %5102 = vmatpush1.bf16.msra.mxu1 %v6981_v28  ;;  %5579 = vmatprep.subr.bf16.mxu0 %v7073_v56  ;;  %v7028_v28 = vld [vmem:[#allocation3 + $0x64c] ss:$16 sps:$4 sm:$0xff]   ;;  %v7026_v56 = vld [vmem:[#allocation3 + $0x648] ss:$16 sps:$4 sm:$0xff]  }
 0x43c   :  { %5103 = vmatprep.subr.bf16.mxu1 %v6986_v54  ;;  %v7031_v54 = vld [vmem:[#allocation3 + $0x66c] ss:$16 sps:$4 sm:$0xff]  }
 0x43e   :  { %5580 = vmatpush1.bf16.msra.mxu0 %v7071_v10  ;;  %v7029_v10 = vld [vmem:[#allocation3 + $0x668] ss:$16 sps:$4 sm:$0xff]  }
 0x43f   :  { %5104 = vmatpush1.bf16.msra.mxu1 %v6984_v57  ;;  %5581 = vmatprep.subr.bf16.mxu0 %v7076_v49  ;;  %v7032_v57 = vld [vmem:[#allocation3 + $0x688] ss:$16 sps:$4 sm:$0xff]   ;;  %v7037_v49 = vld [vmem:[#allocation3 + $0x6ac] ss:$16 sps:$4 sm:$0xff]  }
 0x440   :  { %5105 = vmatprep.subr.bf16.mxu1 %v6989_v23  ;;  %v7035_v23 = vld [vmem:[#allocation3 + $0x6a8] ss:$16 sps:$4 sm:$0xff]  }
 0x442   :  { %5582 = vmatpush1.bf16.msra.mxu0 %v7074_v9 }
 0x443   :  { %5106 = vmatpush1.bf16.msra.mxu1 %v6987_v50  ;;  %5583 = vmatprep.subr.bf16.mxu0 %v7079_v63 }
 0x444   :  { %5107 = vmatprep.subr.bf16.mxu1 %v6992_v45  ;;  %v7038_v45 = vld [vmem:[#allocation3 + $0x6c8] ss:$16 sps:$4 sm:$0xff]  }
 0x446   :  { %5584 = vmatpush1.bf16.msra.mxu0 %v7077_v35 }
 0x447   :  { %5108 = vmatpush1.bf16.msra.mxu1 %v6990_v13  ;;  %5585 = vmatprep.subr.bf16.mxu0 %v7082_v21  ;;  %v7043_v13 = vld [vmem:[#allocation3 + $0x6ec] ss:$16 sps:$4 sm:$0xff]   ;;  %v7041_v21 = vld [vmem:[#allocation3 + $0x6e8] ss:$16 sps:$4 sm:$0xff]  }
 0x448   :  { %5109 = vmatprep.subr.bf16.mxu1 %v6995_v19  ;;  %v7046_v19 = vld [vmem:[#allocation3 + $0x70c] ss:$16 sps:$4 sm:$0xff]  }
 0x44a   :  { %5586 = vmatpush1.bf16.msra.mxu0 %v7080_v6  ;;  %v7044_v6 = vld [vmem:[#allocation3 + $0x708] ss:$16 sps:$4 sm:$0xff]  }
 0x44b   :  { %5110 = vmatpush1.bf16.msra.mxu1 %v6993_v53  ;;  %5587 = vmatprep.subr.bf16.mxu0 %v7085_v5  ;;  %v7049_v53 = vld [vmem:[#allocation3 + $0x72c] ss:$16 sps:$4 sm:$0xff]   ;;  %v7047_v5 = vld [vmem:[#allocation3 + $0x728] ss:$16 sps:$4 sm:$0xff]  }
 0x44c   :  { %5111 = vmatprep.subr.bf16.mxu1 %v6998_v44  ;;  %v7052_v44 = vld [vmem:[#allocation3 + $0x74c] ss:$16 sps:$4 sm:$0xff]  }
 0x44e   :  { %5588 = vmatpush1.bf16.msra.mxu0 %v7083_v43  ;;  %v7113_v43 = vld [vmem:[%s9187_s11 + $0xf0] ss:$8 sps:$4 sm:$0xff]  }
 0x44f   :  { %5112 = vmatpush1.bf16.msra.mxu1 %v6996_v18  ;;  %5589 = vmatprep.subr.bf16.mxu0 %v7088_v55  ;;  %v7115_v18 = vld [vmem:[%s9187_s11 + $0xf4] ss:$8 sps:$4 sm:$0xff]  }
 0x450   :  { %5113 = vmatprep.subr.bf16.mxu1 %v7001_v16  ;;  %v7050_v55 = vld [vmem:[#allocation3 + $0x748] ss:$16 sps:$4 sm:$0xff]  }
 0x451   :  { %v7118_v16 = vld [vmem:[%s9187_s11 + $0x104] ss:$8 sps:$4 sm:$0xff]  }
 0x452   :  { %5590 = vmatpush1.bf16.msra.mxu0 %v7086_v46  ;;  %v7055_v46 = vld [vmem:[#allocation3 + $0x76c] ss:$16 sps:$4 sm:$0xff]  }
 0x453   :  { %5114 = vmatpush1.bf16.msra.mxu1 %v6999_v4  ;;  %5591 = vmatprep.subr.bf16.mxu0 %v7091_v39  ;;  %v7053_v4 = vld [vmem:[#allocation3 + $0x768] ss:$16 sps:$4 sm:$0xff]   ;;  %v7058_v39 = vld [vmem:[#allocation3 + $0x78c] ss:$16 sps:$4 sm:$0xff]  }
 0x454   :  { %5115 = vmatprep.subr.bf16.mxu1 %v7004_v8  ;;  %v7056_v8 = vld [vmem:[#allocation3 + $0x788] ss:$16 sps:$4 sm:$0xff]  }
 0x456   :  { %5592 = vmatpush1.bf16.msra.mxu0 %v7089_v60  ;;  %v7061_v60 = vld [vmem:[#allocation3 + $0x7ac] ss:$16 sps:$4 sm:$0xff]  }
 0x457   :  { %5116 = vmatpush1.bf16.msra.mxu1 %v7002_v7  ;;  %5593 = vmatprep.subr.bf16.mxu0 %v7094_v26  ;;  %v7059_v7 = vld [vmem:[#allocation3 + $0x7a8] ss:$16 sps:$4 sm:$0xff]   ;;  %v7064_v26 = vld [vmem:[#allocation3 + $0x7cc] ss:$16 sps:$4 sm:$0xff]  }
 0x458   :  { %5117 = vmatprep.subr.bf16.mxu1 %v7007_v38  ;;  %v7062_v38 = vld [vmem:[#allocation3 + $0x7c8] ss:$16 sps:$4 sm:$0xff]  }
 0x45a   :  { %5594 = vmatpush1.bf16.msra.mxu0 %v7092_v36  ;;  %v7067_v36 = vld [vmem:[#allocation3 + $0x7ec] ss:$16 sps:$4 sm:$0xff]  }
 0x45b   :  { %5118 = vmatpush1.bf16.msra.mxu1 %v7005_v61  ;;  %5595 = vmatprep.subr.bf16.mxu0 %v7097_v32  ;;  %v7065_v61 = vld [vmem:[#allocation3 + $0x7e8] ss:$16 sps:$4 sm:$0xff]   ;;  %v9060_v32 = vld [vmem:[%s9186_s10] sm:$0xf] }
 0x45c   :  { %5119 = vmatprep.subr.bf16.mxu1 %v7010_v20  ;;  %v3496_v20 = vrot.slane %v9060_v32, %v9529_v52 }
 0x45e   :  { %5596 = vmatpush1.bf16.msra.mxu0 %v7095_v40  ;;  %v3500_v40 = vrot.slane %v9060_v32, %v9531_v51 }
 0x45f   :  { %5120 = vmatpush1.bf16.msra.mxu1 %v7008_v62  ;;  %5597 = vmatprep.subr.bf16.mxu0 %v7100_v1 }
 0x460   :  { %5121 = vmatprep.subr.bf16.mxu1 %v7013_v58 }
 0x462   :  { %5598 = vmatpush1.bf16.msra.mxu0 %v7098_v34 }
 0x463   :  { %5122 = vmatpush1.bf16.msra.mxu1 %v7011_v14  ;;  %5599 = vmatprep.subr.bf16.mxu0 %v7103_v33 }
 0x464   :  { %5123 = vmatprep.subr.bf16.mxu1 %v7016_v15 }
 0x466   :  { %5600 = vmatpush1.bf16.msra.mxu0 %v7101_v37 }
 0x467   :  { %5124 = vmatpush1.bf16.msra.mxu1 %v7014_v17  ;;  %5601 = vmatprep.subr.bf16.mxu0 %v7106_v2  ;;  %v7116_v17 = vld [vmem:[%s9187_s11 + $0x100] ss:$8 sps:$4 sm:$0xff]  }
 0x468   :  { %5125 = vmatprep.subr.bf16.mxu1 %v7019_v47  ;;  %v7121_v47 = vld [vmem:[%s9187_s11 + $0x114] ss:$8 sps:$4 sm:$0xff]  }
 0x46a   :  { %5602 = vmatpush1.bf16.msra.mxu0 %v7104_v30  ;;  %v7119_v30 = vld [vmem:[%s9187_s11 + $0x110] ss:$8 sps:$4 sm:$0xff]  }
 0x46b   :  { %5126 = vmatpush1.bf16.msra.mxu1 %v7017_v59  ;;  %5603 = vmatprep.subr.bf16.mxu0 %v7109_v42  ;;  %v7124_v59 = vld [vmem:[%s9187_s11 + $0x124] ss:$8 sps:$4 sm:$0xff]   ;;  %v7122_v42 = vld [vmem:[%s9187_s11 + $0x120] ss:$8 sps:$4 sm:$0xff]  }
 0x46c   :  { %5136 = vmatprep.subr.bf16.mxu1 %v7022_v31  ;;  %v7127_v31 = vld [vmem:[%s9187_s11 + $0x134] ss:$8 sps:$4 sm:$0xff]  }
 0x46e   :  { %5128 = vmatmul.mubr.bf16.vlgmr.msra.gmra.mrb[36].mxu1 %v8931_v11  ;;  %5604 = vmatpush1.bf16.msra.mxu0 %v7107_v3  ;;  %v7034_v11 = vld [vmem:[#allocation3 + $0x68c] ss:$16 sps:$4 sm:$0xff]  }
 0x46f   :  { %5137 = vmatpush1.bf16.msra.mxu1 %v7020_v0  ;;  %5168 = vmatprep.mubr.bf16.mxu1 %v8933_v27  ;;  %v7040_v27 = vld [vmem:[#allocation3 + $0x6cc] ss:$16 sps:$4 sm:$0xff]  }
 0x470   :  { %5138 = vmatprep.subr.bf16.mxu1 %v7025_v48  ;;  %5605 = vmatprep.subr.bf16.mxu0 %v7112_v22  ;;  %v7125_v3 = vld [vmem:[%s9187_s11 + $0x130] ss:$8 sps:$4 sm:$0xff]   ;;  %v7130_v0 = vld [vmem:[%s9187_s11 + $0x144] ss:$8 sps:$4 sm:$0xff]   ;;  %v7128_v48 = vld [vmem:[%s9187_s11 + $0x140] ss:$8 sps:$4 sm:$0xff]  }
 0x471   :  { %v7133_v22 = vld [vmem:[%s9187_s11 + $0x154] ss:$8 sps:$4 sm:$0xff]  }
 0x472   :  { %5606 = vmatpush1.bf16.msra.mxu0 %v7110_v12  ;;  %v7131_v12 = vld [vmem:[%s9187_s11 + $0x150] ss:$8 sps:$4 sm:$0xff]  }
 0x473   :  { %5139 = vmatpush1.bf16.msra.mxu1 %v7023_v41  ;;  %5607 = vmatprep.subr.bf16.mxu0 %v7115_v18  ;;  %v7136_v41 = vld [vmem:[%s9187_s11 + $0x164] ss:$8 sps:$4 sm:$0xff]  }
 0x474   :  { %5140 = vmatprep.subr.bf16.mxu1 %v7028_v28  ;;  %v7134_v28 = vld [vmem:[%s9187_s11 + $0x160] ss:$8 sps:$4 sm:$0xff]  }
 0x476   :  { %5608 = vmatpush1.bf16.msra.mxu0 %v7113_v43 }
 0x477   :  { %5141 = vmatpush1.bf16.msra.mxu1 %v7026_v56  ;;  %5618 = vmatprep.subr.bf16.mxu0 %v7118_v16  ;;  %v7139_v56 = vld [vmem:[%s9187_s11 + $0x174] ss:$8 sps:$4 sm:$0xff]  }
 0x478   :  { %5142 = vmatprep.subr.bf16.mxu1 %v7031_v54  ;;  %v7137_v54 = vld [vmem:[%s9187_s11 + $0x170] ss:$8 sps:$4 sm:$0xff]  }
 0x47b   :  { %5143 = vmatpush1.bf16.msra.mxu1 %v7029_v10  ;;  %v7142_v10 = vld [vmem:[%s9187_s11 + $0x184] ss:$8 sps:$4 sm:$0xff]  }
 0x47c   :  { %5144 = vmatprep.subr.bf16.mxu1 %v7034_v11  ;;  %v7140_v11 = vld [vmem:[%s9187_s11 + $0x180] ss:$8 sps:$4 sm:$0xff]  }
 0x47f   :  { %5145 = vmatpush1.bf16.msra.mxu1 %v7032_v57  ;;  %v7145_v57 = vld [vmem:[%s9187_s11 + $0x194] ss:$8 sps:$4 sm:$0xff]  }
 0x480   :  { %5146 = vmatprep.subr.bf16.mxu1 %v7037_v49  ;;  %v4883_v9 = vpop.f32.mrb[32].mxu1  ;;  %v7143_v49 = vld [vmem:[%s9187_s11 + $0x190] ss:$8 sps:$4 sm:$0xff]  }
 0x481   :  { %v4885_v50 = vpop.f32.mrb[33].mxu1  ;;  %v4884_v62 = vadd.f32 %v4883_v9, %v3496_v20  ;;  %v7151_v9 = vld [vmem:[%s9187_s11 + $0x1b4] ss:$8 sps:$4 sm:$0xff]  }
 0x482   :  { %v4887_v63 = vpop.f32.mrb[34].mxu1  ;;  %v4886_v1 = vadd.f32 %v4885_v50, %v3500_v40  ;;  %v7149_v50 = vld [vmem:[%s9187_s11 + $0x1b0] ss:$8 sps:$4 sm:$0xff]  }
 0x483   :  { %5147 = vmatpush1.bf16.msra.mxu1 %v7035_v23  ;;  %v4888_v35 = vpop.f32.mrb[35].mxu1  ;;  %v7148_v23 = vld [vmem:[%s9187_s11 + $0x1a4] ss:$8 sps:$4 sm:$0xff]  }
 0x484   :  { %5148 = vmatprep.subr.bf16.mxu1 %v7040_v27  ;;  %v7146_v27 = vld [vmem:[%s9187_s11 + $0x1a0] ss:$8 sps:$4 sm:$0xff]   ;;  %v7154_v63 = vld [vmem:[%s9187_s11 + $0x1c4] ss:$8 sps:$4 sm:$0xff]   ;;  %v7157_v35 = vld [vmem:[%s9187_s11 + $0x1d4] ss:$8 sps:$4 sm:$0xff]  }
 0x487   :  { %5149 = vmatpush1.bf16.msra.mxu1 %v7038_v45  ;;  %v7152_v45 = vld [vmem:[%s9187_s11 + $0x1c0] ss:$8 sps:$4 sm:$0xff]  }
 0x488   :  { %5150 = vmatprep.subr.bf16.mxu1 %v7043_v13  ;;  %v7155_v13 = vld [vmem:[%s9187_s11 + $0x1d0] ss:$8 sps:$4 sm:$0xff]  }
 0x48b   :  { %5151 = vmatpush1.bf16.msra.mxu1 %v7041_v21  ;;  %v7160_v21 = vld [vmem:[%s9187_s11 + $0x1e4] ss:$8 sps:$4 sm:$0xff]  }
 0x48c   :  { %5152 = vmatprep.subr.bf16.mxu1 %v7046_v19  ;;  %v7158_v19 = vld [vmem:[%s9187_s11 + $0x1e0] ss:$8 sps:$4 sm:$0xff]  }
 0x48f   :  { %5153 = vmatpush1.bf16.msra.mxu1 %v7044_v6  ;;  %v7163_v6 = vld [vmem:[%s9187_s11 + $0x1f4] ss:$8 sps:$4 sm:$0xff]  }
 0x490   :  { %5154 = vmatprep.subr.bf16.mxu1 %v7049_v53  ;;  %v7161_v53 = vld [vmem:[%s9187_s11 + $0x1f0] ss:$8 sps:$4 sm:$0xff]  }
 0x493   :  { %5155 = vmatpush1.bf16.msra.mxu1 %v7047_v5  ;;  %v3504_v5 = vrot.slane %v9060_v32, %v9530_v24  ;;  %v5659_v24 = vld [vmem:[%s9189_s13] sm:$0x3] }
 0x494   :  { %5156 = vmatprep.subr.bf16.mxu1 %v7052_v44  ;;  %v3508_v44 = vrot.slane %v9060_v32, %v9532_v29 }
 0x497   :  { %5157 = vmatpush1.bf16.msra.mxu1 %v7050_v55 }
 0x498   :  { %5158 = vmatprep.subr.bf16.mxu1 %v7055_v46 }
 0x49b   :  { %5159 = vmatpush1.bf16.msra.mxu1 %v7053_v4 }
 0x49c   :  { %5160 = vmatprep.subr.bf16.mxu1 %v7058_v39 }
 0x49f   :  { %5161 = vmatpush1.bf16.msra.mxu1 %v7056_v8 }
 0x4a0   :  { %5162 = vmatprep.subr.bf16.mxu1 %v7061_v60  ;;  %v5245_v60 = vld [vmem:[%s9188_s12] sm:$0x3] }
 0x4a1   :  { %v5250_v29 = vrot.slane %v5245_v60, %v9529_v52 }
 0x4a3   :  { %5163 = vmatpush1.bf16.msra.mxu1 %v7059_v7  ;;  %v5254_v7 = vrot.slane %v5245_v60, %v9531_v51 }
 0x4a4   :  { %5164 = vmatprep.subr.bf16.mxu1 %v7064_v26  ;;  %v5664_v26 = vrot.slane %v5659_v24, %v9529_v52 }
 0x4a7   :  { %5165 = vmatpush1.bf16.msra.mxu1 %v7062_v38 }
 0x4a8   :  { %5166 = vmatprep.subr.bf16.mxu1 %v7067_v36  ;;  %v5668_v36 = vrot.slane %v5659_v24, %v9531_v51 }
 0x4ab   :  { %5167 = vmatpush1.bf16.msra.mxu1 %v7065_v61 }
 0x4ae   :  { %5169 = vmatmul.mubr.bf16.vlgmr.msra.gmra.mrb[36].mxu1 %v8958_v25 }
 0x50c   :  { %v5006_v58 = vpop.f32.mrb[32].mxu0 }
 0x50d   :  { %v6647_v34 = vadd.f32 %v5006_v58, %v4884_v62  ;;  %v5008_v14 = vpop.f32.mrb[33].mxu0 }
 0x50e   :  { %v6649_v33 = vadd.f32 %v5008_v14, %v4886_v1  ;;  %v5010_v15 = vpop.f32.mrb[34].mxu0 }
 0x50f   :  { %v5011_v37 = vpop.f32.mrb[35].mxu0  ;;  %v5177_v2 = vpack.c.bf16 %v6647_v34, %v6647_v34  ;;  %v6077_v15 = vld [vmem:[#allocation2] ss:$0 sm:$0xff] }
 0x510   :  { %v5178_v25 = vpack.c.bf16 %v6649_v33, %v6649_v33 }
 0x512   :  { %5609 = vmatprep.mubr.bf16.mxu0 %v5178_v25 }
 0x513   :  { %5610 = vmatmul.mubr.bf16.vlgmr.msra.gmra.mrb[36].mxu0 %v5177_v2 }
 0x514   :  { %5619 = vmatpush1.bf16.msra.mxu0 %v7116_v17 }
 0x515   :  { %5620 = vmatprep.subr.bf16.mxu0 %v7121_v47 }
 0x518   :  { %5621 = vmatpush1.bf16.msra.mxu0 %v7119_v30 }
 0x519   :  { %5622 = vmatprep.subr.bf16.mxu0 %v7124_v59 }
 0x51c   :  { %5623 = vmatpush1.bf16.msra.mxu0 %v7122_v42 }
 0x51d   :  { %5624 = vmatprep.subr.bf16.mxu0 %v7127_v31 }
 0x520   :  { %5625 = vmatpush1.bf16.msra.mxu0 %v7125_v3 }
 0x521   :  { %5626 = vmatprep.subr.bf16.mxu0 %v7130_v0 }
 0x524   :  { %5627 = vmatpush1.bf16.msra.mxu0 %v7128_v48 }
 0x525   :  { %5628 = vmatprep.subr.bf16.mxu0 %v7133_v22 }
 0x528   :  { %5629 = vmatpush1.bf16.msra.mxu0 %v7131_v12 }
 0x529   :  { %5630 = vmatprep.subr.bf16.mxu0 %v7136_v41 }
 0x52c   :  { %5631 = vmatpush1.bf16.msra.mxu0 %v7134_v28 }
 0x52d   :  { %5632 = vmatprep.subr.bf16.mxu0 %v7139_v56 }
 0x530   :  { %5633 = vmatpush1.bf16.msra.mxu0 %v7137_v54 }
 0x531   :  { %5634 = vmatprep.subr.bf16.mxu0 %v7142_v10 }
 0x534   :  { %5635 = vmatpush1.bf16.msra.mxu0 %v7140_v11 }
 0x535   :  { %5636 = vmatprep.subr.bf16.mxu0 %v7145_v57 }
 0x538   :  { %5637 = vmatpush1.bf16.msra.mxu0 %v7143_v49 }
 0x539   :  { %5638 = vmatprep.subr.bf16.mxu0 %v7148_v23 }
 0x53c   :  { %5639 = vmatpush1.bf16.msra.mxu0 %v7146_v27 }
 0x53d   :  { %5640 = vmatprep.subr.bf16.mxu0 %v7151_v9 }
 0x540   :  { %5641 = vmatpush1.bf16.msra.mxu0 %v7149_v50 }
 0x541   :  { %5642 = vmatprep.subr.bf16.mxu0 %v7154_v63 }
 0x544   :  { %5643 = vmatpush1.bf16.msra.mxu0 %v7152_v45 }
 0x545   :  { %5644 = vmatprep.subr.bf16.mxu0 %v7157_v35 }
 0x548   :  { %5645 = vmatpush1.bf16.msra.mxu0 %v7155_v13 }
 0x549   :  { %5646 = vmatprep.subr.bf16.mxu0 %v7160_v21 }
 0x54c   :  { %5647 = vmatpush1.bf16.msra.mxu0 %v7158_v19 }
 0x54d   :  { %5648 = vmatprep.subr.bf16.mxu0 %v7163_v6 }
 0x550   :  { %5649 = vmatpush1.bf16.msra.mxu0 %v7161_v53 }
 0x581   :  { %v5170_v43 = vpop.f32.mrb[36].mxu1 }
 0x582   :  { %v6650_v18 = vadd.f32 %v5170_v43, %v3504_v5  ;;  %v5172_v55 = vpop.f32.mrb[37].mxu1 }
 0x583   :  { %v6651_v16 = vadd.f32 %v5172_v55, %v3508_v44  ;;  %v5174_v46 = vpop.f32.mrb[38].mxu1 }
 0x584   :  { %v5175_v4 = vpop.f32.mrb[39].mxu1  ;;  %v5179_v8 = vpack.c.bf16 %v6650_v18, %v6650_v18 }
 0x585   :  { %v5180_v39 = vpack.c.bf16 %v6651_v16, %v6651_v16 }
 0x587   :  { %5650 = vmatprep.mubr.bf16.mxu0 %v5180_v39 }
 0x588   :  { %5651 = vmatmul.mubr.bf16.vlgmr.msra.gmra.mrb[36].mxu0 %v5179_v8 }
 0x65b   :  { %v5652_v38 = vpop.f32.mrb[36].mxu0 }
 0x65c   :  { %v6652_v61 = vadd.f32 %v5652_v38, %v5250_v29  ;;  %v5654_v32 = vpop.f32.mrb[37].mxu0 }
 0x65d   :  { %v6653_v20 = vadd.f32 %v5654_v32, %v5254_v7  ;;  %v5656_v40 = vpop.f32.mrb[38].mxu0 }
 0x65e   :  { %v5671_v62 = vmul.f32 %v6652_v61, %v5664_v26  ;;  %v5657_v1 = vpop.f32.mrb[39].mxu0 }
 0x65f   :  { %v5672_v58 = vmul.f32 %v6653_v20, %v5668_v36 }
 0x660   :  { %v5674_v34 = vsel %vm5673_vm3, %v5671_v62, 0.0 }
 0x661   :  { %v5675_v14 = vsel %vm5673_vm3, %v5672_v58, 0.0 }
 0x662   :  { %v5676_v33 = vadd.f32 %v5675_v14, %v5674_v34 }
 0x664   :  { %5677 = vadd.xlane.f32.xlu0 %v5676_v33 }
 0x6f1   :  { %v5678_v37 = vpop.xlane.xlu0 %5677 }
 0x6f2   :  { %v5686_v25 = vadd.f32 %v6077_v15, %v5678_v37 }
 0x6f4   :  { %v5688_v17 = vand.u32 2147483647, %v5686_v25  ;;  %v5687_v48 = vmax.f32 %v5686_v25, 0.0 }
 0x6f6   :  { %v5689_v52 = vsub.f32 0.0, %v5688_v17 }
 0x6f8   :  { %v5690_v2 = vmul.f32 1.442695, %v5689_v52 }
 0x6fa   :  { %7166 = vpow2.f32 %v5690_v2 }
 0x704   :  { %v7167_v51 = vpop.eup %7166 }
 0x705   :  { %v5692_v47 = vadd.f32 1.0, %v7167_v51  ;;  %v5695_v30 = vmul.f32 -0.5, %v7167_v51  ;;  %v5698_v42 = vand.u32 2147483647, %v7167_v51 }
 0x707   :  { %7168 = vlog2.f32 %v5692_v47  ;;  %v5696_v59 = vadd.f32 1.0, %v5695_v30  ;;  %vm5699_vm4 = vcmp.lt.f32.partialorder %v5698_v42, 0.0004427343 }
 0x709   :  { %v5697_v0 = vmul.f32 %v7167_v51, %v5696_v59 }
 0x711   :  { %v7169_v31 = vpop.eup %7168 }
 0x712   :  { %v5694_v3 = vmul.f32 0.6931472, %v7169_v31 }
 0x714   :  { %v5700_v22 = vsel %vm5699_vm4, %v5697_v0, %v5694_v3 }
 0x715   :  { %v5701_v12 = vadd.f32 %v5700_v22, %v5687_v48 }
 0x717   :  { %5703 = vst.msk [vmem:[%s9191_s15] sm:$0x3] %vm5702_vm5, %v5701_v12 }
 0x718   :  { %5708 = vsyncpa [#allocation4], 1 }

</bundles_post_ra>
